<compile_context>
chip_gen: v5e
topology: v5e:2x2
jax: 0.10.0
libtpu: 0.0.40
codegen_flags: <defaults>
</compile_context>

<pallas_src>
import functools
import math

import jax
import jax.numpy as jnp
from jax import lax
from jax.experimental import pallas as pl
from jax.experimental.pallas import tpu as pltpu

LANE = 128
SUBLANE = 8


def _round_up(x, m):
    return (x + m - 1) // m * m


# ----------------------- fused bidirectional GRU kernel ---------------------- #

def _bi_gru_kernel(x_ref, wi_ref, wh_ref, bi_ref, bh_ref, out_ref, gi_ref, *,
                   seq_len, batch_pad, hidden_pad, unroll):
    """One GRU direction per grid step (grid axis 0 = direction, 'parallel').

    x_ref : (L*Bp, E)  bf16   time-major input, batch padded to Bp sublanes
    wi_ref: (E, 3*Hp)  bf16   fused input->gate weights  [r | z | n]
    wh_ref: (Hp, 3*Hp) bf16   fused hidden->gate weights [r | z | n]
    bi/bh : (1, 3*Hp)  f32
    out   : (L, Bp, Hp) f32   hidden states (lane-dense (8,128) stores)
    gi_ref: (L*Bp, 3*Hp) f32  VMEM scratch holding the hoisted input projection
    """
    L, Bp, Hp = seq_len, batch_pad, hidden_pad

    # Hoisted input projection: one large MXU matmul over every timestep
    # (bf16 inputs, f32 accumulation) instead of 3 tiny matmuls per step.
    gi_ref[...] = (
        jnp.dot(x_ref[...], wi_ref[...], preferred_element_type=jnp.float32)
        + bi_ref[...]
    )

    wh = wh_ref[...]                       # resident across the recurrence
    bh = bh_ref[...]

    def step(t, h):
        row = pl.multiple_of(t * Bp, Bp)
        gi = gi_ref[pl.ds(row, Bp), :]                         # (Bp, 3Hp) f32
        # single fused hidden-gate matmul per timestep
        gh = jnp.dot(h.astype(wh.dtype), wh,
                     preferred_element_type=jnp.float32) + bh  # (Bp, 3Hp)
        r = jax.nn.sigmoid(gi[:, :Hp] + gh[:, :Hp])
        z = jax.nn.sigmoid(gi[:, Hp:2 * Hp] + gh[:, Hp:2 * Hp])
        n = jnp.tanh(gi[:, 2 * Hp:] + r * gh[:, 2 * Hp:])
        h_new = (1.0 - z) * n + z * h                          # f32 gate math
        out_ref[t] = h_new                                     # full-width vst
        return h_new

    lax.fori_loop(0, L, step, jnp.zeros((Bp, Hp), jnp.float32), unroll=unroll)


def _prep_gru_weights(dir_params, hidden, hidden_pad, input_size):
    """PyTorch-layout GRU weights -> fused, lane-padded, MXU-friendly layout."""
    H, Hp, E = hidden, hidden_pad, input_size

    def pad_gates(w, in_dim, in_pad):
        # w: (3H, in_dim) -> (in_pad, 3*Hp), gate-major along the last axis.
        w3 = jnp.transpose(w.reshape(3, H, in_dim), (2, 0, 1))       # (in, 3, H)
        w3 = jnp.pad(w3, ((0, in_pad - in_dim), (0, 0), (0, Hp - H)))
        return w3.reshape(in_pad, 3 * Hp)

    def pad_bias(b):
        b3 = jnp.pad(b.reshape(3, H), ((0, 0), (0, Hp - H)))
        return b3.reshape(1, 3 * Hp)

    return dict(
        wi=pad_gates(dir_params["w_ih"], E, E).astype(jnp.bfloat16),
        wh=pad_gates(dir_params["w_hh"], H, Hp).astype(jnp.bfloat16),
        bi=pad_bias(dir_params["b_ih"]).astype(jnp.float32),
        bh=pad_bias(dir_params["b_hh"]).astype(jnp.float32),
    )


def _stack_dirs(p_fwd, p_bwd):
    return {k: jnp.stack([p_fwd[k], p_bwd[k]], axis=0) for k in p_fwd}


def bi_gru(x, lengths, w_stacked, *, hidden_pad, unroll):
    """x: (B, L, E) f32.  Returns (h_fwd, h_bwd_rev) each (B, L, Hp) f32
    (forward states; backward states in reversed time order), plus the
    per-batch reversal indices and the validity mask."""
    B, L, E = x.shape
    Bp = max(SUBLANE, _round_up(B, SUBLANE))
    Hp = hidden_pad
    G = 3 * Hp
    LB = L * Bp

    # pack/pad semantics: reverse only the valid prefix per batch element
    # (data-dependent gather stays in XLA glue).
    t = jnp.arange(L)[None, :]
    valid = t < lengths[:, None]                               # (B, L) bool
    rev_idx = jnp.where(valid, lengths[:, None] - 1 - t, t)    # (B, L)
    x_rev = jnp.take_along_axis(x, rev_idx[:, :, None], axis=1)

    def prep(xx):  # (B, L, E) -> (L*Bp, E) time-major, batch padded to Bp
        xx = jnp.pad(xx, ((0, Bp - B), (0, 0), (0, 0)))
        return jnp.transpose(xx, (1, 0, 2)).reshape(LB, E)

    x_dirs = jnp.stack([prep(x), prep(x_rev)], axis=0).astype(jnp.bfloat16)

    kernel = functools.partial(_bi_gru_kernel, seq_len=L, batch_pad=Bp,
                               hidden_pad=Hp, unroll=unroll)
    out = pl.pallas_call(
        kernel,
        out_shape=jax.ShapeDtypeStruct((2, L, Bp, Hp), jnp.float32),
        grid_spec=pltpu.PrefetchScalarGridSpec(
            num_scalar_prefetch=0,
            grid=(2,),                                   # direction axis
            in_specs=[
                pl.BlockSpec((None, LB, E), lambda d: (d, 0, 0)),
                pl.BlockSpec((None, E, G), lambda d: (d, 0, 0)),
                pl.BlockSpec((None, Hp, G), lambda d: (d, 0, 0)),
                pl.BlockSpec((None, 1, G), lambda d: (d, 0, 0)),
                pl.BlockSpec((None, 1, G), lambda d: (d, 0, 0)),
            ],
            out_specs=pl.BlockSpec((None, L, Bp, Hp), lambda d: (d, 0, 0, 0)),
            scratch_shapes=[pltpu.VMEM((LB, G), jnp.float32)],
        ),
        compiler_params=pltpu.CompilerParams(
            dimension_semantics=("parallel",)),
    )(x_dirs, w_stacked["wi"], w_stacked["wh"], w_stacked["bi"], w_stacked["bh"])

    h_fwd = jnp.transpose(out[0, :, :B, :], (1, 0, 2))         # (B, L, Hp)
    h_bwd_rev = jnp.transpose(out[1, :, :B, :], (1, 0, 2))     # (B, L, Hp)
    return h_fwd, h_bwd_rev, rev_idx, valid


# -------------- fused bilinear attention + masked log-softmax ---------------- #

def _attention_kernel(pt_ref, w_ref, b_ref, q_ref, mask_ref, out_ref):
    """One attention head (start/end) per grid step ('parallel').

    pt_ref : (B, D, Lcp) bf16   passage encodings, Lc lane-padded
    w_ref  : (D, D) f32, b_ref: (1, D) f32, q_ref: (B, D) f32
    mask   : (B, Lcp) f32, out: (B, Lcp) f32 log-probabilities
    """
    q = q_ref[...]                                                  # (B, D)
    # Bilinear restructure: logits = p . (q @ W) + q.b
    v = jnp.dot(q, w_ref[...], preferred_element_type=jnp.float32)  # (B, D)
    bq = jnp.sum(q * b_ref[...], axis=-1, keepdims=True)            # (B, 1)
    v16 = v.astype(jnp.bfloat16)

    B = q.shape[0]
    # Per-batch (1,D)@(D,Lcp) contractions on the MXU (B is tiny and static);
    # output is lane-dense over Lcp.
    rows = [
        jnp.dot(v16[b:b + 1, :], pt_ref[b], preferred_element_type=jnp.float32)
        for b in range(B)
    ]
    logits = jnp.concatenate(rows, axis=0) + bq                     # (B, Lcp)

    mask = mask_ref[...]
    masked = mask * logits + (1.0 - mask) * (-1e30)
    m = jnp.max(masked, axis=-1, keepdims=True)
    s = masked - m
    lse = jnp.log(jnp.sum(jnp.exp(s), axis=-1, keepdims=True))
    out_ref[...] = s - lse                                          # log-softmax


def attention_log_softmax(p_i, c_mask, q, w_stack, b_stack):
    """p_i: (B, Lc, D) f32, q: (B, D) f32.  Returns (2, B, Lc) log-probs."""
    B, Lc, D = p_i.shape
    Lcp = _round_up(Lc, LANE)

    p_t = jnp.transpose(p_i, (0, 2, 1))                              # (B, D, Lc)
    p_t = jnp.pad(p_t, ((0, 0), (0, 0), (0, Lcp - Lc))).astype(jnp.bfloat16)
    mask = jnp.pad(c_mask.astype(jnp.float32), ((0, 0), (0, Lcp - Lc)))

    out = pl.pallas_call(
        _attention_kernel,
        out_shape=jax.ShapeDtypeStruct((2, B, Lcp), jnp.float32),
        grid_spec=pltpu.PrefetchScalarGridSpec(
            num_scalar_prefetch=0,
            grid=(2,),                                    # head axis (start/end)
            in_specs=[
                pl.BlockSpec((B, D, Lcp), lambda h: (0, 0, 0)),  # p fetched once
                pl.BlockSpec((None, D, D), lambda h: (h, 0, 0)),
                pl.BlockSpec((None, 1, D), lambda h: (h, 0, 0)),
                pl.BlockSpec((B, D), lambda h: (0, 0)),
                pl.BlockSpec((B, Lcp), lambda h: (0, 0)),
            ],
            out_specs=pl.BlockSpec((None, B, Lcp), lambda h: (h, 0, 0)),
        ),
        compiler_params=pltpu.CompilerParams(
            dimension_semantics=("parallel",)),
    )(p_t, w_stack, b_stack, q, mask)
    return out[:, :, :Lc]


# ------------------------------- model forward -------------------------------- #

def attentive_reader_forward(params, cw_idxs, qw_idxs):
    c_mask = cw_idxs != 0
    q_mask = qw_idxs != 0
    c_len = jnp.sum(c_mask, axis=-1)
    q_len = jnp.sum(q_mask, axis=-1)

    wv = params["word_vectors"]
    c_emb = wv[cw_idxs]                                              # (B, Lc, E)
    q_emb = wv[qw_idxs]                                              # (B, Lq, E)
    # drop_prob = 0.0 -> dropout is the identity.

    H = params["passage"]["fwd"]["w_hh"].shape[1]
    E = wv.shape[1]
    Hp = _round_up(H, LANE)
    Lc = cw_idxs.shape[1]
    Lq = qw_idxs.shape[1]

    pw = _stack_dirs(_prep_gru_weights(params["passage"]["fwd"], H, Hp, E),
                     _prep_gru_weights(params["passage"]["bwd"], H, Hp, E))
    qw = _stack_dirs(_prep_gru_weights(params["query"]["fwd"], H, Hp, E),
                     _prep_gru_weights(params["query"]["bwd"], H, Hp, E))

    # Passage encoder: all hidden states (end_of_seq=False).
    h_fwd, h_bwd_rev, rev_idx, valid = bi_gru(
        c_emb, c_len, pw, hidden_pad=Hp, unroll=True if Lc <= 64 else 8)
    h_bwd = jnp.take_along_axis(h_bwd_rev, rev_idx[:, :, None], axis=1)
    p_i = jnp.concatenate([h_fwd[..., :H], h_bwd[..., :H]], axis=-1)  # (B,Lc,2H)
    p_i = p_i * valid.astype(p_i.dtype)[:, :, None]                   # zero pads

    # Query encoder: final forward/backward states (end_of_seq=True).
    qh_fwd, qh_bwd_rev, _, _ = bi_gru(
        q_emb, q_len, qw, hidden_pad=Hp, unroll=True if Lq <= 64 else 8)
    last = jnp.maximum(q_len - 1, 0)[:, None, None]      # guard q_len == 0
    q_fwd_last = jnp.take_along_axis(qh_fwd[..., :H], last, axis=1)[:, 0, :]
    q_bwd_last = jnp.take_along_axis(qh_bwd_rev[..., :H], last, axis=1)[:, 0, :]
    q = jnp.concatenate([q_fwd_last, q_bwd_last], axis=-1)            # (B, 2H)

    w_stack = jnp.stack([params["att_start"]["w"], params["att_end"]["w"]], 0)
    b_stack = jnp.stack([params["att_start"]["b"], params["att_end"]["b"]], 0)
    log_p = attention_log_softmax(p_i, c_mask, q, w_stack, b_stack[:, None, :])
    return log_p[0], log_p[1]


# ------------------------------ parameter init -------------------------------- #

def init_params(key, vocab, input_size, hidden_size):
    H = hidden_size
    D = 2 * H
    keys = iter(jax.random.split(key, 64))
    s_gru = 1.0 / math.sqrt(H)
    s_att = 1.0 / math.sqrt(D)

    def u(shape, scale):
        return jax.random.uniform(next(keys), shape, jnp.float32, -scale, scale)

    def gru_dir():
        return dict(
            w_ih=u((3 * H, input_size), s_gru),
            w_hh=u((3 * H, H), s_gru),
            b_ih=u((3 * H,), s_gru),
            b_hh=u((3 * H,), s_gru),
        )

    return dict(
        word_vectors=jax.random.normal(next(keys), (vocab, input_size), jnp.float32),
        passage=dict(fwd=gru_dir(), bwd=gru_dir()),
        query=dict(fwd=gru_dir(), bwd=gru_dir()),
        att_start=dict(w=u((D, D), s_att), b=u((D,), s_att)),
        att_end=dict(w=u((D, D), s_att), b=u((D,), s_att)),
    )


# ------------------------------------ main ------------------------------------ #

if __name__ == "__main__":
    V, E, H = 50, 32, 16          # vocab, embedding (input_size), hidden_size
    B, Lc, Lq = 2, 16, 8          # batch, passage len, query len

    params = init_params(jax.random.PRNGKey(0), V, E, H)

    k1, k2 = jax.random.split(jax.random.PRNGKey(0))
    cw_idxs = jax.random.randint(k1, (B, Lc), 1, V)
    qw_idxs = jax.random.randint(k2, (B, Lq), 1, V)
    # trailing padding (idx 0) for one batch element, as the model expects
    cw_idxs = cw_idxs.at[1, Lc - 4:].set(0)
    qw_idxs = qw_idxs.at[1, Lq - 2:].set(0)

    fwd = jax.jit(functools.partial(attentive_reader_forward, params))
    log_p_start, log_p_end = fwd(cw_idxs, qw_idxs)
    jax.block_until_ready((log_p_start, log_p_end))

    assert log_p_start.shape == (B, Lc) and log_p_end.shape == (B, Lc)
    assert bool(jnp.all(jnp.isfinite(log_p_start)))
    assert bool(jnp.all(jnp.isfinite(log_p_end)))
    # log-softmax sanity: probabilities sum to 1 per row
    assert bool(jnp.all(jnp.abs(jnp.exp(log_p_start).sum(-1) - 1.0) < 1e-3))
    assert bool(jnp.all(jnp.abs(jnp.exp(log_p_end).sum(-1) - 1.0) < 1e-3))
    print("KERNEL_OK")
</pallas_src>

<mosaic_0001>
module attributes {stable_mosaic.version = 11 : i64} {
  func.func @_bi_gru_kernel(%arg0: i32, %arg1: memref<1x128x32xbf16, #tpu.memory_space<vmem>>, %arg2: memref<1x32x384xbf16, #tpu.memory_space<vmem>>, %arg3: memref<1x128x384xbf16, #tpu.memory_space<vmem>>, %arg4: memref<1x1x384xf32, #tpu.memory_space<vmem>>, %arg5: memref<1x1x384xf32, #tpu.memory_space<vmem>>, %arg6: memref<1x16x8x128xf32, #tpu.memory_space<vmem>>, %arg7: memref<128x384xf32, #tpu.memory_space<vmem>>) attributes {dimension_semantics = [#tpu.dimension_semantics<parallel>], iteration_bounds = array<i64: 2>, scalar_prefetch = 0 : i64, scratch_operands = 1 : i64, tpu.core_type = #tpu.core_type<tc>, window_params = [{transform_indices = @transform_0, window_bounds = array<i64: 1, 128, 32>}, {transform_indices = @transform_1, window_bounds = array<i64: 1, 32, 384>}, {transform_indices = @transform_2, window_bounds = array<i64: 1, 128, 384>}, {transform_indices = @transform_3, window_bounds = array<i64: 1, 1, 384>}, {transform_indices = @transform_4, window_bounds = array<i64: 1, 1, 384>}, {transform_indices = @transform_5, window_bounds = array<i64: 1, 16, 8, 128>}]} {
    %c0 = arith.constant 0 : index
    %c0_0 = arith.constant 0 : index
    %c0_1 = arith.constant 0 : index
    %0 = vector.load %arg1[%c0, %c0_0, %c0_1] : memref<1x128x32xbf16, #tpu.memory_space<vmem>>, vector<1x128x32xbf16>
    %1 = vector.shape_cast %0 : vector<1x128x32xbf16> to vector<128x32xbf16>
    %c0_2 = arith.constant 0 : index
    %c0_3 = arith.constant 0 : index
    %c0_4 = arith.constant 0 : index
    %2 = vector.load %arg2[%c0_2, %c0_3, %c0_4] : memref<1x32x384xbf16, #tpu.memory_space<vmem>>, vector<1x32x384xbf16>
    %3 = vector.shape_cast %2 : vector<1x32x384xbf16> to vector<32x384xbf16>
    %cst = arith.constant dense<0.000000e+00> : vector<128x384xf32>
    %4 = tpu.matmul %1, %3, %cst {dimension_numbers = #tpu.dot_dimension_numbers<[1], [0], [0], [1], [0, 0, 1, 1], [], []>} : vector<128x32xbf16>, vector<32x384xbf16>, vector<128x384xf32> -> vector<128x384xf32>
    %c0_5 = arith.constant 0 : index
    %c0_6 = arith.constant 0 : index
    %c0_7 = arith.constant 0 : index
    %5 = vector.load %arg4[%c0_5, %c0_6, %c0_7] : memref<1x1x384xf32, #tpu.memory_space<vmem>>, vector<1x1x384xf32>
    %6 = vector.shape_cast %5 : vector<1x1x384xf32> to vector<1x384xf32>
    %7 = vector.broadcast %6 : vector<1x384xf32> to vector<128x384xf32>
    %8 = arith.addf %4, %7 : vector<128x384xf32>
    %c0_8 = arith.constant 0 : index
    %c0_9 = arith.constant 0 : index
    %9 = vector.load %arg7[%c0_8, %c0_9] : memref<128x384xf32, #tpu.memory_space<vmem>>, vector<128x384xf32>
    tpu.vector_store %arg7[%c0_8, %c0_9], %8 {strides = array<i32>} : memref<128x384xf32, #tpu.memory_space<vmem>>, vector<128x384xf32>,
    %c0_10 = arith.constant 0 : index
    %c0_11 = arith.constant 0 : index
    %c0_12 = arith.constant 0 : index
    %10 = vector.load %arg3[%c0_10, %c0_11, %c0_12] : memref<1x128x384xbf16, #tpu.memory_space<vmem>>, vector<1x128x384xbf16>
    %11 = vector.shape_cast %10 : vector<1x128x384xbf16> to vector<128x384xbf16>
    %c0_13 = arith.constant 0 : index
    %c0_14 = arith.constant 0 : index
    %c0_15 = arith.constant 0 : index
    %12 = vector.load %arg5[%c0_13, %c0_14, %c0_15] : memref<1x1x384xf32, #tpu.memory_space<vmem>>, vector<1x1x384xf32>
    %13 = vector.shape_cast %12 : vector<1x1x384xf32> to vector<1x384xf32>
    %cst_16 = arith.constant 0.000000e+00 : f32
    %14 = vector.broadcast %cst_16 : f32 to vector<8x128xf32>
    %c0_i32 = arith.constant 0 : i32
    %c8_i32 = arith.constant 8 : i32
    %15 = arith.muli %c0_i32, %c8_i32 : i32
    %16 = tpu.assume_multiple %15, 8 : i32
    %17 = arith.index_cast %16 : i32 to index
    %c0_17 = arith.constant 0 : index
    %18 = vector.load %arg7[%17, %c0_17] : memref<128x384xf32, #tpu.memory_space<vmem>>, vector<8x384xf32>
    %19 = arith.truncf %14 : vector<8x128xf32> to vector<8x128xbf16>
    %cst_18 = arith.constant dense<0.000000e+00> : vector<8x384xf32>
    %20 = tpu.matmul %19, %11, %cst_18 {dimension_numbers = #tpu.dot_dimension_numbers<[1], [0], [0], [1], [0, 0, 1, 1], [], []>} : vector<8x128xbf16>, vector<128x384xbf16>, vector<8x384xf32> -> vector<8x384xf32>
    %21 = vector.broadcast %13 : vector<1x384xf32> to vector<8x384xf32>
    %22 = arith.addf %20, %21 : vector<8x384xf32>
    %23 = vector.extract_strided_slice %18 {offsets = [0, 0], sizes = [8, 128], strides = [1, 1]} : vector<8x384xf32> to vector<8x128xf32>
    %24 = vector.extract_strided_slice %22 {offsets = [0, 0], sizes = [8, 128], strides = [1, 1]} : vector<8x384xf32> to vector<8x128xf32>
    %25 = arith.addf %23, %24 : vector<8x128xf32>
    %26 = arith.negf %25 : vector<8x128xf32>
    %27 = math.exp %26 : vector<8x128xf32>
    %cst_19 = arith.constant 1.000000e+00 : f32
    %28 = vector.broadcast %cst_19 : f32 to vector<8x128xf32>
    %29 = arith.addf %28, %27 : vector<8x128xf32>
    %30 = arith.divf %28, %29 : vector<8x128xf32>
    %31 = vector.extract_strided_slice %18 {offsets = [0, 128], sizes = [8, 128], strides = [1, 1]} : vector<8x384xf32> to vector<8x128xf32>
    %32 = vector.extract_strided_slice %22 {offsets = [0, 128], sizes = [8, 128], strides = [1, 1]} : vector<8x384xf32> to vector<8x128xf32>
    %33 = arith.addf %31, %32 : vector<8x128xf32>
    %34 = arith.negf %33 : vector<8x128xf32>
    %35 = math.exp %34 : vector<8x128xf32>
    %cst_20 = arith.constant 1.000000e+00 : f32
    %36 = vector.broadcast %cst_20 : f32 to vector<8x128xf32>
    %37 = arith.addf %36, %35 : vector<8x128xf32>
    %38 = arith.divf %36, %37 : vector<8x128xf32>
    %39 = vector.extract_strided_slice %18 {offsets = [0, 256], sizes = [8, 128], strides = [1, 1]} : vector<8x384xf32> to vector<8x128xf32>
    %40 = vector.extract_strided_slice %22 {offsets = [0, 256], sizes = [8, 128], strides = [1, 1]} : vector<8x384xf32> to vector<8x128xf32>
    %41 = arith.mulf %30, %40 : vector<8x128xf32>
    %42 = arith.addf %39, %41 : vector<8x128xf32>
    %43 = math.tanh %42 : vector<8x128xf32>
    %cst_21 = arith.constant 1.000000e+00 : f32
    %44 = vector.broadcast %cst_21 : f32 to vector<8x128xf32>
    %45 = arith.subf %44, %38 : vector<8x128xf32>
    %46 = arith.mulf %45, %43 : vector<8x128xf32>
    %47 = arith.mulf %38, %14 : vector<8x128xf32>
    %48 = arith.addf %46, %47 : vector<8x128xf32>
    %c0_22 = arith.constant 0 : index
    %49 = arith.index_cast %c0_i32 : i32 to index
    %c0_23 = arith.constant 0 : index
    %c0_24 = arith.constant 0 : index
    %50 = vector.load %arg6[%c0_22, %49, %c0_23, %c0_24] : memref<1x16x8x128xf32, #tpu.memory_space<vmem>>, vector<1x1x8x128xf32>
    %51 = vector.shape_cast %50 : vector<1x1x8x128xf32> to vector<8x128xf32>
    %52 = vector.shape_cast %48 : vector<8x128xf32> to vector<1x1x8x128xf32>
    tpu.vector_store %arg6[%c0_22, %49, %c0_23, %c0_24], %52 {strides = array<i32>} : memref<1x16x8x128xf32, #tpu.memory_space<vmem>>, vector<1x1x8x128xf32>,
    %c1_i32 = arith.constant 1 : i32
    %c8_i32_25 = arith.constant 8 : i32
    %53 = arith.muli %c1_i32, %c8_i32_25 : i32
    %54 = tpu.assume_multiple %53, 8 : i32
    %55 = arith.index_cast %54 : i32 to index
    %c0_26 = arith.constant 0 : index
    %56 = vector.load %arg7[%55, %c0_26] : memref<128x384xf32, #tpu.memory_space<vmem>>, vector<8x384xf32>
    %57 = arith.truncf %48 : vector<8x128xf32> to vector<8x128xbf16>
    %cst_27 = arith.constant dense<0.000000e+00> : vector<8x384xf32>
    %58 = tpu.matmul %57, %11, %cst_27 {dimension_numbers = #tpu.dot_dimension_numbers<[1], [0], [0], [1], [0, 0, 1, 1], [], []>} : vector<8x128xbf16>, vector<128x384xbf16>, vector<8x384xf32> -> vector<8x384xf32>
    %59 = vector.broadcast %13 : vector<1x384xf32> to vector<8x384xf32>
    %60 = arith.addf %58, %59 : vector<8x384xf32>
    %61 = vector.extract_strided_slice %56 {offsets = [0, 0], sizes = [8, 128], strides = [1, 1]} : vector<8x384xf32> to vector<8x128xf32>
    %62 = vector.extract_strided_slice %60 {offsets = [0, 0], sizes = [8, 128], strides = [1, 1]} : vector<8x384xf32> to vector<8x128xf32>
    %63 = arith.addf %61, %62 : vector<8x128xf32>
    %64 = arith.negf %63 : vector<8x128xf32>
    %65 = math.exp %64 : vector<8x128xf32>
    %cst_28 = arith.constant 1.000000e+00 : f32
    %66 = vector.broadcast %cst_28 : f32 to vector<8x128xf32>
    %67 = arith.addf %66, %65 : vector<8x128xf32>
    %68 = arith.divf %66, %67 : vector<8x128xf32>
    %69 = vector.extract_strided_slice %56 {offsets = [0, 128], sizes = [8, 128], strides = [1, 1]} : vector<8x384xf32> to vector<8x128xf32>
    %70 = vector.extract_strided_slice %60 {offsets = [0, 128], sizes = [8, 128], strides = [1, 1]} : vector<8x384xf32> to vector<8x128xf32>
    %71 = arith.addf %69, %70 : vector<8x128xf32>
    %72 = arith.negf %71 : vector<8x128xf32>
    %73 = math.exp %72 : vector<8x128xf32>
    %cst_29 = arith.constant 1.000000e+00 : f32
    %74 = vector.broadcast %cst_29 : f32 to vector<8x128xf32>
    %75 = arith.addf %74, %73 : vector<8x128xf32>
    %76 = arith.divf %74, %75 : vector<8x128xf32>
    %77 = vector.extract_strided_slice %56 {offsets = [0, 256], sizes = [8, 128], strides = [1, 1]} : vector<8x384xf32> to vector<8x128xf32>
    %78 = vector.extract_strided_slice %60 {offsets = [0, 256], sizes = [8, 128], strides = [1, 1]} : vector<8x384xf32> to vector<8x128xf32>
    %79 = arith.mulf %68, %78 : vector<8x128xf32>
    %80 = arith.addf %77, %79 : vector<8x128xf32>
    %81 = math.tanh %80 : vector<8x128xf32>
    %cst_30 = arith.constant 1.000000e+00 : f32
    %82 = vector.broadcast %cst_30 : f32 to vector<8x128xf32>
    %83 = arith.subf %82, %76 : vector<8x128xf32>
    %84 = arith.mulf %83, %81 : vector<8x128xf32>
    %85 = arith.mulf %76, %48 : vector<8x128xf32>
    %86 = arith.addf %84, %85 : vector<8x128xf32>
    %c0_31 = arith.constant 0 : index
    %87 = arith.index_cast %c1_i32 : i32 to index
    %c0_32 = arith.constant 0 : index
    %c0_33 = arith.constant 0 : index
    %88 = vector.load %arg6[%c0_31, %87, %c0_32, %c0_33] : memref<1x16x8x128xf32, #tpu.memory_space<vmem>>, vector<1x1x8x128xf32>
    %89 = vector.shape_cast %88 : vector<1x1x8x128xf32> to vector<8x128xf32>
    %90 = vector.shape_cast %86 : vector<8x128xf32> to vector<1x1x8x128xf32>
    tpu.vector_store %arg6[%c0_31, %87, %c0_32, %c0_33], %90 {strides = array<i32>} : memref<1x16x8x128xf32, #tpu.memory_space<vmem>>, vector<1x1x8x128xf32>,
    %c2_i32 = arith.constant 2 : i32
    %c8_i32_34 = arith.constant 8 : i32
    %91 = arith.muli %c2_i32, %c8_i32_34 : i32
    %92 = tpu.assume_multiple %91, 8 : i32
    %93 = arith.index_cast %92 : i32 to index
    %c0_35 = arith.constant 0 : index
    %94 = vector.load %arg7[%93, %c0_35] : memref<128x384xf32, #tpu.memory_space<vmem>>, vector<8x384xf32>
    %95 = arith.truncf %86 : vector<8x128xf32> to vector<8x128xbf16>
    %cst_36 = arith.constant dense<0.000000e+00> : vector<8x384xf32>
    %96 = tpu.matmul %95, %11, %cst_36 {dimension_numbers = #tpu.dot_dimension_numbers<[1], [0], [0], [1], [0, 0, 1, 1], [], []>} : vector<8x128xbf16>, vector<128x384xbf16>, vector<8x384xf32> -> vector<8x384xf32>
    %97 = vector.broadcast %13 : vector<1x384xf32> to vector<8x384xf32>
    %98 = arith.addf %96, %97 : vector<8x384xf32>
    %99 = vector.extract_strided_slice %94 {offsets = [0, 0], sizes = [8, 128], strides = [1, 1]} : vector<8x384xf32> to vector<8x128xf32>
    %100 = vector.extract_strided_slice %98 {offsets = [0, 0], sizes = [8, 128], strides = [1, 1]} : vector<8x384xf32> to vector<8x128xf32>
    %101 = arith.addf %99, %100 : vector<8x128xf32>
    %102 = arith.negf %101 : vector<8x128xf32>
    %103 = math.exp %102 : vector<8x128xf32>
    %cst_37 = arith.constant 1.000000e+00 : f32
    %104 = vector.broadcast %cst_37 : f32 to vector<8x128xf32>
    %105 = arith.addf %104, %103 : vector<8x128xf32>
    %106 = arith.divf %104, %105 : vector<8x128xf32>
    %107 = vector.extract_strided_slice %94 {offsets = [0, 128], sizes = [8, 128], strides = [1, 1]} : vector<8x384xf32> to vector<8x128xf32>
    %108 = vector.extract_strided_slice %98 {offsets = [0, 128], sizes = [8, 128], strides = [1, 1]} : vector<8x384xf32> to vector<8x128xf32>
    %109 = arith.addf %107, %108 : vector<8x128xf32>
    %110 = arith.negf %109 : vector<8x128xf32>
    %111 = math.exp %110 : vector<8x128xf32>
    %cst_38 = arith.constant 1.000000e+00 : f32
    %112 = vector.broadcast %cst_38 : f32 to vector<8x128xf32>
    %113 = arith.addf %112, %111 : vector<8x128xf32>
    %114 = arith.divf %112, %113 : vector<8x128xf32>
    %115 = vector.extract_strided_slice %94 {offsets = [0, 256], sizes = [8, 128], strides = [1, 1]} : vector<8x384xf32> to vector<8x128xf32>
    %116 = vector.extract_strided_slice %98 {offsets = [0, 256], sizes = [8, 128], strides = [1, 1]} : vector<8x384xf32> to vector<8x128xf32>
    %117 = arith.mulf %106, %116 : vector<8x128xf32>
    %118 = arith.addf %115, %117 : vector<8x128xf32>
    %119 = math.tanh %118 : vector<8x128xf32>
    %cst_39 = arith.constant 1.000000e+00 : f32
    %120 = vector.broadcast %cst_39 : f32 to vector<8x128xf32>
    %121 = arith.subf %120, %114 : vector<8x128xf32>
    %122 = arith.mulf %121, %119 : vector<8x128xf32>
    %123 = arith.mulf %114, %86 : vector<8x128xf32>
    %124 = arith.addf %122, %123 : vector<8x128xf32>
    %c0_40 = arith.constant 0 : index
    %125 = arith.index_cast %c2_i32 : i32 to index
    %c0_41 = arith.constant 0 : index
    %c0_42 = arith.constant 0 : index
    %126 = vector.load %arg6[%c0_40, %125, %c0_41, %c0_42] : memref<1x16x8x128xf32, #tpu.memory_space<vmem>>, vector<1x1x8x128xf32>
    %127 = vector.shape_cast %126 : vector<1x1x8x128xf32> to vector<8x128xf32>
    %128 = vector.shape_cast %124 : vector<8x128xf32> to vector<1x1x8x128xf32>
    tpu.vector_store %arg6[%c0_40, %125, %c0_41, %c0_42], %128 {strides = array<i32>} : memref<1x16x8x128xf32, #tpu.memory_space<vmem>>, vector<1x1x8x128xf32>,
    %c3_i32 = arith.constant 3 : i32
    %c8_i32_43 = arith.constant 8 : i32
    %129 = arith.muli %c3_i32, %c8_i32_43 : i32
    %130 = tpu.assume_multiple %129, 8 : i32
    %131 = arith.index_cast %130 : i32 to index
    %c0_44 = arith.constant 0 : index
    %132 = vector.load %arg7[%131, %c0_44] : memref<128x384xf32, #tpu.memory_space<vmem>>, vector<8x384xf32>
    %133 = arith.truncf %124 : vector<8x128xf32> to vector<8x128xbf16>
    %cst_45 = arith.constant dense<0.000000e+00> : vector<8x384xf32>
    %134 = tpu.matmul %133, %11, %cst_45 {dimension_numbers = #tpu.dot_dimension_numbers<[1], [0], [0], [1], [0, 0, 1, 1], [], []>} : vector<8x128xbf16>, vector<128x384xbf16>, vector<8x384xf32> -> vector<8x384xf32>
    %135 = vector.broadcast %13 : vector<1x384xf32> to vector<8x384xf32>
    %136 = arith.addf %134, %135 : vector<8x384xf32>
    %137 = vector.extract_strided_slice %132 {offsets = [0, 0], sizes = [8, 128], strides = [1, 1]} : vector<8x384xf32> to vector<8x128xf32>
    %138 = vector.extract_strided_slice %136 {offsets = [0, 0], sizes = [8, 128], strides = [1, 1]} : vector<8x384xf32> to vector<8x128xf32>
    %139 = arith.addf %137, %138 : vector<8x128xf32>
    %140 = arith.negf %139 : vector<8x128xf32>
    %141 = math.exp %140 : vector<8x128xf32>
    %cst_46 = arith.constant 1.000000e+00 : f32
    %142 = vector.broadcast %cst_46 : f32 to vector<8x128xf32>
    %143 = arith.addf %142, %141 : vector<8x128xf32>
    %144 = arith.divf %142, %143 : vector<8x128xf32>
    %145 = vector.extract_strided_slice %132 {offsets = [0, 128], sizes = [8, 128], strides = [1, 1]} : vector<8x384xf32> to vector<8x128xf32>
    %146 = vector.extract_strided_slice %136 {offsets = [0, 128], sizes = [8, 128], strides = [1, 1]} : vector<8x384xf32> to vector<8x128xf32>
    %147 = arith.addf %145, %146 : vector<8x128xf32>
    %148 = arith.negf %147 : vector<8x128xf32>
    %149 = math.exp %148 : vector<8x128xf32>
    %cst_47 = arith.constant 1.000000e+00 : f32
    %150 = vector.broadcast %cst_47 : f32 to vector<8x128xf32>
    %151 = arith.addf %150, %149 : vector<8x128xf32>
    %152 = arith.divf %150, %151 : vector<8x128xf32>
    %153 = vector.extract_strided_slice %132 {offsets = [0, 256], sizes = [8, 128], strides = [1, 1]} : vector<8x384xf32> to vector<8x128xf32>
    %154 = vector.extract_strided_slice %136 {offsets = [0, 256], sizes = [8, 128], strides = [1, 1]} : vector<8x384xf32> to vector<8x128xf32>
    %155 = arith.mulf %144, %154 : vector<8x128xf32>
    %156 = arith.addf %153, %155 : vector<8x128xf32>
    %157 = math.tanh %156 : vector<8x128xf32>
    %cst_48 = arith.constant 1.000000e+00 : f32
    %158 = vector.broadcast %cst_48 : f32 to vector<8x128xf32>
    %159 = arith.subf %158, %152 : vector<8x128xf32>
    %160 = arith.mulf %159, %157 : vector<8x128xf32>
    %161 = arith.mulf %152, %124 : vector<8x128xf32>
    %162 = arith.addf %160, %161 : vector<8x128xf32>
    %c0_49 = arith.constant 0 : index
    %163 = arith.index_cast %c3_i32 : i32 to index
    %c0_50 = arith.constant 0 : index
    %c0_51 = arith.constant 0 : index
    %164 = vector.load %arg6[%c0_49, %163, %c0_50, %c0_51] : memref<1x16x8x128xf32, #tpu.memory_space<vmem>>, vector<1x1x8x128xf32>
    %165 = vector.shape_cast %164 : vector<1x1x8x128xf32> to vector<8x128xf32>
    %166 = vector.shape_cast %162 : vector<8x128xf32> to vector<1x1x8x128xf32>
    tpu.vector_store %arg6[%c0_49, %163, %c0_50, %c0_51], %166 {strides = array<i32>} : memref<1x16x8x128xf32, #tpu.memory_space<vmem>>, vector<1x1x8x128xf32>,
    %c4_i32 = arith.constant 4 : i32
    %c8_i32_52 = arith.constant 8 : i32
    %167 = arith.muli %c4_i32, %c8_i32_52 : i32
    %168 = tpu.assume_multiple %167, 8 : i32
    %169 = arith.index_cast %168 : i32 to index
    %c0_53 = arith.constant 0 : index
    %170 = vector.load %arg7[%169, %c0_53] : memref<128x384xf32, #tpu.memory_space<vmem>>, vector<8x384xf32>
    %171 = arith.truncf %162 : vector<8x128xf32> to vector<8x128xbf16>
    %cst_54 = arith.constant dense<0.000000e+00> : vector<8x384xf32>
    %172 = tpu.matmul %171, %11, %cst_54 {dimension_numbers = #tpu.dot_dimension_numbers<[1], [0], [0], [1], [0, 0, 1, 1], [], []>} : vector<8x128xbf16>, vector<128x384xbf16>, vector<8x384xf32> -> vector<8x384xf32>
    %173 = vector.broadcast %13 : vector<1x384xf32> to vector<8x384xf32>
    %174 = arith.addf %172, %173 : vector<8x384xf32>
    %175 = vector.extract_strided_slice %170 {offsets = [0, 0], sizes = [8, 128], strides = [1, 1]} : vector<8x384xf32> to vector<8x128xf32>
    %176 = vector.extract_strided_slice %174 {offsets = [0, 0], sizes = [8, 128], strides = [1, 1]} : vector<8x384xf32> to vector<8x128xf32>
    %177 = arith.addf %175, %176 : vector<8x128xf32>
    %178 = arith.negf %177 : vector<8x128xf32>
    %179 = math.exp %178 : vector<8x128xf32>
    %cst_55 = arith.constant 1.000000e+00 : f32
    %180 = vector.broadcast %cst_55 : f32 to vector<8x128xf32>
    %181 = arith.addf %180, %179 : vector<8x128xf32>
    %182 = arith.divf %180, %181 : vector<8x128xf32>
    %183 = vector.extract_strided_slice %170 {offsets = [0, 128], sizes = [8, 128], strides = [1, 1]} : vector<8x384xf32> to vector<8x128xf32>
    %184 = vector.extract_strided_slice %174 {offsets = [0, 128], sizes = [8, 128], strides = [1, 1]} : vector<8x384xf32> to vector<8x128xf32>
    %185 = arith.addf %183, %184 : vector<8x128xf32>
    %186 = arith.negf %185 : vector<8x128xf32>
    %187 = math.exp %186 : vector<8x128xf32>
    %cst_56 = arith.constant 1.000000e+00 : f32
    %188 = vector.broadcast %cst_56 : f32 to vector<8x128xf32>
    %189 = arith.addf %188, %187 : vector<8x128xf32>
    %190 = arith.divf %188, %189 : vector<8x128xf32>
    %191 = vector.extract_strided_slice %170 {offsets = [0, 256], sizes = [8, 128], strides = [1, 1]} : vector<8x384xf32> to vector<8x128xf32>
    %192 = vector.extract_strided_slice %174 {offsets = [0, 256], sizes = [8, 128], strides = [1, 1]} : vector<8x384xf32> to vector<8x128xf32>
    %193 = arith.mulf %182, %192 : vector<8x128xf32>
    %194 = arith.addf %191, %193 : vector<8x128xf32>
    %195 = math.tanh %194 : vector<8x128xf32>
    %cst_57 = arith.constant 1.000000e+00 : f32
    %196 = vector.broadcast %cst_57 : f32 to vector<8x128xf32>
    %197 = arith.subf %196, %190 : vector<8x128xf32>
    %198 = arith.mulf %197, %195 : vector<8x128xf32>
    %199 = arith.mulf %190, %162 : vector<8x128xf32>
    %200 = arith.addf %198, %199 : vector<8x128xf32>
    %c0_58 = arith.constant 0 : index
    %201 = arith.index_cast %c4_i32 : i32 to index
    %c0_59 = arith.constant 0 : index
    %c0_60 = arith.constant 0 : index
    %202 = vector.load %arg6[%c0_58, %201, %c0_59, %c0_60] : memref<1x16x8x128xf32, #tpu.memory_space<vmem>>, vector<1x1x8x128xf32>
    %203 = vector.shape_cast %202 : vector<1x1x8x128xf32> to vector<8x128xf32>
    %204 = vector.shape_cast %200 : vector<8x128xf32> to vector<1x1x8x128xf32>
    tpu.vector_store %arg6[%c0_58, %201, %c0_59, %c0_60], %204 {strides = array<i32>} : memref<1x16x8x128xf32, #tpu.memory_space<vmem>>, vector<1x1x8x128xf32>,
    %c5_i32 = arith.constant 5 : i32
    %c8_i32_61 = arith.constant 8 : i32
    %205 = arith.muli %c5_i32, %c8_i32_61 : i32
    %206 = tpu.assume_multiple %205, 8 : i32
    %207 = arith.index_cast %206 : i32 to index
    %c0_62 = arith.constant 0 : index
    %208 = vector.load %arg7[%207, %c0_62] : memref<128x384xf32, #tpu.memory_space<vmem>>, vector<8x384xf32>
    %209 = arith.truncf %200 : vector<8x128xf32> to vector<8x128xbf16>
    %cst_63 = arith.constant dense<0.000000e+00> : vector<8x384xf32>
    %210 = tpu.matmul %209, %11, %cst_63 {dimension_numbers = #tpu.dot_dimension_numbers<[1], [0], [0], [1], [0, 0, 1, 1], [], []>} : vector<8x128xbf16>, vector<128x384xbf16>, vector<8x384xf32> -> vector<8x384xf32>
    %211 = vector.broadcast %13 : vector<1x384xf32> to vector<8x384xf32>
    %212 = arith.addf %210, %211 : vector<8x384xf32>
    %213 = vector.extract_strided_slice %208 {offsets = [0, 0], sizes = [8, 128], strides = [1, 1]} : vector<8x384xf32> to vector<8x128xf32>
    %214 = vector.extract_strided_slice %212 {offsets = [0, 0], sizes = [8, 128], strides = [1, 1]} : vector<8x384xf32> to vector<8x128xf32>
    %215 = arith.addf %213, %214 : vector<8x128xf32>
    %216 = arith.negf %215 : vector<8x128xf32>
    %217 = math.exp %216 : vector<8x128xf32>
    %cst_64 = arith.constant 1.000000e+00 : f32
    %218 = vector.broadcast %cst_64 : f32 to vector<8x128xf32>
    %219 = arith.addf %218, %217 : vector<8x128xf32>
    %220 = arith.divf %218, %219 : vector<8x128xf32>
    %221 = vector.extract_strided_slice %208 {offsets = [0, 128], sizes = [8, 128], strides = [1, 1]} : vector<8x384xf32> to vector<8x128xf32>
    %222 = vector.extract_strided_slice %212 {offsets = [0, 128], sizes = [8, 128], strides = [1, 1]} : vector<8x384xf32> to vector<8x128xf32>
    %223 = arith.addf %221, %222 : vector<8x128xf32>
    %224 = arith.negf %223 : vector<8x128xf32>
    %225 = math.exp %224 : vector<8x128xf32>
    %cst_65 = arith.constant 1.000000e+00 : f32
    %226 = vector.broadcast %cst_65 : f32 to vector<8x128xf32>
    %227 = arith.addf %226, %225 : vector<8x128xf32>
    %228 = arith.divf %226, %227 : vector<8x128xf32>
    %229 = vector.extract_strided_slice %208 {offsets = [0, 256], sizes = [8, 128], strides = [1, 1]} : vector<8x384xf32> to vector<8x128xf32>
    %230 = vector.extract_strided_slice %212 {offsets = [0, 256], sizes = [8, 128], strides = [1, 1]} : vector<8x384xf32> to vector<8x128xf32>
    %231 = arith.mulf %220, %230 : vector<8x128xf32>
    %232 = arith.addf %229, %231 : vector<8x128xf32>
    %233 = math.tanh %232 : vector<8x128xf32>
    %cst_66 = arith.constant 1.000000e+00 : f32
    %234 = vector.broadcast %cst_66 : f32 to vector<8x128xf32>
    %235 = arith.subf %234, %228 : vector<8x128xf32>
    %236 = arith.mulf %235, %233 : vector<8x128xf32>
    %237 = arith.mulf %228, %200 : vector<8x128xf32>
    %238 = arith.addf %236, %237 : vector<8x128xf32>
    %c0_67 = arith.constant 0 : index
    %239 = arith.index_cast %c5_i32 : i32 to index
    %c0_68 = arith.constant 0 : index
    %c0_69 = arith.constant 0 : index
    %240 = vector.load %arg6[%c0_67, %239, %c0_68, %c0_69] : memref<1x16x8x128xf32, #tpu.memory_space<vmem>>, vector<1x1x8x128xf32>
    %241 = vector.shape_cast %240 : vector<1x1x8x128xf32> to vector<8x128xf32>
    %242 = vector.shape_cast %238 : vector<8x128xf32> to vector<1x1x8x128xf32>
    tpu.vector_store %arg6[%c0_67, %239, %c0_68, %c0_69], %242 {strides = array<i32>} : memref<1x16x8x128xf32, #tpu.memory_space<vmem>>, vector<1x1x8x128xf32>,
    %c6_i32 = arith.constant 6 : i32
    %c8_i32_70 = arith.constant 8 : i32
    %243 = arith.muli %c6_i32, %c8_i32_70 : i32
    %244 = tpu.assume_multiple %243, 8 : i32
    %245 = arith.index_cast %244 : i32 to index
    %c0_71 = arith.constant 0 : index
    %246 = vector.load %arg7[%245, %c0_71] : memref<128x384xf32, #tpu.memory_space<vmem>>, vector<8x384xf32>
    %247 = arith.truncf %238 : vector<8x128xf32> to vector<8x128xbf16>
    %cst_72 = arith.constant dense<0.000000e+00> : vector<8x384xf32>
    %248 = tpu.matmul %247, %11, %cst_72 {dimension_numbers = #tpu.dot_dimension_numbers<[1], [0], [0], [1], [0, 0, 1, 1], [], []>} : vector<8x128xbf16>, vector<128x384xbf16>, vector<8x384xf32> -> vector<8x384xf32>
    %249 = vector.broadcast %13 : vector<1x384xf32> to vector<8x384xf32>
    %250 = arith.addf %248, %249 : vector<8x384xf32>
    %251 = vector.extract_strided_slice %246 {offsets = [0, 0], sizes = [8, 128], strides = [1, 1]} : vector<8x384xf32> to vector<8x128xf32>
    %252 = vector.extract_strided_slice %250 {offsets = [0, 0], sizes = [8, 128], strides = [1, 1]} : vector<8x384xf32> to vector<8x128xf32>
    %253 = arith.addf %251, %252 : vector<8x128xf32>
    %254 = arith.negf %253 : vector<8x128xf32>
    %255 = math.exp %254 : vector<8x128xf32>
    %cst_73 = arith.constant 1.000000e+00 : f32
    %256 = vector.broadcast %cst_73 : f32 to vector<8x128xf32>
    %257 = arith.addf %256, %255 : vector<8x128xf32>
    %258 = arith.divf %256, %257 : vector<8x128xf32>
    %259 = vector.extract_strided_slice %246 {offsets = [0, 128], sizes = [8, 128], strides = [1, 1]} : vector<8x384xf32> to vector<8x128xf32>
    %260 = vector.extract_strided_slice %250 {offsets = [0, 128], sizes = [8, 128], strides = [1, 1]} : vector<8x384xf32> to vector<8x128xf32>
    %261 = arith.addf %259, %260 : vector<8x128xf32>
    %262 = arith.negf %261 : vector<8x128xf32>
    %263 = math.exp %262 : vector<8x128xf32>
    %cst_74 = arith.constant 1.000000e+00 : f32
    %264 = vector.broadcast %cst_74 : f32 to vector<8x128xf32>
    %265 = arith.addf %264, %263 : vector<8x128xf32>
    %266 = arith.divf %264, %265 : vector<8x128xf32>
    %267 = vector.extract_strided_slice %246 {offsets = [0, 256], sizes = [8, 128], strides = [1, 1]} : vector<8x384xf32> to vector<8x128xf32>
    %268 = vector.extract_strided_slice %250 {offsets = [0, 256], sizes = [8, 128], strides = [1, 1]} : vector<8x384xf32> to vector<8x128xf32>
    %269 = arith.mulf %258, %268 : vector<8x128xf32>
    %270 = arith.addf %267, %269 : vector<8x128xf32>
    %271 = math.tanh %270 : vector<8x128xf32>
    %cst_75 = arith.constant 1.000000e+00 : f32
    %272 = vector.broadcast %cst_75 : f32 to vector<8x128xf32>
    %273 = arith.subf %272, %266 : vector<8x128xf32>
    %274 = arith.mulf %273, %271 : vector<8x128xf32>
    %275 = arith.mulf %266, %238 : vector<8x128xf32>
    %276 = arith.addf %274, %275 : vector<8x128xf32>
    %c0_76 = arith.constant 0 : index
    %277 = arith.index_cast %c6_i32 : i32 to index
    %c0_77 = arith.constant 0 : index
    %c0_78 = arith.constant 0 : index
    %278 = vector.load %arg6[%c0_76, %277, %c0_77, %c0_78] : memref<1x16x8x128xf32, #tpu.memory_space<vmem>>, vector<1x1x8x128xf32>
    %279 = vector.shape_cast %278 : vector<1x1x8x128xf32> to vector<8x128xf32>
    %280 = vector.shape_cast %276 : vector<8x128xf32> to vector<1x1x8x128xf32>
    tpu.vector_store %arg6[%c0_76, %277, %c0_77, %c0_78], %280 {strides = array<i32>} : memref<1x16x8x128xf32, #tpu.memory_space<vmem>>, vector<1x1x8x128xf32>,
    %c7_i32 = arith.constant 7 : i32
    %c8_i32_79 = arith.constant 8 : i32
    %281 = arith.muli %c7_i32, %c8_i32_79 : i32
    %282 = tpu.assume_multiple %281, 8 : i32
    %283 = arith.index_cast %282 : i32 to index
    %c0_80 = arith.constant 0 : index
    %284 = vector.load %arg7[%283, %c0_80] : memref<128x384xf32, #tpu.memory_space<vmem>>, vector<8x384xf32>
    %285 = arith.truncf %276 : vector<8x128xf32> to vector<8x128xbf16>
    %cst_81 = arith.constant dense<0.000000e+00> : vector<8x384xf32>
    %286 = tpu.matmul %285, %11, %cst_81 {dimension_numbers = #tpu.dot_dimension_numbers<[1], [0], [0], [1], [0, 0, 1, 1], [], []>} : vector<8x128xbf16>, vector<128x384xbf16>, vector<8x384xf32> -> vector<8x384xf32>
    %287 = vector.broadcast %13 : vector<1x384xf32> to vector<8x384xf32>
    %288 = arith.addf %286, %287 : vector<8x384xf32>
    %289 = vector.extract_strided_slice %284 {offsets = [0, 0], sizes = [8, 128], strides = [1, 1]} : vector<8x384xf32> to vector<8x128xf32>
    %290 = vector.extract_strided_slice %288 {offsets = [0, 0], sizes = [8, 128], strides = [1, 1]} : vector<8x384xf32> to vector<8x128xf32>
    %291 = arith.addf %289, %290 : vector<8x128xf32>
    %292 = arith.negf %291 : vector<8x128xf32>
    %293 = math.exp %292 : vector<8x128xf32>
    %cst_82 = arith.constant 1.000000e+00 : f32
    %294 = vector.broadcast %cst_82 : f32 to vector<8x128xf32>
    %295 = arith.addf %294, %293 : vector<8x128xf32>
    %296 = arith.divf %294, %295 : vector<8x128xf32>
    %297 = vector.extract_strided_slice %284 {offsets = [0, 128], sizes = [8, 128], strides = [1, 1]} : vector<8x384xf32> to vector<8x128xf32>
    %298 = vector.extract_strided_slice %288 {offsets = [0, 128], sizes = [8, 128], strides = [1, 1]} : vector<8x384xf32> to vector<8x128xf32>
    %299 = arith.addf %297, %298 : vector<8x128xf32>
    %300 = arith.negf %299 : vector<8x128xf32>
    %301 = math.exp %300 : vector<8x128xf32>
    %cst_83 = arith.constant 1.000000e+00 : f32
    %302 = vector.broadcast %cst_83 : f32 to vector<8x128xf32>
    %303 = arith.addf %302, %301 : vector<8x128xf32>
    %304 = arith.divf %302, %303 : vector<8x128xf32>
    %305 = vector.extract_strided_slice %284 {offsets = [0, 256], sizes = [8, 128], strides = [1, 1]} : vector<8x384xf32> to vector<8x128xf32>
    %306 = vector.extract_strided_slice %288 {offsets = [0, 256], sizes = [8, 128], strides = [1, 1]} : vector<8x384xf32> to vector<8x128xf32>
    %307 = arith.mulf %296, %306 : vector<8x128xf32>
    %308 = arith.addf %305, %307 : vector<8x128xf32>
    %309 = math.tanh %308 : vector<8x128xf32>
    %cst_84 = arith.constant 1.000000e+00 : f32
    %310 = vector.broadcast %cst_84 : f32 to vector<8x128xf32>
    %311 = arith.subf %310, %304 : vector<8x128xf32>
    %312 = arith.mulf %311, %309 : vector<8x128xf32>
    %313 = arith.mulf %304, %276 : vector<8x128xf32>
    %314 = arith.addf %312, %313 : vector<8x128xf32>
    %c0_85 = arith.constant 0 : index
    %315 = arith.index_cast %c7_i32 : i32 to index
    %c0_86 = arith.constant 0 : index
    %c0_87 = arith.constant 0 : index
    %316 = vector.load %arg6[%c0_85, %315, %c0_86, %c0_87] : memref<1x16x8x128xf32, #tpu.memory_space<vmem>>, vector<1x1x8x128xf32>
    %317 = vector.shape_cast %316 : vector<1x1x8x128xf32> to vector<8x128xf32>
    %318 = vector.shape_cast %314 : vector<8x128xf32> to vector<1x1x8x128xf32>
    tpu.vector_store %arg6[%c0_85, %315, %c0_86, %c0_87], %318 {strides = array<i32>} : memref<1x16x8x128xf32, #tpu.memory_space<vmem>>, vector<1x1x8x128xf32>,
    %c8_i32_88 = arith.constant 8 : i32
    %c8_i32_89 = arith.constant 8 : i32
    %319 = arith.muli %c8_i32_88, %c8_i32_89 : i32
    %320 = tpu.assume_multiple %319, 8 : i32
    %321 = arith.index_cast %320 : i32 to index
    %c0_90 = arith.constant 0 : index
    %322 = vector.load %arg7[%321, %c0_90] : memref<128x384xf32, #tpu.memory_space<vmem>>, vector<8x384xf32>
    %323 = arith.truncf %314 : vector<8x128xf32> to vector<8x128xbf16>
    %cst_91 = arith.constant dense<0.000000e+00> : vector<8x384xf32>
    %324 = tpu.matmul %323, %11, %cst_91 {dimension_numbers = #tpu.dot_dimension_numbers<[1], [0], [0], [1], [0, 0, 1, 1], [], []>} : vector<8x128xbf16>, vector<128x384xbf16>, vector<8x384xf32> -> vector<8x384xf32>
    %325 = vector.broadcast %13 : vector<1x384xf32> to vector<8x384xf32>
    %326 = arith.addf %324, %325 : vector<8x384xf32>
    %327 = vector.extract_strided_slice %322 {offsets = [0, 0], sizes = [8, 128], strides = [1, 1]} : vector<8x384xf32> to vector<8x128xf32>
    %328 = vector.extract_strided_slice %326 {offsets = [0, 0], sizes = [8, 128], strides = [1, 1]} : vector<8x384xf32> to vector<8x128xf32>
    %329 = arith.addf %327, %328 : vector<8x128xf32>
    %330 = arith.negf %329 : vector<8x128xf32>
    %331 = math.exp %330 : vector<8x128xf32>
    %cst_92 = arith.constant 1.000000e+00 : f32
    %332 = vector.broadcast %cst_92 : f32 to vector<8x128xf32>
    %333 = arith.addf %332, %331 : vector<8x128xf32>
    %334 = arith.divf %332, %333 : vector<8x128xf32>
    %335 = vector.extract_strided_slice %322 {offsets = [0, 128], sizes = [8, 128], strides = [1, 1]} : vector<8x384xf32> to vector<8x128xf32>
    %336 = vector.extract_strided_slice %326 {offsets = [0, 128], sizes = [8, 128], strides = [1, 1]} : vector<8x384xf32> to vector<8x128xf32>
    %337 = arith.addf %335, %336 : vector<8x128xf32>
    %338 = arith.negf %337 : vector<8x128xf32>
    %339 = math.exp %338 : vector<8x128xf32>
    %cst_93 = arith.constant 1.000000e+00 : f32
    %340 = vector.broadcast %cst_93 : f32 to vector<8x128xf32>
    %341 = arith.addf %340, %339 : vector<8x128xf32>
    %342 = arith.divf %340, %341 : vector<8x128xf32>
    %343 = vector.extract_strided_slice %322 {offsets = [0, 256], sizes = [8, 128], strides = [1, 1]} : vector<8x384xf32> to vector<8x128xf32>
    %344 = vector.extract_strided_slice %326 {offsets = [0, 256], sizes = [8, 128], strides = [1, 1]} : vector<8x384xf32> to vector<8x128xf32>
    %345 = arith.mulf %334, %344 : vector<8x128xf32>
    %346 = arith.addf %343, %345 : vector<8x128xf32>
    %347 = math.tanh %346 : vector<8x128xf32>
    %cst_94 = arith.constant 1.000000e+00 : f32
    %348 = vector.broadcast %cst_94 : f32 to vector<8x128xf32>
    %349 = arith.subf %348, %342 : vector<8x128xf32>
    %350 = arith.mulf %349, %347 : vector<8x128xf32>
    %351 = arith.mulf %342, %314 : vector<8x128xf32>
    %352 = arith.addf %350, %351 : vector<8x128xf32>
    %c0_95 = arith.constant 0 : index
    %353 = arith.index_cast %c8_i32_88 : i32 to index
    %c0_96 = arith.constant 0 : index
    %c0_97 = arith.constant 0 : index
    %354 = vector.load %arg6[%c0_95, %353, %c0_96, %c0_97] : memref<1x16x8x128xf32, #tpu.memory_space<vmem>>, vector<1x1x8x128xf32>
    %355 = vector.shape_cast %354 : vector<1x1x8x128xf32> to vector<8x128xf32>
    %356 = vector.shape_cast %352 : vector<8x128xf32> to vector<1x1x8x128xf32>
    tpu.vector_store %arg6[%c0_95, %353, %c0_96, %c0_97], %356 {strides = array<i32>} : memref<1x16x8x128xf32, #tpu.memory_space<vmem>>, vector<1x1x8x128xf32>,
    %c9_i32 = arith.constant 9 : i32
    %c8_i32_98 = arith.constant 8 : i32
    %357 = arith.muli %c9_i32, %c8_i32_98 : i32
    %358 = tpu.assume_multiple %357, 8 : i32
    %359 = arith.index_cast %358 : i32 to index
    %c0_99 = arith.constant 0 : index
    %360 = vector.load %arg7[%359, %c0_99] : memref<128x384xf32, #tpu.memory_space<vmem>>, vector<8x384xf32>
    %361 = arith.truncf %352 : vector<8x128xf32> to vector<8x128xbf16>
    %cst_100 = arith.constant dense<0.000000e+00> : vector<8x384xf32>
    %362 = tpu.matmul %361, %11, %cst_100 {dimension_numbers = #tpu.dot_dimension_numbers<[1], [0], [0], [1], [0, 0, 1, 1], [], []>} : vector<8x128xbf16>, vector<128x384xbf16>, vector<8x384xf32> -> vector<8x384xf32>
    %363 = vector.broadcast %13 : vector<1x384xf32> to vector<8x384xf32>
    %364 = arith.addf %362, %363 : vector<8x384xf32>
    %365 = vector.extract_strided_slice %360 {offsets = [0, 0], sizes = [8, 128], strides = [1, 1]} : vector<8x384xf32> to vector<8x128xf32>
    %366 = vector.extract_strided_slice %364 {offsets = [0, 0], sizes = [8, 128], strides = [1, 1]} : vector<8x384xf32> to vector<8x128xf32>
    %367 = arith.addf %365, %366 : vector<8x128xf32>
    %368 = arith.negf %367 : vector<8x128xf32>
    %369 = math.exp %368 : vector<8x128xf32>
    %cst_101 = arith.constant 1.000000e+00 : f32
    %370 = vector.broadcast %cst_101 : f32 to vector<8x128xf32>
    %371 = arith.addf %370, %369 : vector<8x128xf32>
    %372 = arith.divf %370, %371 : vector<8x128xf32>
    %373 = vector.extract_strided_slice %360 {offsets = [0, 128], sizes = [8, 128], strides = [1, 1]} : vector<8x384xf32> to vector<8x128xf32>
    %374 = vector.extract_strided_slice %364 {offsets = [0, 128], sizes = [8, 128], strides = [1, 1]} : vector<8x384xf32> to vector<8x128xf32>
    %375 = arith.addf %373, %374 : vector<8x128xf32>
    %376 = arith.negf %375 : vector<8x128xf32>
    %377 = math.exp %376 : vector<8x128xf32>
    %cst_102 = arith.constant 1.000000e+00 : f32
    %378 = vector.broadcast %cst_102 : f32 to vector<8x128xf32>
    %379 = arith.addf %378, %377 : vector<8x128xf32>
    %380 = arith.divf %378, %379 : vector<8x128xf32>
    %381 = vector.extract_strided_slice %360 {offsets = [0, 256], sizes = [8, 128], strides = [1, 1]} : vector<8x384xf32> to vector<8x128xf32>
    %382 = vector.extract_strided_slice %364 {offsets = [0, 256], sizes = [8, 128], strides = [1, 1]} : vector<8x384xf32> to vector<8x128xf32>
    %383 = arith.mulf %372, %382 : vector<8x128xf32>
    %384 = arith.addf %381, %383 : vector<8x128xf32>
    %385 = math.tanh %384 : vector<8x128xf32>
    %cst_103 = arith.constant 1.000000e+00 : f32
    %386 = vector.broadcast %cst_103 : f32 to vector<8x128xf32>
    %387 = arith.subf %386, %380 : vector<8x128xf32>
    %388 = arith.mulf %387, %385 : vector<8x128xf32>
    %389 = arith.mulf %380, %352 : vector<8x128xf32>
    %390 = arith.addf %388, %389 : vector<8x128xf32>
    %c0_104 = arith.constant 0 : index
    %391 = arith.index_cast %c9_i32 : i32 to index
    %c0_105 = arith.constant 0 : index
    %c0_106 = arith.constant 0 : index
    %392 = vector.load %arg6[%c0_104, %391, %c0_105, %c0_106] : memref<1x16x8x128xf32, #tpu.memory_space<vmem>>, vector<1x1x8x128xf32>
    %393 = vector.shape_cast %392 : vector<1x1x8x128xf32> to vector<8x128xf32>
    %394 = vector.shape_cast %390 : vector<8x128xf32> to vector<1x1x8x128xf32>
    tpu.vector_store %arg6[%c0_104, %391, %c0_105, %c0_106], %394 {strides = array<i32>} : memref<1x16x8x128xf32, #tpu.memory_space<vmem>>, vector<1x1x8x128xf32>,
    %c10_i32 = arith.constant 10 : i32
    %c8_i32_107 = arith.constant 8 : i32
    %395 = arith.muli %c10_i32, %c8_i32_107 : i32
    %396 = tpu.assume_multiple %395, 8 : i32
    %397 = arith.index_cast %396 : i32 to index
    %c0_108 = arith.constant 0 : index
    %398 = vector.load %arg7[%397, %c0_108] : memref<128x384xf32, #tpu.memory_space<vmem>>, vector<8x384xf32>
    %399 = arith.truncf %390 : vector<8x128xf32> to vector<8x128xbf16>
    %cst_109 = arith.constant dense<0.000000e+00> : vector<8x384xf32>
    %400 = tpu.matmul %399, %11, %cst_109 {dimension_numbers = #tpu.dot_dimension_numbers<[1], [0], [0], [1], [0, 0, 1, 1], [], []>} : vector<8x128xbf16>, vector<128x384xbf16>, vector<8x384xf32> -> vector<8x384xf32>
    %401 = vector.broadcast %13 : vector<1x384xf32> to vector<8x384xf32>
    %402 = arith.addf %400, %401 : vector<8x384xf32>
    %403 = vector.extract_strided_slice %398 {offsets = [0, 0], sizes = [8, 128], strides = [1, 1]} : vector<8x384xf32> to vector<8x128xf32>
    %404 = vector.extract_strided_slice %402 {offsets = [0, 0], sizes = [8, 128], strides = [1, 1]} : vector<8x384xf32> to vector<8x128xf32>
    %405 = arith.addf %403, %404 : vector<8x128xf32>
    %406 = arith.negf %405 : vector<8x128xf32>
    %407 = math.exp %406 : vector<8x128xf32>
    %cst_110 = arith.constant 1.000000e+00 : f32
    %408 = vector.broadcast %cst_110 : f32 to vector<8x128xf32>
    %409 = arith.addf %408, %407 : vector<8x128xf32>
    %410 = arith.divf %408, %409 : vector<8x128xf32>
    %411 = vector.extract_strided_slice %398 {offsets = [0, 128], sizes = [8, 128], strides = [1, 1]} : vector<8x384xf32> to vector<8x128xf32>
    %412 = vector.extract_strided_slice %402 {offsets = [0, 128], sizes = [8, 128], strides = [1, 1]} : vector<8x384xf32> to vector<8x128xf32>
    %413 = arith.addf %411, %412 : vector<8x128xf32>
    %414 = arith.negf %413 : vector<8x128xf32>
    %415 = math.exp %414 : vector<8x128xf32>
    %cst_111 = arith.constant 1.000000e+00 : f32
    %416 = vector.broadcast %cst_111 : f32 to vector<8x128xf32>
    %417 = arith.addf %416, %415 : vector<8x128xf32>
    %418 = arith.divf %416, %417 : vector<8x128xf32>
    %419 = vector.extract_strided_slice %398 {offsets = [0, 256], sizes = [8, 128], strides = [1, 1]} : vector<8x384xf32> to vector<8x128xf32>
    %420 = vector.extract_strided_slice %402 {offsets = [0, 256], sizes = [8, 128], strides = [1, 1]} : vector<8x384xf32> to vector<8x128xf32>
    %421 = arith.mulf %410, %420 : vector<8x128xf32>
    %422 = arith.addf %419, %421 : vector<8x128xf32>
    %423 = math.tanh %422 : vector<8x128xf32>
    %cst_112 = arith.constant 1.000000e+00 : f32
    %424 = vector.broadcast %cst_112 : f32 to vector<8x128xf32>
    %425 = arith.subf %424, %418 : vector<8x128xf32>
    %426 = arith.mulf %425, %423 : vector<8x128xf32>
    %427 = arith.mulf %418, %390 : vector<8x128xf32>
    %428 = arith.addf %426, %427 : vector<8x128xf32>
    %c0_113 = arith.constant 0 : index
    %429 = arith.index_cast %c10_i32 : i32 to index
    %c0_114 = arith.constant 0 : index
    %c0_115 = arith.constant 0 : index
    %430 = vector.load %arg6[%c0_113, %429, %c0_114, %c0_115] : memref<1x16x8x128xf32, #tpu.memory_space<vmem>>, vector<1x1x8x128xf32>
    %431 = vector.shape_cast %430 : vector<1x1x8x128xf32> to vector<8x128xf32>
    %432 = vector.shape_cast %428 : vector<8x128xf32> to vector<1x1x8x128xf32>
    tpu.vector_store %arg6[%c0_113, %429, %c0_114, %c0_115], %432 {strides = array<i32>} : memref<1x16x8x128xf32, #tpu.memory_space<vmem>>, vector<1x1x8x128xf32>,
    %c11_i32 = arith.constant 11 : i32
    %c8_i32_116 = arith.constant 8 : i32
    %433 = arith.muli %c11_i32, %c8_i32_116 : i32
    %434 = tpu.assume_multiple %433, 8 : i32
    %435 = arith.index_cast %434 : i32 to index
    %c0_117 = arith.constant 0 : index
    %436 = vector.load %arg7[%435, %c0_117] : memref<128x384xf32, #tpu.memory_space<vmem>>, vector<8x384xf32>
    %437 = arith.truncf %428 : vector<8x128xf32> to vector<8x128xbf16>
    %cst_118 = arith.constant dense<0.000000e+00> : vector<8x384xf32>
    %438 = tpu.matmul %437, %11, %cst_118 {dimension_numbers = #tpu.dot_dimension_numbers<[1], [0], [0], [1], [0, 0, 1, 1], [], []>} : vector<8x128xbf16>, vector<128x384xbf16>, vector<8x384xf32> -> vector<8x384xf32>
    %439 = vector.broadcast %13 : vector<1x384xf32> to vector<8x384xf32>
    %440 = arith.addf %438, %439 : vector<8x384xf32>
    %441 = vector.extract_strided_slice %436 {offsets = [0, 0], sizes = [8, 128], strides = [1, 1]} : vector<8x384xf32> to vector<8x128xf32>
    %442 = vector.extract_strided_slice %440 {offsets = [0, 0], sizes = [8, 128], strides = [1, 1]} : vector<8x384xf32> to vector<8x128xf32>
    %443 = arith.addf %441, %442 : vector<8x128xf32>
    %444 = arith.negf %443 : vector<8x128xf32>
    %445 = math.exp %444 : vector<8x128xf32>
    %cst_119 = arith.constant 1.000000e+00 : f32
    %446 = vector.broadcast %cst_119 : f32 to vector<8x128xf32>
    %447 = arith.addf %446, %445 : vector<8x128xf32>
    %448 = arith.divf %446, %447 : vector<8x128xf32>
    %449 = vector.extract_strided_slice %436 {offsets = [0, 128], sizes = [8, 128], strides = [1, 1]} : vector<8x384xf32> to vector<8x128xf32>
    %450 = vector.extract_strided_slice %440 {offsets = [0, 128], sizes = [8, 128], strides = [1, 1]} : vector<8x384xf32> to vector<8x128xf32>
    %451 = arith.addf %449, %450 : vector<8x128xf32>
    %452 = arith.negf %451 : vector<8x128xf32>
    %453 = math.exp %452 : vector<8x128xf32>
    %cst_120 = arith.constant 1.000000e+00 : f32
    %454 = vector.broadcast %cst_120 : f32 to vector<8x128xf32>
    %455 = arith.addf %454, %453 : vector<8x128xf32>
    %456 = arith.divf %454, %455 : vector<8x128xf32>
    %457 = vector.extract_strided_slice %436 {offsets = [0, 256], sizes = [8, 128], strides = [1, 1]} : vector<8x384xf32> to vector<8x128xf32>
    %458 = vector.extract_strided_slice %440 {offsets = [0, 256], sizes = [8, 128], strides = [1, 1]} : vector<8x384xf32> to vector<8x128xf32>
    %459 = arith.mulf %448, %458 : vector<8x128xf32>
    %460 = arith.addf %457, %459 : vector<8x128xf32>
    %461 = math.tanh %460 : vector<8x128xf32>
    %cst_121 = arith.constant 1.000000e+00 : f32
    %462 = vector.broadcast %cst_121 : f32 to vector<8x128xf32>
    %463 = arith.subf %462, %456 : vector<8x128xf32>
    %464 = arith.mulf %463, %461 : vector<8x128xf32>
    %465 = arith.mulf %456, %428 : vector<8x128xf32>
    %466 = arith.addf %464, %465 : vector<8x128xf32>
    %c0_122 = arith.constant 0 : index
    %467 = arith.index_cast %c11_i32 : i32 to index
    %c0_123 = arith.constant 0 : index
    %c0_124 = arith.constant 0 : index
    %468 = vector.load %arg6[%c0_122, %467, %c0_123, %c0_124] : memref<1x16x8x128xf32, #tpu.memory_space<vmem>>, vector<1x1x8x128xf32>
    %469 = vector.shape_cast %468 : vector<1x1x8x128xf32> to vector<8x128xf32>
    %470 = vector.shape_cast %466 : vector<8x128xf32> to vector<1x1x8x128xf32>
    tpu.vector_store %arg6[%c0_122, %467, %c0_123, %c0_124], %470 {strides = array<i32>} : memref<1x16x8x128xf32, #tpu.memory_space<vmem>>, vector<1x1x8x128xf32>,
    %c12_i32 = arith.constant 12 : i32
    %c8_i32_125 = arith.constant 8 : i32
    %471 = arith.muli %c12_i32, %c8_i32_125 : i32
    %472 = tpu.assume_multiple %471, 8 : i32
    %473 = arith.index_cast %472 : i32 to index
    %c0_126 = arith.constant 0 : index
    %474 = vector.load %arg7[%473, %c0_126] : memref<128x384xf32, #tpu.memory_space<vmem>>, vector<8x384xf32>
    %475 = arith.truncf %466 : vector<8x128xf32> to vector<8x128xbf16>
    %cst_127 = arith.constant dense<0.000000e+00> : vector<8x384xf32>
    %476 = tpu.matmul %475, %11, %cst_127 {dimension_numbers = #tpu.dot_dimension_numbers<[1], [0], [0], [1], [0, 0, 1, 1], [], []>} : vector<8x128xbf16>, vector<128x384xbf16>, vector<8x384xf32> -> vector<8x384xf32>
    %477 = vector.broadcast %13 : vector<1x384xf32> to vector<8x384xf32>
    %478 = arith.addf %476, %477 : vector<8x384xf32>
    %479 = vector.extract_strided_slice %474 {offsets = [0, 0], sizes = [8, 128], strides = [1, 1]} : vector<8x384xf32> to vector<8x128xf32>
    %480 = vector.extract_strided_slice %478 {offsets = [0, 0], sizes = [8, 128], strides = [1, 1]} : vector<8x384xf32> to vector<8x128xf32>
    %481 = arith.addf %479, %480 : vector<8x128xf32>
    %482 = arith.negf %481 : vector<8x128xf32>
    %483 = math.exp %482 : vector<8x128xf32>
    %cst_128 = arith.constant 1.000000e+00 : f32
    %484 = vector.broadcast %cst_128 : f32 to vector<8x128xf32>
    %485 = arith.addf %484, %483 : vector<8x128xf32>
    %486 = arith.divf %484, %485 : vector<8x128xf32>
    %487 = vector.extract_strided_slice %474 {offsets = [0, 128], sizes = [8, 128], strides = [1, 1]} : vector<8x384xf32> to vector<8x128xf32>
    %488 = vector.extract_strided_slice %478 {offsets = [0, 128], sizes = [8, 128], strides = [1, 1]} : vector<8x384xf32> to vector<8x128xf32>
    %489 = arith.addf %487, %488 : vector<8x128xf32>
    %490 = arith.negf %489 : vector<8x128xf32>
    %491 = math.exp %490 : vector<8x128xf32>
    %cst_129 = arith.constant 1.000000e+00 : f32
    %492 = vector.broadcast %cst_129 : f32 to vector<8x128xf32>
    %493 = arith.addf %492, %491 : vector<8x128xf32>
    %494 = arith.divf %492, %493 : vector<8x128xf32>
    %495 = vector.extract_strided_slice %474 {offsets = [0, 256], sizes = [8, 128], strides = [1, 1]} : vector<8x384xf32> to vector<8x128xf32>
    %496 = vector.extract_strided_slice %478 {offsets = [0, 256], sizes = [8, 128], strides = [1, 1]} : vector<8x384xf32> to vector<8x128xf32>
    %497 = arith.mulf %486, %496 : vector<8x128xf32>
    %498 = arith.addf %495, %497 : vector<8x128xf32>
    %499 = math.tanh %498 : vector<8x128xf32>
    %cst_130 = arith.constant 1.000000e+00 : f32
    %500 = vector.broadcast %cst_130 : f32 to vector<8x128xf32>
    %501 = arith.subf %500, %494 : vector<8x128xf32>
    %502 = arith.mulf %501, %499 : vector<8x128xf32>
    %503 = arith.mulf %494, %466 : vector<8x128xf32>
    %504 = arith.addf %502, %503 : vector<8x128xf32>
    %c0_131 = arith.constant 0 : index
    %505 = arith.index_cast %c12_i32 : i32 to index
    %c0_132 = arith.constant 0 : index
    %c0_133 = arith.constant 0 : index
    %506 = vector.load %arg6[%c0_131, %505, %c0_132, %c0_133] : memref<1x16x8x128xf32, #tpu.memory_space<vmem>>, vector<1x1x8x128xf32>
    %507 = vector.shape_cast %506 : vector<1x1x8x128xf32> to vector<8x128xf32>
    %508 = vector.shape_cast %504 : vector<8x128xf32> to vector<1x1x8x128xf32>
    tpu.vector_store %arg6[%c0_131, %505, %c0_132, %c0_133], %508 {strides = array<i32>} : memref<1x16x8x128xf32, #tpu.memory_space<vmem>>, vector<1x1x8x128xf32>,
    %c13_i32 = arith.constant 13 : i32
    %c8_i32_134 = arith.constant 8 : i32
    %509 = arith.muli %c13_i32, %c8_i32_134 : i32
    %510 = tpu.assume_multiple %509, 8 : i32
    %511 = arith.index_cast %510 : i32 to index
    %c0_135 = arith.constant 0 : index
    %512 = vector.load %arg7[%511, %c0_135] : memref<128x384xf32, #tpu.memory_space<vmem>>, vector<8x384xf32>
    %513 = arith.truncf %504 : vector<8x128xf32> to vector<8x128xbf16>
    %cst_136 = arith.constant dense<0.000000e+00> : vector<8x384xf32>
    %514 = tpu.matmul %513, %11, %cst_136 {dimension_numbers = #tpu.dot_dimension_numbers<[1], [0], [0], [1], [0, 0, 1, 1], [], []>} : vector<8x128xbf16>, vector<128x384xbf16>, vector<8x384xf32> -> vector<8x384xf32>
    %515 = vector.broadcast %13 : vector<1x384xf32> to vector<8x384xf32>
    %516 = arith.addf %514, %515 : vector<8x384xf32>
    %517 = vector.extract_strided_slice %512 {offsets = [0, 0], sizes = [8, 128], strides = [1, 1]} : vector<8x384xf32> to vector<8x128xf32>
    %518 = vector.extract_strided_slice %516 {offsets = [0, 0], sizes = [8, 128], strides = [1, 1]} : vector<8x384xf32> to vector<8x128xf32>
    %519 = arith.addf %517, %518 : vector<8x128xf32>
    %520 = arith.negf %519 : vector<8x128xf32>
    %521 = math.exp %520 : vector<8x128xf32>
    %cst_137 = arith.constant 1.000000e+00 : f32
    %522 = vector.broadcast %cst_137 : f32 to vector<8x128xf32>
    %523 = arith.addf %522, %521 : vector<8x128xf32>
    %524 = arith.divf %522, %523 : vector<8x128xf32>
    %525 = vector.extract_strided_slice %512 {offsets = [0, 128], sizes = [8, 128], strides = [1, 1]} : vector<8x384xf32> to vector<8x128xf32>
    %526 = vector.extract_strided_slice %516 {offsets = [0, 128], sizes = [8, 128], strides = [1, 1]} : vector<8x384xf32> to vector<8x128xf32>
    %527 = arith.addf %525, %526 : vector<8x128xf32>
    %528 = arith.negf %527 : vector<8x128xf32>
    %529 = math.exp %528 : vector<8x128xf32>
    %cst_138 = arith.constant 1.000000e+00 : f32
    %530 = vector.broadcast %cst_138 : f32 to vector<8x128xf32>
    %531 = arith.addf %530, %529 : vector<8x128xf32>
    %532 = arith.divf %530, %531 : vector<8x128xf32>
    %533 = vector.extract_strided_slice %512 {offsets = [0, 256], sizes = [8, 128], strides = [1, 1]} : vector<8x384xf32> to vector<8x128xf32>
    %534 = vector.extract_strided_slice %516 {offsets = [0, 256], sizes = [8, 128], strides = [1, 1]} : vector<8x384xf32> to vector<8x128xf32>
    %535 = arith.mulf %524, %534 : vector<8x128xf32>
    %536 = arith.addf %533, %535 : vector<8x128xf32>
    %537 = math.tanh %536 : vector<8x128xf32>
    %cst_139 = arith.constant 1.000000e+00 : f32
    %538 = vector.broadcast %cst_139 : f32 to vector<8x128xf32>
    %539 = arith.subf %538, %532 : vector<8x128xf32>
    %540 = arith.mulf %539, %537 : vector<8x128xf32>
    %541 = arith.mulf %532, %504 : vector<8x128xf32>
    %542 = arith.addf %540, %541 : vector<8x128xf32>
    %c0_140 = arith.constant 0 : index
    %543 = arith.index_cast %c13_i32 : i32 to index
    %c0_141 = arith.constant 0 : index
    %c0_142 = arith.constant 0 : index
    %544 = vector.load %arg6[%c0_140, %543, %c0_141, %c0_142] : memref<1x16x8x128xf32, #tpu.memory_space<vmem>>, vector<1x1x8x128xf32>
    %545 = vector.shape_cast %544 : vector<1x1x8x128xf32> to vector<8x128xf32>
    %546 = vector.shape_cast %542 : vector<8x128xf32> to vector<1x1x8x128xf32>
    tpu.vector_store %arg6[%c0_140, %543, %c0_141, %c0_142], %546 {strides = array<i32>} : memref<1x16x8x128xf32, #tpu.memory_space<vmem>>, vector<1x1x8x128xf32>,
    %c14_i32 = arith.constant 14 : i32
    %c8_i32_143 = arith.constant 8 : i32
    %547 = arith.muli %c14_i32, %c8_i32_143 : i32
    %548 = tpu.assume_multiple %547, 8 : i32
    %549 = arith.index_cast %548 : i32 to index
    %c0_144 = arith.constant 0 : index
    %550 = vector.load %arg7[%549, %c0_144] : memref<128x384xf32, #tpu.memory_space<vmem>>, vector<8x384xf32>
    %551 = arith.truncf %542 : vector<8x128xf32> to vector<8x128xbf16>
    %cst_145 = arith.constant dense<0.000000e+00> : vector<8x384xf32>
    %552 = tpu.matmul %551, %11, %cst_145 {dimension_numbers = #tpu.dot_dimension_numbers<[1], [0], [0], [1], [0, 0, 1, 1], [], []>} : vector<8x128xbf16>, vector<128x384xbf16>, vector<8x384xf32> -> vector<8x384xf32>
    %553 = vector.broadcast %13 : vector<1x384xf32> to vector<8x384xf32>
    %554 = arith.addf %552, %553 : vector<8x384xf32>
    %555 = vector.extract_strided_slice %550 {offsets = [0, 0], sizes = [8, 128], strides = [1, 1]} : vector<8x384xf32> to vector<8x128xf32>
    %556 = vector.extract_strided_slice %554 {offsets = [0, 0], sizes = [8, 128], strides = [1, 1]} : vector<8x384xf32> to vector<8x128xf32>
    %557 = arith.addf %555, %556 : vector<8x128xf32>
    %558 = arith.negf %557 : vector<8x128xf32>
    %559 = math.exp %558 : vector<8x128xf32>
    %cst_146 = arith.constant 1.000000e+00 : f32
    %560 = vector.broadcast %cst_146 : f32 to vector<8x128xf32>
    %561 = arith.addf %560, %559 : vector<8x128xf32>
    %562 = arith.divf %560, %561 : vector<8x128xf32>
    %563 = vector.extract_strided_slice %550 {offsets = [0, 128], sizes = [8, 128], strides = [1, 1]} : vector<8x384xf32> to vector<8x128xf32>
    %564 = vector.extract_strided_slice %554 {offsets = [0, 128], sizes = [8, 128], strides = [1, 1]} : vector<8x384xf32> to vector<8x128xf32>
    %565 = arith.addf %563, %564 : vector<8x128xf32>
    %566 = arith.negf %565 : vector<8x128xf32>
    %567 = math.exp %566 : vector<8x128xf32>
    %cst_147 = arith.constant 1.000000e+00 : f32
    %568 = vector.broadcast %cst_147 : f32 to vector<8x128xf32>
    %569 = arith.addf %568, %567 : vector<8x128xf32>
    %570 = arith.divf %568, %569 : vector<8x128xf32>
    %571 = vector.extract_strided_slice %550 {offsets = [0, 256], sizes = [8, 128], strides = [1, 1]} : vector<8x384xf32> to vector<8x128xf32>
    %572 = vector.extract_strided_slice %554 {offsets = [0, 256], sizes = [8, 128], strides = [1, 1]} : vector<8x384xf32> to vector<8x128xf32>
    %573 = arith.mulf %562, %572 : vector<8x128xf32>
    %574 = arith.addf %571, %573 : vector<8x128xf32>
    %575 = math.tanh %574 : vector<8x128xf32>
    %cst_148 = arith.constant 1.000000e+00 : f32
    %576 = vector.broadcast %cst_148 : f32 to vector<8x128xf32>
    %577 = arith.subf %576, %570 : vector<8x128xf32>
    %578 = arith.mulf %577, %575 : vector<8x128xf32>
    %579 = arith.mulf %570, %542 : vector<8x128xf32>
    %580 = arith.addf %578, %579 : vector<8x128xf32>
    %c0_149 = arith.constant 0 : index
    %581 = arith.index_cast %c14_i32 : i32 to index
    %c0_150 = arith.constant 0 : index
    %c0_151 = arith.constant 0 : index
    %582 = vector.load %arg6[%c0_149, %581, %c0_150, %c0_151] : memref<1x16x8x128xf32, #tpu.memory_space<vmem>>, vector<1x1x8x128xf32>
    %583 = vector.shape_cast %582 : vector<1x1x8x128xf32> to vector<8x128xf32>
    %584 = vector.shape_cast %580 : vector<8x128xf32> to vector<1x1x8x128xf32>
    tpu.vector_store %arg6[%c0_149, %581, %c0_150, %c0_151], %584 {strides = array<i32>} : memref<1x16x8x128xf32, #tpu.memory_space<vmem>>, vector<1x1x8x128xf32>,
    %c15_i32 = arith.constant 15 : i32
    %c8_i32_152 = arith.constant 8 : i32
    %585 = arith.muli %c15_i32, %c8_i32_152 : i32
    %586 = tpu.assume_multiple %585, 8 : i32
    %587 = arith.index_cast %586 : i32 to index
    %c0_153 = arith.constant 0 : index
    %588 = vector.load %arg7[%587, %c0_153] : memref<128x384xf32, #tpu.memory_space<vmem>>, vector<8x384xf32>
    %589 = arith.truncf %580 : vector<8x128xf32> to vector<8x128xbf16>
    %cst_154 = arith.constant dense<0.000000e+00> : vector<8x384xf32>
    %590 = tpu.matmul %589, %11, %cst_154 {dimension_numbers = #tpu.dot_dimension_numbers<[1], [0], [0], [1], [0, 0, 1, 1], [], []>} : vector<8x128xbf16>, vector<128x384xbf16>, vector<8x384xf32> -> vector<8x384xf32>
    %591 = vector.broadcast %13 : vector<1x384xf32> to vector<8x384xf32>
    %592 = arith.addf %590, %591 : vector<8x384xf32>
    %593 = vector.extract_strided_slice %588 {offsets = [0, 0], sizes = [8, 128], strides = [1, 1]} : vector<8x384xf32> to vector<8x128xf32>
    %594 = vector.extract_strided_slice %592 {offsets = [0, 0], sizes = [8, 128], strides = [1, 1]} : vector<8x384xf32> to vector<8x128xf32>
    %595 = arith.addf %593, %594 : vector<8x128xf32>
    %596 = arith.negf %595 : vector<8x128xf32>
    %597 = math.exp %596 : vector<8x128xf32>
    %cst_155 = arith.constant 1.000000e+00 : f32
    %598 = vector.broadcast %cst_155 : f32 to vector<8x128xf32>
    %599 = arith.addf %598, %597 : vector<8x128xf32>
    %600 = arith.divf %598, %599 : vector<8x128xf32>
    %601 = vector.extract_strided_slice %588 {offsets = [0, 128], sizes = [8, 128], strides = [1, 1]} : vector<8x384xf32> to vector<8x128xf32>
    %602 = vector.extract_strided_slice %592 {offsets = [0, 128], sizes = [8, 128], strides = [1, 1]} : vector<8x384xf32> to vector<8x128xf32>
    %603 = arith.addf %601, %602 : vector<8x128xf32>
    %604 = arith.negf %603 : vector<8x128xf32>
    %605 = math.exp %604 : vector<8x128xf32>
    %cst_156 = arith.constant 1.000000e+00 : f32
    %606 = vector.broadcast %cst_156 : f32 to vector<8x128xf32>
    %607 = arith.addf %606, %605 : vector<8x128xf32>
    %608 = arith.divf %606, %607 : vector<8x128xf32>
    %609 = vector.extract_strided_slice %588 {offsets = [0, 256], sizes = [8, 128], strides = [1, 1]} : vector<8x384xf32> to vector<8x128xf32>
    %610 = vector.extract_strided_slice %592 {offsets = [0, 256], sizes = [8, 128], strides = [1, 1]} : vector<8x384xf32> to vector<8x128xf32>
    %611 = arith.mulf %600, %610 : vector<8x128xf32>
    %612 = arith.addf %609, %611 : vector<8x128xf32>
    %613 = math.tanh %612 : vector<8x128xf32>
    %cst_157 = arith.constant 1.000000e+00 : f32
    %614 = vector.broadcast %cst_157 : f32 to vector<8x128xf32>
    %615 = arith.subf %614, %608 : vector<8x128xf32>
    %616 = arith.mulf %615, %613 : vector<8x128xf32>
    %617 = arith.mulf %608, %580 : vector<8x128xf32>
    %618 = arith.addf %616, %617 : vector<8x128xf32>
    %c0_158 = arith.constant 0 : index
    %619 = arith.index_cast %c15_i32 : i32 to index
    %c0_159 = arith.constant 0 : index
    %c0_160 = arith.constant 0 : index
    %620 = vector.load %arg6[%c0_158, %619, %c0_159, %c0_160] : memref<1x16x8x128xf32, #tpu.memory_space<vmem>>, vector<1x1x8x128xf32>
    %621 = vector.shape_cast %620 : vector<1x1x8x128xf32> to vector<8x128xf32>
    %622 = vector.shape_cast %618 : vector<8x128xf32> to vector<1x1x8x128xf32>
    tpu.vector_store %arg6[%c0_158, %619, %c0_159, %c0_160], %622 {strides = array<i32>} : memref<1x16x8x128xf32, #tpu.memory_space<vmem>>, vector<1x1x8x128xf32>,
    %c16_i32 = arith.constant 16 : i32
    return
  }
  func.func @transform_0(%arg0: i32) -> (i32, i32, i32) {
    %c0_i32 = arith.constant 0 : i32
    %c0_i32_0 = arith.constant 0 : i32
    %c0_i32_1 = arith.constant 0 : i32
    return %arg0, %c0_i32, %c0_i32_0 : i32, i32, i32
  }
  func.func @transform_1(%arg0: i32) -> (i32, i32, i32) {
    %c0_i32 = arith.constant 0 : i32
    %c0_i32_0 = arith.constant 0 : i32
    %c0_i32_1 = arith.constant 0 : i32
    return %arg0, %c0_i32, %c0_i32_0 : i32, i32, i32
  }
  func.func @transform_2(%arg0: i32) -> (i32, i32, i32) {
    %c0_i32 = arith.constant 0 : i32
    %c0_i32_0 = arith.constant 0 : i32
    %c0_i32_1 = arith.constant 0 : i32
    return %arg0, %c0_i32, %c0_i32_0 : i32, i32, i32
  }
  func.func @transform_3(%arg0: i32) -> (i32, i32, i32) {
    %c0_i32 = arith.constant 0 : i32
    %c0_i32_0 = arith.constant 0 : i32
    %c0_i32_1 = arith.constant 0 : i32
    return %arg0, %c0_i32, %c0_i32_0 : i32, i32, i32
  }
  func.func @transform_4(%arg0: i32) -> (i32, i32, i32) {
    %c0_i32 = arith.constant 0 : i32
    %c0_i32_0 = arith.constant 0 : i32
    %c0_i32_1 = arith.constant 0 : i32
    return %arg0, %c0_i32, %c0_i32_0 : i32, i32, i32
  }
  func.func @transform_5(%arg0: i32) -> (i32, i32, i32, i32) {
    %c0_i32 = arith.constant 0 : i32
    %c0_i32_0 = arith.constant 0 : i32
    %c0_i32_1 = arith.constant 0 : i32
    %c0_i32_2 = arith.constant 0 : i32
    return %arg0, %c0_i32, %c0_i32_0, %c0_i32_1 : i32, i32, i32, i32
  }
}

module attributes {stable_mosaic.version = 11 : i64} {
  func.func @_bi_gru_kernel(%arg0: i32, %arg1: memref<1x64x32xbf16, #tpu.memory_space<vmem>>, %arg2: memref<1x32x384xbf16, #tpu.memory_space<vmem>>, %arg3: memref<1x128x384xbf16, #tpu.memory_space<vmem>>, %arg4: memref<1x1x384xf32, #tpu.memory_space<vmem>>, %arg5: memref<1x1x384xf32, #tpu.memory_space<vmem>>, %arg6: memref<1x8x8x128xf32, #tpu.memory_space<vmem>>, %arg7: memref<64x384xf32, #tpu.memory_space<vmem>>) attributes {dimension_semantics = [#tpu.dimension_semantics<parallel>], iteration_bounds = array<i64: 2>, scalar_prefetch = 0 : i64, scratch_operands = 1 : i64, tpu.core_type = #tpu.core_type<tc>, window_params = [{transform_indices = @transform_0, window_bounds = array<i64: 1, 64, 32>}, {transform_indices = @transform_1, window_bounds = array<i64: 1, 32, 384>}, {transform_indices = @transform_2, window_bounds = array<i64: 1, 128, 384>}, {transform_indices = @transform_3, window_bounds = array<i64: 1, 1, 384>}, {transform_indices = @transform_4, window_bounds = array<i64: 1, 1, 384>}, {transform_indices = @transform_5, window_bounds = array<i64: 1, 8, 8, 128>}]} {
    %c0 = arith.constant 0 : index
    %c0_0 = arith.constant 0 : index
    %c0_1 = arith.constant 0 : index
    %0 = vector.load %arg1[%c0, %c0_0, %c0_1] : memref<1x64x32xbf16, #tpu.memory_space<vmem>>, vector<1x64x32xbf16>
    %1 = vector.shape_cast %0 : vector<1x64x32xbf16> to vector<64x32xbf16>
    %c0_2 = arith.constant 0 : index
    %c0_3 = arith.constant 0 : index
    %c0_4 = arith.constant 0 : index
    %2 = vector.load %arg2[%c0_2, %c0_3, %c0_4] : memref<1x32x384xbf16, #tpu.memory_space<vmem>>, vector<1x32x384xbf16>
    %3 = vector.shape_cast %2 : vector<1x32x384xbf16> to vector<32x384xbf16>
    %cst = arith.constant dense<0.000000e+00> : vector<64x384xf32>
    %4 = tpu.matmul %1, %3, %cst {dimension_numbers = #tpu.dot_dimension_numbers<[1], [0], [0], [1], [0, 0, 1, 1], [], []>} : vector<64x32xbf16>, vector<32x384xbf16>, vector<64x384xf32> -> vector<64x384xf32>
    %c0_5 = arith.constant 0 : index
    %c0_6 = arith.constant 0 : index
    %c0_7 = arith.constant 0 : index
    %5 = vector.load %arg4[%c0_5, %c0_6, %c0_7] : memref<1x1x384xf32, #tpu.memory_space<vmem>>, vector<1x1x384xf32>
    %6 = vector.shape_cast %5 : vector<1x1x384xf32> to vector<1x384xf32>
    %7 = vector.broadcast %6 : vector<1x384xf32> to vector<64x384xf32>
    %8 = arith.addf %4, %7 : vector<64x384xf32>
    %c0_8 = arith.constant 0 : index
    %c0_9 = arith.constant 0 : index
    %9 = vector.load %arg7[%c0_8, %c0_9] : memref<64x384xf32, #tpu.memory_space<vmem>>, vector<64x384xf32>
    tpu.vector_store %arg7[%c0_8, %c0_9], %8 {strides = array<i32>} : memref<64x384xf32, #tpu.memory_space<vmem>>, vector<64x384xf32>,
    %c0_10 = arith.constant 0 : index
    %c0_11 = arith.constant 0 : index
    %c0_12 = arith.constant 0 : index
    %10 = vector.load %arg3[%c0_10, %c0_11, %c0_12] : memref<1x128x384xbf16, #tpu.memory_space<vmem>>, vector<1x128x384xbf16>
    %11 = vector.shape_cast %10 : vector<1x128x384xbf16> to vector<128x384xbf16>
    %c0_13 = arith.constant 0 : index
    %c0_14 = arith.constant 0 : index
    %c0_15 = arith.constant 0 : index
    %12 = vector.load %arg5[%c0_13, %c0_14, %c0_15] : memref<1x1x384xf32, #tpu.memory_space<vmem>>, vector<1x1x384xf32>
    %13 = vector.shape_cast %12 : vector<1x1x384xf32> to vector<1x384xf32>
    %cst_16 = arith.constant 0.000000e+00 : f32
    %14 = vector.broadcast %cst_16 : f32 to vector<8x128xf32>
    %c0_i32 = arith.constant 0 : i32
    %c8_i32 = arith.constant 8 : i32
    %15 = arith.muli %c0_i32, %c8_i32 : i32
    %16 = tpu.assume_multiple %15, 8 : i32
    %17 = arith.index_cast %16 : i32 to index
    %c0_17 = arith.constant 0 : index
    %18 = vector.load %arg7[%17, %c0_17] : memref<64x384xf32, #tpu.memory_space<vmem>>, vector<8x384xf32>
    %19 = arith.truncf %14 : vector<8x128xf32> to vector<8x128xbf16>
    %cst_18 = arith.constant dense<0.000000e+00> : vector<8x384xf32>
    %20 = tpu.matmul %19, %11, %cst_18 {dimension_numbers = #tpu.dot_dimension_numbers<[1], [0], [0], [1], [0, 0, 1, 1], [], []>} : vector<8x128xbf16>, vector<128x384xbf16>, vector<8x384xf32> -> vector<8x384xf32>
    %21 = vector.broadcast %13 : vector<1x384xf32> to vector<8x384xf32>
    %22 = arith.addf %20, %21 : vector<8x384xf32>
    %23 = vector.extract_strided_slice %18 {offsets = [0, 0], sizes = [8, 128], strides = [1, 1]} : vector<8x384xf32> to vector<8x128xf32>
    %24 = vector.extract_strided_slice %22 {offsets = [0, 0], sizes = [8, 128], strides = [1, 1]} : vector<8x384xf32> to vector<8x128xf32>
    %25 = arith.addf %23, %24 : vector<8x128xf32>
    %26 = arith.negf %25 : vector<8x128xf32>
    %27 = math.exp %26 : vector<8x128xf32>
    %cst_19 = arith.constant 1.000000e+00 : f32
    %28 = vector.broadcast %cst_19 : f32 to vector<8x128xf32>
    %29 = arith.addf %28, %27 : vector<8x128xf32>
    %30 = arith.divf %28, %29 : vector<8x128xf32>
    %31 = vector.extract_strided_slice %18 {offsets = [0, 128], sizes = [8, 128], strides = [1, 1]} : vector<8x384xf32> to vector<8x128xf32>
    %32 = vector.extract_strided_slice %22 {offsets = [0, 128], sizes = [8, 128], strides = [1, 1]} : vector<8x384xf32> to vector<8x128xf32>
    %33 = arith.addf %31, %32 : vector<8x128xf32>
    %34 = arith.negf %33 : vector<8x128xf32>
    %35 = math.exp %34 : vector<8x128xf32>
    %cst_20 = arith.constant 1.000000e+00 : f32
    %36 = vector.broadcast %cst_20 : f32 to vector<8x128xf32>
    %37 = arith.addf %36, %35 : vector<8x128xf32>
    %38 = arith.divf %36, %37 : vector<8x128xf32>
    %39 = vector.extract_strided_slice %18 {offsets = [0, 256], sizes = [8, 128], strides = [1, 1]} : vector<8x384xf32> to vector<8x128xf32>
    %40 = vector.extract_strided_slice %22 {offsets = [0, 256], sizes = [8, 128], strides = [1, 1]} : vector<8x384xf32> to vector<8x128xf32>
    %41 = arith.mulf %30, %40 : vector<8x128xf32>
    %42 = arith.addf %39, %41 : vector<8x128xf32>
    %43 = math.tanh %42 : vector<8x128xf32>
    %cst_21 = arith.constant 1.000000e+00 : f32
    %44 = vector.broadcast %cst_21 : f32 to vector<8x128xf32>
    %45 = arith.subf %44, %38 : vector<8x128xf32>
    %46 = arith.mulf %45, %43 : vector<8x128xf32>
    %47 = arith.mulf %38, %14 : vector<8x128xf32>
    %48 = arith.addf %46, %47 : vector<8x128xf32>
    %c0_22 = arith.constant 0 : index
    %49 = arith.index_cast %c0_i32 : i32 to index
    %c0_23 = arith.constant 0 : index
    %c0_24 = arith.constant 0 : index
    %50 = vector.load %arg6[%c0_22, %49, %c0_23, %c0_24] : memref<1x8x8x128xf32, #tpu.memory_space<vmem>>, vector<1x1x8x128xf32>
    %51 = vector.shape_cast %50 : vector<1x1x8x128xf32> to vector<8x128xf32>
    %52 = vector.shape_cast %48 : vector<8x128xf32> to vector<1x1x8x128xf32>
    tpu.vector_store %arg6[%c0_22, %49, %c0_23, %c0_24], %52 {strides = array<i32>} : memref<1x8x8x128xf32, #tpu.memory_space<vmem>>, vector<1x1x8x128xf32>,
    %c1_i32 = arith.constant 1 : i32
    %c8_i32_25 = arith.constant 8 : i32
    %53 = arith.muli %c1_i32, %c8_i32_25 : i32
    %54 = tpu.assume_multiple %53, 8 : i32
    %55 = arith.index_cast %54 : i32 to index
    %c0_26 = arith.constant 0 : index
    %56 = vector.load %arg7[%55, %c0_26] : memref<64x384xf32, #tpu.memory_space<vmem>>, vector<8x384xf32>
    %57 = arith.truncf %48 : vector<8x128xf32> to vector<8x128xbf16>
    %cst_27 = arith.constant dense<0.000000e+00> : vector<8x384xf32>
    %58 = tpu.matmul %57, %11, %cst_27 {dimension_numbers = #tpu.dot_dimension_numbers<[1], [0], [0], [1], [0, 0, 1, 1], [], []>} : vector<8x128xbf16>, vector<128x384xbf16>, vector<8x384xf32> -> vector<8x384xf32>
    %59 = vector.broadcast %13 : vector<1x384xf32> to vector<8x384xf32>
    %60 = arith.addf %58, %59 : vector<8x384xf32>
    %61 = vector.extract_strided_slice %56 {offsets = [0, 0], sizes = [8, 128], strides = [1, 1]} : vector<8x384xf32> to vector<8x128xf32>
    %62 = vector.extract_strided_slice %60 {offsets = [0, 0], sizes = [8, 128], strides = [1, 1]} : vector<8x384xf32> to vector<8x128xf32>
    %63 = arith.addf %61, %62 : vector<8x128xf32>
    %64 = arith.negf %63 : vector<8x128xf32>
    %65 = math.exp %64 : vector<8x128xf32>
    %cst_28 = arith.constant 1.000000e+00 : f32
    %66 = vector.broadcast %cst_28 : f32 to vector<8x128xf32>
    %67 = arith.addf %66, %65 : vector<8x128xf32>
    %68 = arith.divf %66, %67 : vector<8x128xf32>
    %69 = vector.extract_strided_slice %56 {offsets = [0, 128], sizes = [8, 128], strides = [1, 1]} : vector<8x384xf32> to vector<8x128xf32>
    %70 = vector.extract_strided_slice %60 {offsets = [0, 128], sizes = [8, 128], strides = [1, 1]} : vector<8x384xf32> to vector<8x128xf32>
    %71 = arith.addf %69, %70 : vector<8x128xf32>
    %72 = arith.negf %71 : vector<8x128xf32>
    %73 = math.exp %72 : vector<8x128xf32>
    %cst_29 = arith.constant 1.000000e+00 : f32
    %74 = vector.broadcast %cst_29 : f32 to vector<8x128xf32>
    %75 = arith.addf %74, %73 : vector<8x128xf32>
    %76 = arith.divf %74, %75 : vector<8x128xf32>
    %77 = vector.extract_strided_slice %56 {offsets = [0, 256], sizes = [8, 128], strides = [1, 1]} : vector<8x384xf32> to vector<8x128xf32>
    %78 = vector.extract_strided_slice %60 {offsets = [0, 256], sizes = [8, 128], strides = [1, 1]} : vector<8x384xf32> to vector<8x128xf32>
    %79 = arith.mulf %68, %78 : vector<8x128xf32>
    %80 = arith.addf %77, %79 : vector<8x128xf32>
    %81 = math.tanh %80 : vector<8x128xf32>
    %cst_30 = arith.constant 1.000000e+00 : f32
    %82 = vector.broadcast %cst_30 : f32 to vector<8x128xf32>
    %83 = arith.subf %82, %76 : vector<8x128xf32>
    %84 = arith.mulf %83, %81 : vector<8x128xf32>
    %85 = arith.mulf %76, %48 : vector<8x128xf32>
    %86 = arith.addf %84, %85 : vector<8x128xf32>
    %c0_31 = arith.constant 0 : index
    %87 = arith.index_cast %c1_i32 : i32 to index
    %c0_32 = arith.constant 0 : index
    %c0_33 = arith.constant 0 : index
    %88 = vector.load %arg6[%c0_31, %87, %c0_32, %c0_33] : memref<1x8x8x128xf32, #tpu.memory_space<vmem>>, vector<1x1x8x128xf32>
    %89 = vector.shape_cast %88 : vector<1x1x8x128xf32> to vector<8x128xf32>
    %90 = vector.shape_cast %86 : vector<8x128xf32> to vector<1x1x8x128xf32>
    tpu.vector_store %arg6[%c0_31, %87, %c0_32, %c0_33], %90 {strides = array<i32>} : memref<1x8x8x128xf32, #tpu.memory_space<vmem>>, vector<1x1x8x128xf32>,
    %c2_i32 = arith.constant 2 : i32
    %c8_i32_34 = arith.constant 8 : i32
    %91 = arith.muli %c2_i32, %c8_i32_34 : i32
    %92 = tpu.assume_multiple %91, 8 : i32
    %93 = arith.index_cast %92 : i32 to index
    %c0_35 = arith.constant 0 : index
    %94 = vector.load %arg7[%93, %c0_35] : memref<64x384xf32, #tpu.memory_space<vmem>>, vector<8x384xf32>
    %95 = arith.truncf %86 : vector<8x128xf32> to vector<8x128xbf16>
    %cst_36 = arith.constant dense<0.000000e+00> : vector<8x384xf32>
    %96 = tpu.matmul %95, %11, %cst_36 {dimension_numbers = #tpu.dot_dimension_numbers<[1], [0], [0], [1], [0, 0, 1, 1], [], []>} : vector<8x128xbf16>, vector<128x384xbf16>, vector<8x384xf32> -> vector<8x384xf32>
    %97 = vector.broadcast %13 : vector<1x384xf32> to vector<8x384xf32>
    %98 = arith.addf %96, %97 : vector<8x384xf32>
    %99 = vector.extract_strided_slice %94 {offsets = [0, 0], sizes = [8, 128], strides = [1, 1]} : vector<8x384xf32> to vector<8x128xf32>
    %100 = vector.extract_strided_slice %98 {offsets = [0, 0], sizes = [8, 128], strides = [1, 1]} : vector<8x384xf32> to vector<8x128xf32>
    %101 = arith.addf %99, %100 : vector<8x128xf32>
    %102 = arith.negf %101 : vector<8x128xf32>
    %103 = math.exp %102 : vector<8x128xf32>
    %cst_37 = arith.constant 1.000000e+00 : f32
    %104 = vector.broadcast %cst_37 : f32 to vector<8x128xf32>
    %105 = arith.addf %104, %103 : vector<8x128xf32>
    %106 = arith.divf %104, %105 : vector<8x128xf32>
    %107 = vector.extract_strided_slice %94 {offsets = [0, 128], sizes = [8, 128], strides = [1, 1]} : vector<8x384xf32> to vector<8x128xf32>
    %108 = vector.extract_strided_slice %98 {offsets = [0, 128], sizes = [8, 128], strides = [1, 1]} : vector<8x384xf32> to vector<8x128xf32>
    %109 = arith.addf %107, %108 : vector<8x128xf32>
    %110 = arith.negf %109 : vector<8x128xf32>
    %111 = math.exp %110 : vector<8x128xf32>
    %cst_38 = arith.constant 1.000000e+00 : f32
    %112 = vector.broadcast %cst_38 : f32 to vector<8x128xf32>
    %113 = arith.addf %112, %111 : vector<8x128xf32>
    %114 = arith.divf %112, %113 : vector<8x128xf32>
    %115 = vector.extract_strided_slice %94 {offsets = [0, 256], sizes = [8, 128], strides = [1, 1]} : vector<8x384xf32> to vector<8x128xf32>
    %116 = vector.extract_strided_slice %98 {offsets = [0, 256], sizes = [8, 128], strides = [1, 1]} : vector<8x384xf32> to vector<8x128xf32>
    %117 = arith.mulf %106, %116 : vector<8x128xf32>
    %118 = arith.addf %115, %117 : vector<8x128xf32>
    %119 = math.tanh %118 : vector<8x128xf32>
    %cst_39 = arith.constant 1.000000e+00 : f32
    %120 = vector.broadcast %cst_39 : f32 to vector<8x128xf32>
    %121 = arith.subf %120, %114 : vector<8x128xf32>
    %122 = arith.mulf %121, %119 : vector<8x128xf32>
    %123 = arith.mulf %114, %86 : vector<8x128xf32>
    %124 = arith.addf %122, %123 : vector<8x128xf32>
    %c0_40 = arith.constant 0 : index
    %125 = arith.index_cast %c2_i32 : i32 to index
    %c0_41 = arith.constant 0 : index
    %c0_42 = arith.constant 0 : index
    %126 = vector.load %arg6[%c0_40, %125, %c0_41, %c0_42] : memref<1x8x8x128xf32, #tpu.memory_space<vmem>>, vector<1x1x8x128xf32>
    %127 = vector.shape_cast %126 : vector<1x1x8x128xf32> to vector<8x128xf32>
    %128 = vector.shape_cast %124 : vector<8x128xf32> to vector<1x1x8x128xf32>
    tpu.vector_store %arg6[%c0_40, %125, %c0_41, %c0_42], %128 {strides = array<i32>} : memref<1x8x8x128xf32, #tpu.memory_space<vmem>>, vector<1x1x8x128xf32>,
    %c3_i32 = arith.constant 3 : i32
    %c8_i32_43 = arith.constant 8 : i32
    %129 = arith.muli %c3_i32, %c8_i32_43 : i32
    %130 = tpu.assume_multiple %129, 8 : i32
    %131 = arith.index_cast %130 : i32 to index
    %c0_44 = arith.constant 0 : index
    %132 = vector.load %arg7[%131, %c0_44] : memref<64x384xf32, #tpu.memory_space<vmem>>, vector<8x384xf32>
    %133 = arith.truncf %124 : vector<8x128xf32> to vector<8x128xbf16>
    %cst_45 = arith.constant dense<0.000000e+00> : vector<8x384xf32>
    %134 = tpu.matmul %133, %11, %cst_45 {dimension_numbers = #tpu.dot_dimension_numbers<[1], [0], [0], [1], [0, 0, 1, 1], [], []>} : vector<8x128xbf16>, vector<128x384xbf16>, vector<8x384xf32> -> vector<8x384xf32>
    %135 = vector.broadcast %13 : vector<1x384xf32> to vector<8x384xf32>
    %136 = arith.addf %134, %135 : vector<8x384xf32>
    %137 = vector.extract_strided_slice %132 {offsets = [0, 0], sizes = [8, 128], strides = [1, 1]} : vector<8x384xf32> to vector<8x128xf32>
    %138 = vector.extract_strided_slice %136 {offsets = [0, 0], sizes = [8, 128], strides = [1, 1]} : vector<8x384xf32> to vector<8x128xf32>
    %139 = arith.addf %137, %138 : vector<8x128xf32>
    %140 = arith.negf %139 : vector<8x128xf32>
    %141 = math.exp %140 : vector<8x128xf32>
    %cst_46 = arith.constant 1.000000e+00 : f32
    %142 = vector.broadcast %cst_46 : f32 to vector<8x128xf32>
    %143 = arith.addf %142, %141 : vector<8x128xf32>
    %144 = arith.divf %142, %143 : vector<8x128xf32>
    %145 = vector.extract_strided_slice %132 {offsets = [0, 128], sizes = [8, 128], strides = [1, 1]} : vector<8x384xf32> to vector<8x128xf32>
    %146 = vector.extract_strided_slice %136 {offsets = [0, 128], sizes = [8, 128], strides = [1, 1]} : vector<8x384xf32> to vector<8x128xf32>
    %147 = arith.addf %145, %146 : vector<8x128xf32>
    %148 = arith.negf %147 : vector<8x128xf32>
    %149 = math.exp %148 : vector<8x128xf32>
    %cst_47 = arith.constant 1.000000e+00 : f32
    %150 = vector.broadcast %cst_47 : f32 to vector<8x128xf32>
    %151 = arith.addf %150, %149 : vector<8x128xf32>
    %152 = arith.divf %150, %151 : vector<8x128xf32>
    %153 = vector.extract_strided_slice %132 {offsets = [0, 256], sizes = [8, 128], strides = [1, 1]} : vector<8x384xf32> to vector<8x128xf32>
    %154 = vector.extract_strided_slice %136 {offsets = [0, 256], sizes = [8, 128], strides = [1, 1]} : vector<8x384xf32> to vector<8x128xf32>
    %155 = arith.mulf %144, %154 : vector<8x128xf32>
    %156 = arith.addf %153, %155 : vector<8x128xf32>
    %157 = math.tanh %156 : vector<8x128xf32>
    %cst_48 = arith.constant 1.000000e+00 : f32
    %158 = vector.broadcast %cst_48 : f32 to vector<8x128xf32>
    %159 = arith.subf %158, %152 : vector<8x128xf32>
    %160 = arith.mulf %159, %157 : vector<8x128xf32>
    %161 = arith.mulf %152, %124 : vector<8x128xf32>
    %162 = arith.addf %160, %161 : vector<8x128xf32>
    %c0_49 = arith.constant 0 : index
    %163 = arith.index_cast %c3_i32 : i32 to index
    %c0_50 = arith.constant 0 : index
    %c0_51 = arith.constant 0 : index
    %164 = vector.load %arg6[%c0_49, %163, %c0_50, %c0_51] : memref<1x8x8x128xf32, #tpu.memory_space<vmem>>, vector<1x1x8x128xf32>
    %165 = vector.shape_cast %164 : vector<1x1x8x128xf32> to vector<8x128xf32>
    %166 = vector.shape_cast %162 : vector<8x128xf32> to vector<1x1x8x128xf32>
    tpu.vector_store %arg6[%c0_49, %163, %c0_50, %c0_51], %166 {strides = array<i32>} : memref<1x8x8x128xf32, #tpu.memory_space<vmem>>, vector<1x1x8x128xf32>,
    %c4_i32 = arith.constant 4 : i32
    %c8_i32_52 = arith.constant 8 : i32
    %167 = arith.muli %c4_i32, %c8_i32_52 : i32
    %168 = tpu.assume_multiple %167, 8 : i32
    %169 = arith.index_cast %168 : i32 to index
    %c0_53 = arith.constant 0 : index
    %170 = vector.load %arg7[%169, %c0_53] : memref<64x384xf32, #tpu.memory_space<vmem>>, vector<8x384xf32>
    %171 = arith.truncf %162 : vector<8x128xf32> to vector<8x128xbf16>
    %cst_54 = arith.constant dense<0.000000e+00> : vector<8x384xf32>
    %172 = tpu.matmul %171, %11, %cst_54 {dimension_numbers = #tpu.dot_dimension_numbers<[1], [0], [0], [1], [0, 0, 1, 1], [], []>} : vector<8x128xbf16>, vector<128x384xbf16>, vector<8x384xf32> -> vector<8x384xf32>
    %173 = vector.broadcast %13 : vector<1x384xf32> to vector<8x384xf32>
    %174 = arith.addf %172, %173 : vector<8x384xf32>
    %175 = vector.extract_strided_slice %170 {offsets = [0, 0], sizes = [8, 128], strides = [1, 1]} : vector<8x384xf32> to vector<8x128xf32>
    %176 = vector.extract_strided_slice %174 {offsets = [0, 0], sizes = [8, 128], strides = [1, 1]} : vector<8x384xf32> to vector<8x128xf32>
    %177 = arith.addf %175, %176 : vector<8x128xf32>
    %178 = arith.negf %177 : vector<8x128xf32>
    %179 = math.exp %178 : vector<8x128xf32>
    %cst_55 = arith.constant 1.000000e+00 : f32
    %180 = vector.broadcast %cst_55 : f32 to vector<8x128xf32>
    %181 = arith.addf %180, %179 : vector<8x128xf32>
    %182 = arith.divf %180, %181 : vector<8x128xf32>
    %183 = vector.extract_strided_slice %170 {offsets = [0, 128], sizes = [8, 128], strides = [1, 1]} : vector<8x384xf32> to vector<8x128xf32>
    %184 = vector.extract_strided_slice %174 {offsets = [0, 128], sizes = [8, 128], strides = [1, 1]} : vector<8x384xf32> to vector<8x128xf32>
    %185 = arith.addf %183, %184 : vector<8x128xf32>
    %186 = arith.negf %185 : vector<8x128xf32>
    %187 = math.exp %186 : vector<8x128xf32>
    %cst_56 = arith.constant 1.000000e+00 : f32
    %188 = vector.broadcast %cst_56 : f32 to vector<8x128xf32>
    %189 = arith.addf %188, %187 : vector<8x128xf32>
    %190 = arith.divf %188, %189 : vector<8x128xf32>
    %191 = vector.extract_strided_slice %170 {offsets = [0, 256], sizes = [8, 128], strides = [1, 1]} : vector<8x384xf32> to vector<8x128xf32>
    %192 = vector.extract_strided_slice %174 {offsets = [0, 256], sizes = [8, 128], strides = [1, 1]} : vector<8x384xf32> to vector<8x128xf32>
    %193 = arith.mulf %182, %192 : vector<8x128xf32>
    %194 = arith.addf %191, %193 : vector<8x128xf32>
    %195 = math.tanh %194 : vector<8x128xf32>
    %cst_57 = arith.constant 1.000000e+00 : f32
    %196 = vector.broadcast %cst_57 : f32 to vector<8x128xf32>
    %197 = arith.subf %196, %190 : vector<8x128xf32>
    %198 = arith.mulf %197, %195 : vector<8x128xf32>
    %199 = arith.mulf %190, %162 : vector<8x128xf32>
    %200 = arith.addf %198, %199 : vector<8x128xf32>
    %c0_58 = arith.constant 0 : index
    %201 = arith.index_cast %c4_i32 : i32 to index
    %c0_59 = arith.constant 0 : index
    %c0_60 = arith.constant 0 : index
    %202 = vector.load %arg6[%c0_58, %201, %c0_59, %c0_60] : memref<1x8x8x128xf32, #tpu.memory_space<vmem>>, vector<1x1x8x128xf32>
    %203 = vector.shape_cast %202 : vector<1x1x8x128xf32> to vector<8x128xf32>
    %204 = vector.shape_cast %200 : vector<8x128xf32> to vector<1x1x8x128xf32>
    tpu.vector_store %arg6[%c0_58, %201, %c0_59, %c0_60], %204 {strides = array<i32>} : memref<1x8x8x128xf32, #tpu.memory_space<vmem>>, vector<1x1x8x128xf32>,
    %c5_i32 = arith.constant 5 : i32
    %c8_i32_61 = arith.constant 8 : i32
    %205 = arith.muli %c5_i32, %c8_i32_61 : i32
    %206 = tpu.assume_multiple %205, 8 : i32
    %207 = arith.index_cast %206 : i32 to index
    %c0_62 = arith.constant 0 : index
    %208 = vector.load %arg7[%207, %c0_62] : memref<64x384xf32, #tpu.memory_space<vmem>>, vector<8x384xf32>
    %209 = arith.truncf %200 : vector<8x128xf32> to vector<8x128xbf16>
    %cst_63 = arith.constant dense<0.000000e+00> : vector<8x384xf32>
    %210 = tpu.matmul %209, %11, %cst_63 {dimension_numbers = #tpu.dot_dimension_numbers<[1], [0], [0], [1], [0, 0, 1, 1], [], []>} : vector<8x128xbf16>, vector<128x384xbf16>, vector<8x384xf32> -> vector<8x384xf32>
    %211 = vector.broadcast %13 : vector<1x384xf32> to vector<8x384xf32>
    %212 = arith.addf %210, %211 : vector<8x384xf32>
    %213 = vector.extract_strided_slice %208 {offsets = [0, 0], sizes = [8, 128], strides = [1, 1]} : vector<8x384xf32> to vector<8x128xf32>
    %214 = vector.extract_strided_slice %212 {offsets = [0, 0], sizes = [8, 128], strides = [1, 1]} : vector<8x384xf32> to vector<8x128xf32>
    %215 = arith.addf %213, %214 : vector<8x128xf32>
    %216 = arith.negf %215 : vector<8x128xf32>
    %217 = math.exp %216 : vector<8x128xf32>
    %cst_64 = arith.constant 1.000000e+00 : f32
    %218 = vector.broadcast %cst_64 : f32 to vector<8x128xf32>
    %219 = arith.addf %218, %217 : vector<8x128xf32>
    %220 = arith.divf %218, %219 : vector<8x128xf32>
    %221 = vector.extract_strided_slice %208 {offsets = [0, 128], sizes = [8, 128], strides = [1, 1]} : vector<8x384xf32> to vector<8x128xf32>
    %222 = vector.extract_strided_slice %212 {offsets = [0, 128], sizes = [8, 128], strides = [1, 1]} : vector<8x384xf32> to vector<8x128xf32>
    %223 = arith.addf %221, %222 : vector<8x128xf32>
    %224 = arith.negf %223 : vector<8x128xf32>
    %225 = math.exp %224 : vector<8x128xf32>
    %cst_65 = arith.constant 1.000000e+00 : f32
    %226 = vector.broadcast %cst_65 : f32 to vector<8x128xf32>
    %227 = arith.addf %226, %225 : vector<8x128xf32>
    %228 = arith.divf %226, %227 : vector<8x128xf32>
    %229 = vector.extract_strided_slice %208 {offsets = [0, 256], sizes = [8, 128], strides = [1, 1]} : vector<8x384xf32> to vector<8x128xf32>
    %230 = vector.extract_strided_slice %212 {offsets = [0, 256], sizes = [8, 128], strides = [1, 1]} : vector<8x384xf32> to vector<8x128xf32>
    %231 = arith.mulf %220, %230 : vector<8x128xf32>
    %232 = arith.addf %229, %231 : vector<8x128xf32>
    %233 = math.tanh %232 : vector<8x128xf32>
    %cst_66 = arith.constant 1.000000e+00 : f32
    %234 = vector.broadcast %cst_66 : f32 to vector<8x128xf32>
    %235 = arith.subf %234, %228 : vector<8x128xf32>
    %236 = arith.mulf %235, %233 : vector<8x128xf32>
    %237 = arith.mulf %228, %200 : vector<8x128xf32>
    %238 = arith.addf %236, %237 : vector<8x128xf32>
    %c0_67 = arith.constant 0 : index
    %239 = arith.index_cast %c5_i32 : i32 to index
    %c0_68 = arith.constant 0 : index
    %c0_69 = arith.constant 0 : index
    %240 = vector.load %arg6[%c0_67, %239, %c0_68, %c0_69] : memref<1x8x8x128xf32, #tpu.memory_space<vmem>>, vector<1x1x8x128xf32>
    %241 = vector.shape_cast %240 : vector<1x1x8x128xf32> to vector<8x128xf32>
    %242 = vector.shape_cast %238 : vector<8x128xf32> to vector<1x1x8x128xf32>
    tpu.vector_store %arg6[%c0_67, %239, %c0_68, %c0_69], %242 {strides = array<i32>} : memref<1x8x8x128xf32, #tpu.memory_space<vmem>>, vector<1x1x8x128xf32>,
    %c6_i32 = arith.constant 6 : i32
    %c8_i32_70 = arith.constant 8 : i32
    %243 = arith.muli %c6_i32, %c8_i32_70 : i32
    %244 = tpu.assume_multiple %243, 8 : i32
    %245 = arith.index_cast %244 : i32 to index
    %c0_71 = arith.constant 0 : index
    %246 = vector.load %arg7[%245, %c0_71] : memref<64x384xf32, #tpu.memory_space<vmem>>, vector<8x384xf32>
    %247 = arith.truncf %238 : vector<8x128xf32> to vector<8x128xbf16>
    %cst_72 = arith.constant dense<0.000000e+00> : vector<8x384xf32>
    %248 = tpu.matmul %247, %11, %cst_72 {dimension_numbers = #tpu.dot_dimension_numbers<[1], [0], [0], [1], [0, 0, 1, 1], [], []>} : vector<8x128xbf16>, vector<128x384xbf16>, vector<8x384xf32> -> vector<8x384xf32>
    %249 = vector.broadcast %13 : vector<1x384xf32> to vector<8x384xf32>
    %250 = arith.addf %248, %249 : vector<8x384xf32>
    %251 = vector.extract_strided_slice %246 {offsets = [0, 0], sizes = [8, 128], strides = [1, 1]} : vector<8x384xf32> to vector<8x128xf32>
    %252 = vector.extract_strided_slice %250 {offsets = [0, 0], sizes = [8, 128], strides = [1, 1]} : vector<8x384xf32> to vector<8x128xf32>
    %253 = arith.addf %251, %252 : vector<8x128xf32>
    %254 = arith.negf %253 : vector<8x128xf32>
    %255 = math.exp %254 : vector<8x128xf32>
    %cst_73 = arith.constant 1.000000e+00 : f32
    %256 = vector.broadcast %cst_73 : f32 to vector<8x128xf32>
    %257 = arith.addf %256, %255 : vector<8x128xf32>
    %258 = arith.divf %256, %257 : vector<8x128xf32>
    %259 = vector.extract_strided_slice %246 {offsets = [0, 128], sizes = [8, 128], strides = [1, 1]} : vector<8x384xf32> to vector<8x128xf32>
    %260 = vector.extract_strided_slice %250 {offsets = [0, 128], sizes = [8, 128], strides = [1, 1]} : vector<8x384xf32> to vector<8x128xf32>
    %261 = arith.addf %259, %260 : vector<8x128xf32>
    %262 = arith.negf %261 : vector<8x128xf32>
    %263 = math.exp %262 : vector<8x128xf32>
    %cst_74 = arith.constant 1.000000e+00 : f32
    %264 = vector.broadcast %cst_74 : f32 to vector<8x128xf32>
    %265 = arith.addf %264, %263 : vector<8x128xf32>
    %266 = arith.divf %264, %265 : vector<8x128xf32>
    %267 = vector.extract_strided_slice %246 {offsets = [0, 256], sizes = [8, 128], strides = [1, 1]} : vector<8x384xf32> to vector<8x128xf32>
    %268 = vector.extract_strided_slice %250 {offsets = [0, 256], sizes = [8, 128], strides = [1, 1]} : vector<8x384xf32> to vector<8x128xf32>
    %269 = arith.mulf %258, %268 : vector<8x128xf32>
    %270 = arith.addf %267, %269 : vector<8x128xf32>
    %271 = math.tanh %270 : vector<8x128xf32>
    %cst_75 = arith.constant 1.000000e+00 : f32
    %272 = vector.broadcast %cst_75 : f32 to vector<8x128xf32>
    %273 = arith.subf %272, %266 : vector<8x128xf32>
    %274 = arith.mulf %273, %271 : vector<8x128xf32>
    %275 = arith.mulf %266, %238 : vector<8x128xf32>
    %276 = arith.addf %274, %275 : vector<8x128xf32>
    %c0_76 = arith.constant 0 : index
    %277 = arith.index_cast %c6_i32 : i32 to index
    %c0_77 = arith.constant 0 : index
    %c0_78 = arith.constant 0 : index
    %278 = vector.load %arg6[%c0_76, %277, %c0_77, %c0_78] : memref<1x8x8x128xf32, #tpu.memory_space<vmem>>, vector<1x1x8x128xf32>
    %279 = vector.shape_cast %278 : vector<1x1x8x128xf32> to vector<8x128xf32>
    %280 = vector.shape_cast %276 : vector<8x128xf32> to vector<1x1x8x128xf32>
    tpu.vector_store %arg6[%c0_76, %277, %c0_77, %c0_78], %280 {strides = array<i32>} : memref<1x8x8x128xf32, #tpu.memory_space<vmem>>, vector<1x1x8x128xf32>,
    %c7_i32 = arith.constant 7 : i32
    %c8_i32_79 = arith.constant 8 : i32
    %281 = arith.muli %c7_i32, %c8_i32_79 : i32
    %282 = tpu.assume_multiple %281, 8 : i32
    %283 = arith.index_cast %282 : i32 to index
    %c0_80 = arith.constant 0 : index
    %284 = vector.load %arg7[%283, %c0_80] : memref<64x384xf32, #tpu.memory_space<vmem>>, vector<8x384xf32>
    %285 = arith.truncf %276 : vector<8x128xf32> to vector<8x128xbf16>
    %cst_81 = arith.constant dense<0.000000e+00> : vector<8x384xf32>
    %286 = tpu.matmul %285, %11, %cst_81 {dimension_numbers = #tpu.dot_dimension_numbers<[1], [0], [0], [1], [0, 0, 1, 1], [], []>} : vector<8x128xbf16>, vector<128x384xbf16>, vector<8x384xf32> -> vector<8x384xf32>
    %287 = vector.broadcast %13 : vector<1x384xf32> to vector<8x384xf32>
    %288 = arith.addf %286, %287 : vector<8x384xf32>
    %289 = vector.extract_strided_slice %284 {offsets = [0, 0], sizes = [8, 128], strides = [1, 1]} : vector<8x384xf32> to vector<8x128xf32>
    %290 = vector.extract_strided_slice %288 {offsets = [0, 0], sizes = [8, 128], strides = [1, 1]} : vector<8x384xf32> to vector<8x128xf32>
    %291 = arith.addf %289, %290 : vector<8x128xf32>
    %292 = arith.negf %291 : vector<8x128xf32>
    %293 = math.exp %292 : vector<8x128xf32>
    %cst_82 = arith.constant 1.000000e+00 : f32
    %294 = vector.broadcast %cst_82 : f32 to vector<8x128xf32>
    %295 = arith.addf %294, %293 : vector<8x128xf32>
    %296 = arith.divf %294, %295 : vector<8x128xf32>
    %297 = vector.extract_strided_slice %284 {offsets = [0, 128], sizes = [8, 128], strides = [1, 1]} : vector<8x384xf32> to vector<8x128xf32>
    %298 = vector.extract_strided_slice %288 {offsets = [0, 128], sizes = [8, 128], strides = [1, 1]} : vector<8x384xf32> to vector<8x128xf32>
    %299 = arith.addf %297, %298 : vector<8x128xf32>
    %300 = arith.negf %299 : vector<8x128xf32>
    %301 = math.exp %300 : vector<8x128xf32>
    %cst_83 = arith.constant 1.000000e+00 : f32
    %302 = vector.broadcast %cst_83 : f32 to vector<8x128xf32>
    %303 = arith.addf %302, %301 : vector<8x128xf32>
    %304 = arith.divf %302, %303 : vector<8x128xf32>
    %305 = vector.extract_strided_slice %284 {offsets = [0, 256], sizes = [8, 128], strides = [1, 1]} : vector<8x384xf32> to vector<8x128xf32>
    %306 = vector.extract_strided_slice %288 {offsets = [0, 256], sizes = [8, 128], strides = [1, 1]} : vector<8x384xf32> to vector<8x128xf32>
    %307 = arith.mulf %296, %306 : vector<8x128xf32>
    %308 = arith.addf %305, %307 : vector<8x128xf32>
    %309 = math.tanh %308 : vector<8x128xf32>
    %cst_84 = arith.constant 1.000000e+00 : f32
    %310 = vector.broadcast %cst_84 : f32 to vector<8x128xf32>
    %311 = arith.subf %310, %304 : vector<8x128xf32>
    %312 = arith.mulf %311, %309 : vector<8x128xf32>
    %313 = arith.mulf %304, %276 : vector<8x128xf32>
    %314 = arith.addf %312, %313 : vector<8x128xf32>
    %c0_85 = arith.constant 0 : index
    %315 = arith.index_cast %c7_i32 : i32 to index
    %c0_86 = arith.constant 0 : index
    %c0_87 = arith.constant 0 : index
    %316 = vector.load %arg6[%c0_85, %315, %c0_86, %c0_87] : memref<1x8x8x128xf32, #tpu.memory_space<vmem>>, vector<1x1x8x128xf32>
    %317 = vector.shape_cast %316 : vector<1x1x8x128xf32> to vector<8x128xf32>
    %318 = vector.shape_cast %314 : vector<8x128xf32> to vector<1x1x8x128xf32>
    tpu.vector_store %arg6[%c0_85, %315, %c0_86, %c0_87], %318 {strides = array<i32>} : memref<1x8x8x128xf32, #tpu.memory_space<vmem>>, vector<1x1x8x128xf32>,
    %c8_i32_88 = arith.constant 8 : i32
    return
  }
  func.func @transform_0(%arg0: i32) -> (i32, i32, i32) {
    %c0_i32 = arith.constant 0 : i32
    %c0_i32_0 = arith.constant 0 : i32
    %c0_i32_1 = arith.constant 0 : i32
    return %arg0, %c0_i32, %c0_i32_0 : i32, i32, i32
  }
  func.func @transform_1(%arg0: i32) -> (i32, i32, i32) {
    %c0_i32 = arith.constant 0 : i32
    %c0_i32_0 = arith.constant 0 : i32
    %c0_i32_1 = arith.constant 0 : i32
    return %arg0, %c0_i32, %c0_i32_0 : i32, i32, i32
  }
  func.func @transform_2(%arg0: i32) -> (i32, i32, i32) {
    %c0_i32 = arith.constant 0 : i32
    %c0_i32_0 = arith.constant 0 : i32
    %c0_i32_1 = arith.constant 0 : i32
    return %arg0, %c0_i32, %c0_i32_0 : i32, i32, i32
  }
  func.func @transform_3(%arg0: i32) -> (i32, i32, i32) {
    %c0_i32 = arith.constant 0 : i32
    %c0_i32_0 = arith.constant 0 : i32
    %c0_i32_1 = arith.constant 0 : i32
    return %arg0, %c0_i32, %c0_i32_0 : i32, i32, i32
  }
  func.func @transform_4(%arg0: i32) -> (i32, i32, i32) {
    %c0_i32 = arith.constant 0 : i32
    %c0_i32_0 = arith.constant 0 : i32
    %c0_i32_1 = arith.constant 0 : i32
    return %arg0, %c0_i32, %c0_i32_0 : i32, i32, i32
  }
  func.func @transform_5(%arg0: i32) -> (i32, i32, i32, i32) {
    %c0_i32 = arith.constant 0 : i32
    %c0_i32_0 = arith.constant 0 : i32
    %c0_i32_1 = arith.constant 0 : i32
    %c0_i32_2 = arith.constant 0 : i32
    return %arg0, %c0_i32, %c0_i32_0, %c0_i32_1 : i32, i32, i32, i32
  }
}

module attributes {stable_mosaic.version = 11 : i64} {
  func.func @_attention_kernel(%arg0: i32, %arg1: memref<2x32x128xbf16, #tpu.memory_space<vmem>>, %arg2: memref<1x32x32xf32, #tpu.memory_space<vmem>>, %arg3: memref<1x1x32xf32, #tpu.memory_space<vmem>>, %arg4: memref<2x32xf32, #tpu.memory_space<vmem>>, %arg5: memref<2x128xf32, #tpu.memory_space<vmem>>, %arg6: memref<1x2x128xf32, #tpu.memory_space<vmem>>) attributes {dimension_semantics = [#tpu.dimension_semantics<parallel>], iteration_bounds = array<i64: 2>, scalar_prefetch = 0 : i64, scratch_operands = 0 : i64, tpu.core_type = #tpu.core_type<tc>, window_params = [{pipeline_mode = #tpu.pipeline_mode<synchronous>, transform_indices = @transform_0, window_bounds = array<i64: 2, 32, 128>}, {transform_indices = @transform_1, window_bounds = array<i64: 1, 32, 32>}, {transform_indices = @transform_2, window_bounds = array<i64: 1, 1, 32>}, {pipeline_mode = #tpu.pipeline_mode<synchronous>, transform_indices = @transform_3, window_bounds = array<i64: 2, 32>}, {pipeline_mode = #tpu.pipeline_mode<synchronous>, transform_indices = @transform_4, window_bounds = array<i64: 2, 128>}, {transform_indices = @transform_5, window_bounds = array<i64: 1, 2, 128>}]} {
    %c0 = arith.constant 0 : index
    %c0_0 = arith.constant 0 : index
    %0 = vector.load %arg4[%c0, %c0_0] : memref<2x32xf32, #tpu.memory_space<vmem>>, vector<2x32xf32>
    %c0_1 = arith.constant 0 : index
    %c0_2 = arith.constant 0 : index
    %c0_3 = arith.constant 0 : index
    %1 = vector.load %arg2[%c0_1, %c0_2, %c0_3] : memref<1x32x32xf32, #tpu.memory_space<vmem>>, vector<1x32x32xf32>
    %2 = vector.shape_cast %1 : vector<1x32x32xf32> to vector<32x32xf32>
    %cst = arith.constant dense<0.000000e+00> : vector<2x32xf32>
    %3 = tpu.matmul %0, %2, %cst {dimension_numbers = #tpu.dot_dimension_numbers<[1], [0], [0], [1], [0, 0, 1, 1], [], []>} : vector<2x32xf32>, vector<32x32xf32>, vector<2x32xf32> -> vector<2x32xf32>
    %c0_4 = arith.constant 0 : index
    %c0_5 = arith.constant 0 : index
    %c0_6 = arith.constant 0 : index
    %4 = vector.load %arg3[%c0_4, %c0_5, %c0_6] : memref<1x1x32xf32, #tpu.memory_space<vmem>>, vector<1x1x32xf32>
    %5 = vector.shape_cast %4 : vector<1x1x32xf32> to vector<1x32xf32>
    %6 = vector.broadcast %5 : vector<1x32xf32> to vector<2x32xf32>
    %7 = arith.mulf %0, %6 : vector<2x32xf32>
    %cst_7 = arith.constant dense<0.000000e+00> : vector<2xf32>
    %8 = vector.multi_reduction <add>, %7, %cst_7 [1] : vector<2x32xf32> to vector<2xf32>
    %9 = vector.shape_cast %8 : vector<2xf32> to vector<2x1xf32>
    %10 = arith.truncf %3 : vector<2x32xf32> to vector<2x32xbf16>
    %11 = vector.extract_strided_slice %10 {offsets = [0, 0], sizes = [1, 32], strides = [1, 1]} : vector<2x32xbf16> to vector<1x32xbf16>
    %c0_8 = arith.constant 0 : index
    %c0_9 = arith.constant 0 : index
    %c0_10 = arith.constant 0 : index
    %12 = vector.load %arg1[%c0_8, %c0_9, %c0_10] : memref<2x32x128xbf16, #tpu.memory_space<vmem>>, vector<1x32x128xbf16>
    %13 = vector.shape_cast %12 : vector<1x32x128xbf16> to vector<32x128xbf16>
    %cst_11 = arith.constant dense<0.000000e+00> : vector<1x128xf32>
    %14 = tpu.matmul %11, %13, %cst_11 {dimension_numbers = #tpu.dot_dimension_numbers<[1], [0], [0], [1], [0, 0, 1, 1], [], []>} : vector<1x32xbf16>, vector<32x128xbf16>, vector<1x128xf32> -> vector<1x128xf32>
    %15 = vector.extract_strided_slice %10 {offsets = [1, 0], sizes = [1, 32], strides = [1, 1]} : vector<2x32xbf16> to vector<1x32xbf16>
    %c1 = arith.constant 1 : index
    %c0_12 = arith.constant 0 : index
    %c0_13 = arith.constant 0 : index
    %16 = vector.load %arg1[%c1, %c0_12, %c0_13] : memref<2x32x128xbf16, #tpu.memory_space<vmem>>, vector<1x32x128xbf16>
    %17 = vector.shape_cast %16 : vector<1x32x128xbf16> to vector<32x128xbf16>
    %cst_14 = arith.constant dense<0.000000e+00> : vector<1x128xf32>
    %18 = tpu.matmul %15, %17, %cst_14 {dimension_numbers = #tpu.dot_dimension_numbers<[1], [0], [0], [1], [0, 0, 1, 1], [], []>} : vector<1x32xbf16>, vector<32x128xbf16>, vector<1x128xf32> -> vector<1x128xf32>
    %19 = tpu.concatenate %14, %18 in 0 : vector<1x128xf32>, vector<1x128xf32> -> vector<2x128xf32>
    %20 = vector.broadcast %9 : vector<2x1xf32> to vector<2x128xf32>
    %21 = arith.addf %19, %20 : vector<2x128xf32>
    %c0_15 = arith.constant 0 : index
    %c0_16 = arith.constant 0 : index
    %22 = vector.load %arg5[%c0_15, %c0_16] : memref<2x128xf32, #tpu.memory_space<vmem>>, vector<2x128xf32>
    %23 = arith.mulf %22, %21 : vector<2x128xf32>
    %cst_17 = arith.constant 1.000000e+00 : f32
    %24 = vector.broadcast %cst_17 : f32 to vector<2x128xf32>
    %25 = arith.subf %24, %22 : vector<2x128xf32>
    %cst_18 = arith.constant -1.000000e+30 : f32
    %26 = vector.broadcast %cst_18 : f32 to vector<2x128xf32>
    %27 = arith.mulf %25, %26 : vector<2x128xf32>
    %28 = arith.addf %23, %27 : vector<2x128xf32>
    %cst_19 = arith.constant dense<0xFF800000> : vector<2xf32>
    %29 = vector.multi_reduction <maximumf>, %28, %cst_19 [1] : vector<2x128xf32> to vector<2xf32>
    %30 = vector.shape_cast %29 : vector<2xf32> to vector<2x1xf32>
    %31 = vector.broadcast %30 : vector<2x1xf32> to vector<2x128xf32>
    %32 = arith.subf %28, %31 : vector<2x128xf32>
    %33 = math.exp %32 : vector<2x128xf32>
    %cst_20 = arith.constant dense<0.000000e+00> : vector<2xf32>
    %34 = vector.multi_reduction <add>, %33, %cst_20 [1] : vector<2x128xf32> to vector<2xf32>
    %35 = vector.shape_cast %34 : vector<2xf32> to vector<2x1xf32>
    %36 = math.log %35 : vector<2x1xf32>
    %37 = vector.broadcast %36 : vector<2x1xf32> to vector<2x128xf32>
    %38 = arith.subf %32, %37 : vector<2x128xf32>
    %c0_21 = arith.constant 0 : index
    %c0_22 = arith.constant 0 : index
    %c0_23 = arith.constant 0 : index
    %39 = vector.load %arg6[%c0_21, %c0_22, %c0_23] : memref<1x2x128xf32, #tpu.memory_space<vmem>>, vector<1x2x128xf32>
    %40 = vector.shape_cast %39 : vector<1x2x128xf32> to vector<2x128xf32>
    %41 = vector.shape_cast %38 : vector<2x128xf32> to vector<1x2x128xf32>
    tpu.vector_store %arg6[%c0_21, %c0_22, %c0_23], %41 {strides = array<i32>} : memref<1x2x128xf32, #tpu.memory_space<vmem>>, vector<1x2x128xf32>,
    return
  }
  func.func @transform_0(%arg0: i32) -> (i32, i32, i32) {
    %c0_i32 = arith.constant 0 : i32
    %c0_i32_0 = arith.constant 0 : i32
    %c0_i32_1 = arith.constant 0 : i32
    %c0_i32_2 = arith.constant 0 : i32
    return %c0_i32, %c0_i32_0, %c0_i32_1 : i32, i32, i32
  }
  func.func @transform_1(%arg0: i32) -> (i32, i32, i32) {
    %c0_i32 = arith.constant 0 : i32
    %c0_i32_0 = arith.constant 0 : i32
    %c0_i32_1 = arith.constant 0 : i32
    return %arg0, %c0_i32, %c0_i32_0 : i32, i32, i32
  }
  func.func @transform_2(%arg0: i32) -> (i32, i32, i32) {
    %c0_i32 = arith.constant 0 : i32
    %c0_i32_0 = arith.constant 0 : i32
    %c0_i32_1 = arith.constant 0 : i32
    return %arg0, %c0_i32, %c0_i32_0 : i32, i32, i32
  }
  func.func @transform_3(%arg0: i32) -> (i32, i32) {
    %c0_i32 = arith.constant 0 : i32
    %c0_i32_0 = arith.constant 0 : i32
    %c0_i32_1 = arith.constant 0 : i32
    return %c0_i32, %c0_i32_0 : i32, i32
  }
  func.func @transform_4(%arg0: i32) -> (i32, i32) {
    %c0_i32 = arith.constant 0 : i32
    %c0_i32_0 = arith.constant 0 : i32
    %c0_i32_1 = arith.constant 0 : i32
    return %c0_i32, %c0_i32_0 : i32, i32
  }
  func.func @transform_5(%arg0: i32) -> (i32, i32, i32) {
    %c0_i32 = arith.constant 0 : i32
    %c0_i32_0 = arith.constant 0 : i32
    %c0_i32_1 = arith.constant 0 : i32
    return %arg0, %c0_i32, %c0_i32_0 : i32, i32, i32
  }
}

</mosaic_0001>

<bundles_post_ra>
// kernel: attentive_reader_forward.5
= control target key start
LH: loop header
LB: loop body
LE: loop exit
PB: predicated region body
PF: predicated region fallthrough
CT: control target
= control target key end

     0   :  { %s524_s18 = smov 0   ;;  %s570_s0 = inlined_call_operand.vmem [shape: bf16[2,32,128], index: 0, kind: input, shape index: {}]   ;;  %s571_s1 = inlined_call_operand.vmem [shape: f32[2,32,32], index: 1, kind: input, shape index: {}]   ;;  %s572_s2 = inlined_call_operand.vmem [shape: f32[2,1,32], index: 2, kind: input, shape index: {}]   ;;  %s573_s3 = inlined_call_operand.vmem [shape: f32[2,32], index: 3, kind: input, shape index: {}]   ;;  %s574_s4 = inlined_call_operand.vmem [shape: f32[2,128], index: 4, kind: input, shape index: {}]   ;;  %s575_s5 = inlined_call_operand.vmem [shape: f32[2,2,128], index: 5, kind: output, shape index: {}]  }
   0x1 LB: > { %s435_s19 = sadd.s32 4294967295, %s492_s18   ;;  %p439_p0 = scmp.ge.s32.totalorder %s492_s18, 1  ;;  %s492_s18 = sphi %s524_s18, %s15_s18  }
   0x2   : > { %p195_p1 = scmp.lt.s32.totalorder %s492_s18, 3 }
   0x4   : > { %p196_p2 = pnand %p439_p0, %p195_p1 }
   0x5   : > { %p225_p3 = scmp.lt.s32.totalorder (!%p196_p2), %s435_s19, 1 }
   0x6   : > { %199 = sbr.rel (%p196_p2) target bundleno = 554 (0x22a), region = 40 }
   0xb   : > { %v470_v0 = vld [vmem:[%s570_s0 + $0x8] sm:$0xff]  ;;  %s577_s19 = smov (!%p225_p3, %s435_s19), 1  ;;  %v238_v5 = vld [vmem:[%s573_s3] sm:$0x3]  ;;  %vm243_vm0 = vcmask 261120   ;;  %v472_v7 = vld [vmem:[%s570_s0 + $0x18] sm:$0xff] }
   0xc   : > { %302 = vmatpush.bf16.msra.mxu1 %v470_v0  ;;  %s468_s22 = sshll.u32 %s577_s19, 5  ;;  %s232_s30 = scalar_lea.vmem %s572_s2, %s577_s19  ;;  %v469_v6 = vld [vmem:[%s570_s0] sm:$0xff]  ;;  %341 = vmatpush.bf16.msra.mxu2 %v472_v7  ;;  %v471_v8 = vld [vmem:[%s570_s0 + $0x10] sm:$0xff]  ;;  %vm272_vm1 = vcmask 254976   ;;  %vm351_vm2 = vcmask 1040384   ;;  %vm359_vm3 = vcmask 1041408  }
   0xd   : > { %s229_s25 = scalar_lea.vmem %s571_s1, %s468_s22  ;;  %v481_v9 = vld [vmem:[%s232_s30] ss:$0 sm:$0xff]  ;;  %s442_s14 = sshll.u32 %s577_s19, 1 }
   0xe   : > { %v242_v1 = vld [vmem:[%s229_s25 + $0x18] sm:$0xff]  ;;  %v241_v2 = vld [vmem:[%s229_s25 + $0x10] sm:$0xff]  ;;  %v240_v3 = vld [vmem:[%s229_s25 + $0x8] sm:$0xff]  ;;  %v271_v10 = vmul.f32 %v481_v9, %v238_v5  ;;  %s236_s17 = scalar_lea.vmem %s575_s5, %s442_s14 }
   0xf   : > { %259 = vmatpush.msra.mxu0 %v242_v1  ;;  %v239_v4 = vld [vmem:[%s229_s25] sm:$0xff] }
  0x10   : > { %303 = vmatpush.bf16.msra.mxu1 %v469_v6  ;;  %342 = vmatpush.bf16.msra.mxu2 %v471_v8  ;;  %v273_v11 = vsel %vm272_vm1, %v271_v10, 0.0  ;;  %v354_v19 = vld [vmem:[%s574_s4] sm:$0x3] }
  0x11   : > { %260 = vmatpush.msra.mxu0 %v241_v2  ;;  %274 = vadd.xlane.f32.xlu0 %v273_v11  ;;  %v356_v21 = vsub.f32 1.0, %v354_v19 }
  0x13   : > { %261 = vmatpush.msra.mxu0 %v240_v3  ;;  %v357_v26 = vmul.f32 -1e+30, %v356_v21 }
  0x15   : > { %262 = vmatpush.msra.mxu0 %v239_v4 }
  0x16   : > { %443 = vmatmul.msk.f32.vlgmr.msra.gmra.mxu0 %vm243_vm0, %v238_v5 }
  0x84   : > { %v275_v23 = vpop.xlane.xlu0 %274 }
  0x93   : > { %v264_v12 = vpop.f32.mrf.mxu0 }
  0x94   : > { %v276_v13 = vpack.c.bf16 %v264_v12, %v264_v12 }
  0x96   : > { %v315_v14 = vunpack.c.l.b16 %v276_v13  ;;  %452 = vmatmul.msk.bf16.vlgmr.msra.gmra.mxu1 %vm243_vm0, %v276_v13 }
  0x98   : > { %v316_v15 = vpack.c.b16 %v315_v14, %v315_v14 }
  0x9a   : > { %v318_v16 = vshrl.u32 %v316_v15, 16 }
  0x9c   : > { %465 = vmatmul.msk.bf16.vlgmr.msra.gmra.mxu2 %vm243_vm0, %v318_v16 }
 0x113   : > { %v305_v17 = vpop.f32.mrf.mxu1 }
 0x11b   : > { %v307_v18 = vpop.f32.mrf.mxu1 }
 0x11f   : > { %v344_v20 = vpop.f32.mrf.mxu2 }
 0x120   : > { %v349_v22 = vrot.slane %v344_v20, 7 }
 0x122   : > { %v352_v24 = vsel %vm351_vm2, %v305_v17, %v349_v22 }
 0x123   : > { %v353_v25 = vadd.f32 %v352_v24, %v275_v23 }
 0x125   : > { %v355_v27 = vmul.f32 %v354_v19, %v353_v25 }
 0x127   : > { %v346_v28 = vpop.f32.mrf.mxu2  ;;  %v358_v29 = vadd.f32 %v357_v26, %v355_v27 }
 0x129   : > { %v360_v30 = vsel %vm359_vm3, %v358_v29, -inf }
 0x12a   : > { %361 = vmax.xlane.f32.xlu0 %v360_v30 }
 0x19d   : > { %v362_v31 = vpop.xlane.xlu0 %361 }
 0x19e   : > { %v363_v32 = vsub.f32 %v358_v29, %v362_v31 }
 0x1a0   : > { %v364_v33 = vmul.f32 1.442695, %v363_v32 }
 0x1a2   : > { %482 = vpow2.f32 %v364_v33 }
 0x1a8   : > { %v483_v34 = vpop.eup %482 }
 0x1a9   : > { %v366_v35 = vsel %vm359_vm3, %v483_v34, 0.0 }
 0x1aa   : > { %367 = vadd.xlane.f32.xlu1 %v366_v35 }
 0x21d   : > { %v368_v36 = vpop.xlane.xlu1 %367 }
 0x21e   : > { %484 = vlog2.f32 %v368_v36 }
 0x224   : > { %v485_v37 = vpop.eup %484 }
 0x225   : > { %v370_v38 = vmul.f32 0.6931472, %v485_v37 }
 0x227   : > { %v371_v39 = vsub.f32 %v363_v32, %v370_v38 }
 0x229   : > { %372 = vst [vmem:[%s236_s17] sm:$0x3] %v371_v39 }
 0x22a PF: > { %s15_s18 = sadd.s32 1, %s492_s18  }
 0x22b   : > { %p12_p4 = scmp.ge.s32.totalorder %s15_s18, 4  }
 0x22d   :  { %14 = sbr.rel (!%p12_p4) target bundleno = 1 (0x1), region = 74 }

// kernel: attentive_reader_forward.4
= control target key start
LH: loop header
LB: loop body
LE: loop exit
PB: predicated region body
PF: predicated region fallthrough
CT: control target
= control target key end

     0   :  { %s1887_s18 = smov 0   ;;  %s2411_s0 = inlined_call_operand.vmem [shape: bf16[2,64,32], index: 0, kind: input, shape index: {}]   ;;  %s2412_s1 = inlined_call_operand.vmem [shape: bf16[2,32,384], index: 1, kind: input, shape index: {}]   ;;  %s2413_s2 = inlined_call_operand.vmem [shape: bf16[2,128,384], index: 2, kind: input, shape index: {}]   ;;  %s2414_s3 = inlined_call_operand.vmem [shape: f32[2,1,384], index: 3, kind: input, shape index: {}]   ;;  %s2415_s4 = inlined_call_operand.vmem [shape: f32[2,1,384], index: 4, kind: input, shape index: {}]   ;;  %s2416_s5 = inlined_call_operand.vmem [shape: f32[2,8,8,128], index: 5, kind: output, shape index: {}]  }
   0x1 LB: > { %s1536_s19 = sadd.s32 4294967295, %s1854_s18   ;;  %p1540_p0 = scmp.ge.s32.totalorder %s1854_s18, 1  ;;  %s1854_s18 = sphi %s1887_s18, %s15_s18  }
   0x2   : > { %p225_p1 = scmp.lt.s32.totalorder %s1854_s18, 3 }
   0x4   : > { %p226_p2 = pnand %p1540_p0, %p225_p1 }
   0x6   : > { %229 = sbr.rel (%p226_p2) target bundleno = 1498 (0x5da), region = 40 }
   0xb   : > { %p271_p3 = scmp.lt.s32.totalorder %s1536_s19, 1  ;;  %vm376_vm0 = vcmask 261120  }
   0xd   : > { %s2430_s19 = smov (!%p271_p3, %s1536_s19), 1 }
   0xe   : > { %s1756_s20 = smul.u32 48, %s2430_s19  ;;  %s1720_s25 = sshll.u32 %s2430_s19, 5 }
   0xf   : > { %s1757_s21 = smul.u32 192, %s2430_s19  ;;  %s1923_s6 = scalar_lea.vmem %s2411_s0, %s1720_s25 }
  0x10   : > { %s1902_s24 = scalar_lea.vmem %s2412_s1, %s1756_s20  ;;  %v1933_v16 = vld [vmem:[%s1923_s6] sm:$0xff]  ;;  %v1978_v42 = vld [vmem:[%s1923_s6 + $0x8] sm:$0xff]  ;;  %s1758_s7 = smul.u32 3, %s2430_s19 }
  0x11   : > { %s1908_s28 = scalar_lea.vmem %s2413_s2, %s1757_s21  ;;  %v1577_v0 = vld [vmem:[%s1902_s24 + $0x18] sm:$0xf]  ;;  %v1730_v1 = vld [vmem:[%s1902_s24 + $0x20] sm:$0xf0]  ;;  %v1565_v2 = vld [vmem:[%s1902_s24] sm:$0xf] }
  0x12   : > { %v1578_v3 = vor.u32 %v1730_v1, %v1577_v0  ;;  %v1685_v4 = vld [vmem:[%s1908_s28 + $0xa8] sm:$0xf]  ;;  %v1754_v5 = vld [vmem:[%s1908_s28 + $0xb0] sm:$0xf0]  ;;  %v1727_v6 = vld [vmem:[%s1902_s24 + $0x8] sm:$0xf0]  ;;  %s289_s10 = scalar_lea.vmem %s2414_s3, %s1758_s7  ;;  %s293_s13 = scalar_lea.vmem %s2415_s4, %s1758_s7 }
  0x13   : > { %v1916_v7 = vor.u32 %v1754_v5, %v1685_v4  ;;  %v1673_v8 = vld [vmem:[%s1908_s28 + $0x90] sm:$0xf]  ;;  %v1751_v9 = vld [vmem:[%s1908_s28 + $0x98] sm:$0xf0]  ;;  %v1566_v10 = vor.u32 %v1727_v6, %v1565_v2  ;;  %v1661_v12 = vld [vmem:[%s1908_s28 + $0x78] sm:$0xf] }
  0x14   : > { %395 = vmatpush.bf16.msra.mxu0 %v1578_v3  ;;  %v1926_v11 = vor.u32 %v1751_v9, %v1673_v8  ;;  %v1748_v13 = vld [vmem:[%s1908_s28 + $0x80] sm:$0xf0]  ;;  %v1693_v14 = vld [vmem:[%s1908_s28 + $0xb0] sm:$0xf]  ;;  %v1755_v15 = vld [vmem:[%s1908_s28 + $0xb8] sm:$0xf0] }
  0x15   : > { %674 = vmatpush.bf16.msra.mxu3 %v1916_v7  ;;  %v1935_v17 = vor.u32 %v1755_v15, %v1693_v14  ;;  %v1938_v18 = vor.u32 %v1748_v13, %v1661_v12  ;;  %v1681_v19 = vld [vmem:[%s1908_s28 + $0x98] sm:$0xf]  ;;  %v1752_v20 = vld [vmem:[%s1908_s28 + $0xa0] sm:$0xf0]  ;;  %v1649_v21 = vld [vmem:[%s1908_s28 + $0x60] sm:$0xf] }
  0x16   : > { %v1745_v22 = vld [vmem:[%s1908_s28 + $0x68] sm:$0xf0]  ;;  %v1945_v23 = vor.u32 %v1752_v20, %v1681_v19  ;;  %v1669_v24 = vld [vmem:[%s1908_s28 + $0x80] sm:$0xf]  ;;  %v1637_v28 = vld [vmem:[%s1908_s28 + $0x48] sm:$0xf] }
  0x17   : > { %v1749_v25 = vld [vmem:[%s1908_s28 + $0x88] sm:$0xf0]  ;;  %v1952_v26 = vor.u32 %v1745_v22, %v1649_v21  ;;  %v1742_v29 = vld [vmem:[%s1908_s28 + $0x50] sm:$0xf0]  ;;  %v1625_v31 = vld [vmem:[%s1908_s28 + $0x30] sm:$0xf] }
  0x18   : > { %396 = vmatpush.bf16.msra.mxu0 %v1566_v10  ;;  %v1955_v27 = vor.u32 %v1749_v25, %v1669_v24  ;;  %v1960_v30 = vor.u32 %v1742_v29, %v1637_v28  ;;  %v1739_v32 = vld [vmem:[%s1908_s28 + $0x38] sm:$0xf0]  ;;  %v1657_v33 = vld [vmem:[%s1908_s28 + $0x68] sm:$0xf]  ;;  %v1746_v34 = vld [vmem:[%s1908_s28 + $0x70] sm:$0xf0] }
  0x19   : > { %675 = vmatpush.bf16.msra.mxu3 %v1926_v11  ;;  %v1967_v35 = vor.u32 %v1746_v34, %v1657_v33  ;;  %v1970_v36 = vor.u32 %v1739_v32, %v1625_v31  ;;  %v1729_v37 = vld [vmem:[%s1902_s24 + $0x1c] sm:$0xf]  ;;  %v1579_v38 = vld [vmem:[%s1902_s24 + $0x24] sm:$0xf0]  ;;  %v1613_v39 = vld [vmem:[%s1908_s28 + $0x18] sm:$0xf] }
  0x1a   : > { %v1736_v40 = vld [vmem:[%s1908_s28 + $0x20] sm:$0xf0]  ;;  %v1582_v41 = vor.u32 %v1729_v37, %v1579_v38  ;;  %v1601_v44 = vld [vmem:[%s1908_s28] sm:$0xf]  ;;  %v1567_v46 = vld [vmem:[%s1902_s24 + $0xc] sm:$0xf0] }
  0x1b   : > { %1587 = vmatmul.msk.bf16.vlgmr.msra.gmra.mxu0 %vm376_vm0, %v1933_v16  ;;  %v1981_v43 = vor.u32 %v1736_v40, %v1613_v39  ;;  %v1726_v45 = vld [vmem:[%s1902_s24 + $0x4] sm:$0xf]  ;;  %v1733_v47 = vld [vmem:[%s1908_s28 + $0x8] sm:$0xf0]  ;;  %v1645_v49 = vld [vmem:[%s1908_s28 + $0x50] sm:$0xf] }
  0x1c   : > { %700 = vmatpush.bf16.msrb.mxu0 %v1935_v17  ;;  %424 = vmatpush.bf16.msra.mxu1 %v1582_v41  ;;  %v1570_v48 = vor.u32 %v1726_v45, %v1567_v46  ;;  %v1743_v50 = vld [vmem:[%s1908_s28 + $0x58] sm:$0xf0]  ;;  %v1753_v51 = vld [vmem:[%s1908_s28 + $0xac] sm:$0xf]  ;;  %v1687_v52 = vld [vmem:[%s1908_s28 + $0xb4] sm:$0xf0]  ;;  %v1996_v54 = vor.u32 %v1733_v47, %v1601_v44 }
  0x1d   : > { %676 = vmatpush.bf16.msra.mxu3 %v1938_v18  ;;  %v1993_v53 = vor.u32 %v1743_v50, %v1645_v49  ;;  %v1999_v55 = vor.u32 %v1753_v51, %v1687_v52  ;;  %v1585_v56 = vld [vmem:[%s1902_s24 + $0x20] sm:$0xf]  ;;  %v1731_v57 = vld [vmem:[%s1902_s24 + $0x28] sm:$0xf0]  ;;  %v1633_v58 = vld [vmem:[%s1908_s28 + $0x38] sm:$0xf] }
  0x1e   : > { %v1750_v59 = vld [vmem:[%s1908_s28 + $0x94] sm:$0xf]  ;;  %v1675_v60 = vld [vmem:[%s1908_s28 + $0x9c] sm:$0xf0]  ;;  %v1586_v61 = vor.u32 %v1731_v57, %v1585_v56  ;;  %v1740_v62 = vld [vmem:[%s1908_s28 + $0x40] sm:$0xf0] }
  0x1f   : > { %v2010_v63 = vor.u32 %v1740_v62, %v1633_v58  ;;  %v1573_v0 = vld [vmem:[%s1902_s24 + $0x8] sm:$0xf]  ;;  %v1728_v1 = vld [vmem:[%s1902_s24 + $0x10] sm:$0xf0]  ;;  %v1621_v2 = vld [vmem:[%s1908_s28 + $0x20] sm:$0xf]  ;;  %v2017_v3 = vor.u32 %v1750_v59, %v1675_v60 }
  0x20   : > { %701 = vmatpush.bf16.msrb.mxu0 %v1945_v23  ;;  %425 = vmatpush.bf16.msra.mxu1 %v1570_v48  ;;  %v1747_v4 = vld [vmem:[%s1908_s28 + $0x7c] sm:$0xf]  ;;  %v1574_v5 = vor.u32 %v1728_v1, %v1573_v0  ;;  %v1737_v6 = vld [vmem:[%s1908_s28 + $0x28] sm:$0xf0]  ;;  %v1663_v8 = vld [vmem:[%s1908_s28 + $0x84] sm:$0xf0] }
  0x21   : > { %677 = vmatpush.bf16.msra.mxu3 %v1952_v26  ;;  %453 = vmatpush.bf16.msra.mxu2 %v1586_v61  ;;  %v2023_v9 = vor.u32 %v1737_v6, %v1621_v2  ;;  %v1609_v10 = vld [vmem:[%s1908_s28 + $0x8] sm:$0xf]  ;;  %v1734_v12 = vld [vmem:[%s1908_s28 + $0x10] sm:$0xf0]  ;;  %v1856_v13 = vmov 0   ;;  %v2030_v14 = vor.u32 %v1747_v4, %v1663_v8  ;;  %v1725_v37 = vld [vmem:[%s1923_s6 + $0x18] sm:$0xff] }
  0x22   : > { %v2033_v15 = vor.u32 %v1734_v12, %v1609_v10  ;;  %v1724_v19 = vld [vmem:[%s1923_s6 + $0x10] sm:$0xff]  ;;  %v1744_v20 = vld [vmem:[%s1908_s28 + $0x64] sm:$0xf]  ;;  %v1741_v24 = vld [vmem:[%s1908_s28 + $0x4c] sm:$0xf]  ;;  %s1721_s14 = sshll.u32 %s2430_s19, 6 }
  0x23   : > { %1591 = vmatmul.msk.bf16.vlgmr.msra.gmra.mxu1 %vm376_vm0, %v1933_v16  ;;  %v1651_v21 = vld [vmem:[%s1908_s28 + $0x6c] sm:$0xf0]  ;;  %v1639_v25 = vld [vmem:[%s1908_s28 + $0x54] sm:$0xf0]  ;;  %v1738_v28 = vld [vmem:[%s1908_s28 + $0x34] sm:$0xf]  ;;  %s2180_s17 = scalar_lea.vmem %s2416_s5, %s1721_s14 }
  0x24   : > { %702 = vmatpush.bf16.msrb.mxu0 %v1955_v27  ;;  %768 = vmatpush.bf16.msrb.mxu1 %v1916_v7  ;;  %v2043_v22 = vor.u32 %v1744_v20, %v1651_v21  ;;  %v1627_v29 = vld [vmem:[%s1908_s28 + $0x3c] sm:$0xf0]  ;;  %v1735_v32 = vld [vmem:[%s1908_s28 + $0x1c] sm:$0xf]  ;;  %v1615_v33 = vld [vmem:[%s1908_s28 + $0x24] sm:$0xf0] }
  0x25   : > { %678 = vmatpush.bf16.msra.mxu3 %v1960_v30  ;;  %454 = vmatpush.bf16.msra.mxu2 %v1574_v5  ;;  %v2063_v31 = vor.u32 %v1738_v28, %v1627_v29  ;;  %v2071_v34 = vor.u32 %v1735_v32, %v1615_v33  ;;  %v1732_v38 = vld [vmem:[%s1908_s28 + $0x4] sm:$0xf]  ;;  %v1603_v39 = vld [vmem:[%s1908_s28 + $0xc] sm:$0xf0]  ;;  %v532_v51 = vld [vmem:[%s293_s13] sm:$0x7] }
  0x26   : > { %v2082_v40 = vor.u32 %v1732_v38, %v1603_v39  ;;  %v2153_v52 = vperm.slane %v532_v51, 0  ;;  %v2166_v20 = vperm.slane %v532_v51, 1 }
  0x28   : > { %703 = vmatpush.bf16.msrb.mxu0 %v1967_v35  ;;  %769 = vmatpush.bf16.msrb.mxu1 %v1926_v11 }
  0x29   : > { %679 = vmatpush.bf16.msra.mxu3 %v1970_v36  ;;  %781 = vmatpush.bf16.msrb.mxu2 %v1999_v55 }
  0x2a   : > { %1595 = vmatmul.msk.bf16.vlgmr.msra.gmra.mxu2 %vm376_vm0, %v1933_v16  ;;  %v2053_v16 = vor.u32 %v1741_v24, %v1639_v25 }
  0x2b   : > { %1588 = vmatmul.msk.bf16.gmra.mxu0 %vm376_vm0, %v1978_v42 }
  0x2c   : > { %704 = vmatpush.bf16.msrb.mxu0 %v1993_v53  ;;  %770 = vmatpush.bf16.msrb.mxu1 %v1938_v18 }
  0x2d   : > { %680 = vmatpush.bf16.msra.mxu3 %v1981_v43  ;;  %782 = vmatpush.bf16.msrb.mxu2 %v2017_v3 }
  0x30   : > { %705 = vmatpush.bf16.msrb.mxu0 %v2010_v63  ;;  %771 = vmatpush.bf16.msrb.mxu1 %v1952_v26 }
  0x31   : > { %681 = vmatpush.bf16.msra.mxu3 %v1996_v54  ;;  %783 = vmatpush.bf16.msrb.mxu2 %v2030_v14 }
  0x33   : > { %1592 = vmatmul.msk.bf16.gmra.mxu1 %vm376_vm0, %v1978_v42 }
  0x34   : > { %682 = vmatmul.bf16.vlgmr.msra.gmra.mxu3 %v1856_v13  ;;  %706 = vmatpush.bf16.msrb.mxu0 %v2023_v9 }
  0x35   : > { %687 = vmatpush.bf16.msrb.mxu3 %v1999_v55  ;;  %772 = vmatpush.bf16.msrb.mxu1 %v1960_v30 }
  0x36   : > { %784 = vmatpush.bf16.msrb.mxu2 %v2043_v22 }
  0x38   : > { %707 = vmatpush.bf16.msrb.mxu0 %v2033_v15 }
  0x39   : > { %688 = vmatpush.bf16.msrb.mxu3 %v2017_v3  ;;  %773 = vmatpush.bf16.msrb.mxu1 %v1970_v36 }
  0x3a   : > { %785 = vmatpush.bf16.msrb.mxu2 %v2053_v16 }
  0x3b   : > { %1589 = vmatmul.msk.bf16.gmra.mxu0 %vm376_vm0, %v1724_v19  ;;  %1596 = vmatmul.msk.bf16.gmra.mxu2 %vm376_vm0, %v1978_v42  ;;  %v316_v42 = vld [vmem:[%s289_s10] sm:$0x7] }
  0x3c   : > { %863 = vmatpush.bf16.msra.mxu0 %v1916_v7  ;;  %v318_v44 = vperm.slane %v316_v42, 0  ;;  %v2162_v10 = vperm.slane %v316_v42, 1 }
  0x3d   : > { %689 = vmatpush.bf16.msrb.mxu3 %v2030_v14  ;;  %774 = vmatpush.bf16.msrb.mxu1 %v1981_v43 }
  0x3e   : > { %786 = vmatpush.bf16.msrb.mxu2 %v2063_v31 }
  0x40   : > { %864 = vmatpush.bf16.msra.mxu0 %v1926_v11 }
  0x41   : > { %690 = vmatpush.bf16.msrb.mxu3 %v2043_v22  ;;  %775 = vmatpush.bf16.msrb.mxu1 %v1996_v54 }
  0x42   : > { %787 = vmatpush.bf16.msrb.mxu2 %v2071_v34 }
  0x43   : > { %1593 = vmatmul.msk.bf16.gmra.mxu1 %vm376_vm0, %v1724_v19 }
  0x44   : > { %865 = vmatpush.bf16.msra.mxu0 %v1938_v18 }
  0x45   : > { %691 = vmatpush.bf16.msrb.mxu3 %v2053_v16  ;;  %876 = vmatpush.bf16.msra.mxu1 %v1999_v55 }
  0x46   : > { %788 = vmatpush.bf16.msrb.mxu2 %v2082_v40 }
  0x48   : > { %866 = vmatpush.bf16.msra.mxu0 %v1952_v26 }
  0x49   : > { %692 = vmatpush.bf16.msrb.mxu3 %v2063_v31  ;;  %877 = vmatpush.bf16.msra.mxu1 %v2017_v3 }
  0x4a   : > { %889 = vmatpush.bf16.msra.mxu2 %v1935_v17 }
  0x4b   : > { %1590 = vmatmul.msk.bf16.gmra.mxu0 %vm376_vm0, %v1725_v37  ;;  %1597 = vmatmul.msk.bf16.gmra.mxu2 %vm376_vm0, %v1724_v19 }
  0x4c   : > { %867 = vmatpush.bf16.msra.mxu0 %v1960_v30 }
  0x4d   : > { %693 = vmatpush.bf16.msrb.mxu3 %v2071_v34  ;;  %878 = vmatpush.bf16.msra.mxu1 %v2030_v14 }
  0x4e   : > { %890 = vmatpush.bf16.msra.mxu2 %v1945_v23 }
  0x50   : > { %868 = vmatpush.bf16.msra.mxu0 %v1970_v36 }
  0x51   : > { %694 = vmatpush.bf16.msrb.mxu3 %v2082_v40  ;;  %879 = vmatpush.bf16.msra.mxu1 %v2043_v22 }
  0x52   : > { %891 = vmatpush.bf16.msra.mxu2 %v1955_v27 }
  0x53   : > { %1594 = vmatmul.msk.bf16.gmra.mxu1 %vm376_vm0, %v1725_v37 }
  0x54   : > { %695 = vmatmul.bf16.vlgmr.msrb.gmra.mxu3 %v1856_v13  ;;  %869 = vmatpush.bf16.msra.mxu0 %v1981_v43 }
  0x55   : > { %794 = vmatpush.bf16.msra.mxu3 %v1935_v17  ;;  %880 = vmatpush.bf16.msra.mxu1 %v2053_v16 }
  0x56   : > { %892 = vmatpush.bf16.msra.mxu2 %v1967_v35 }
  0x58   : > { %870 = vmatpush.bf16.msra.mxu0 %v1996_v54 }
  0x59   : > { %795 = vmatpush.bf16.msra.mxu3 %v1945_v23  ;;  %881 = vmatpush.bf16.msra.mxu1 %v2063_v31 }
  0x5a   : > { %893 = vmatpush.bf16.msra.mxu2 %v1993_v53 }
  0x5b   : > { %708 = vmatmul.bf16.vlgmr.msrb.gmra.mxu0 %v1856_v13  ;;  %1598 = vmatmul.msk.bf16.gmra.mxu2 %vm376_vm0, %v1725_v37 }
  0x5c   : > { %971 = vmatpush.bf16.msrb.mxu0 %v1999_v55 }
  0x5d   : > { %796 = vmatpush.bf16.msra.mxu3 %v1955_v27  ;;  %882 = vmatpush.bf16.msra.mxu1 %v2071_v34 }
  0x5e   : > { %894 = vmatpush.bf16.msra.mxu2 %v2010_v63 }
  0x60   : > { %972 = vmatpush.bf16.msrb.mxu0 %v2017_v3 }
  0x61   : > { %797 = vmatpush.bf16.msra.mxu3 %v1967_v35  ;;  %883 = vmatpush.bf16.msra.mxu1 %v2082_v40 }
  0x62   : > { %895 = vmatpush.bf16.msra.mxu2 %v2023_v9 }
  0x64   : > { %973 = vmatpush.bf16.msrb.mxu0 %v2030_v14 }
  0x65   : > { %798 = vmatpush.bf16.msra.mxu3 %v1993_v53 }
  0x66   : > { %896 = vmatpush.bf16.msra.mxu2 %v2033_v15 }
  0x68   : > { %974 = vmatpush.bf16.msrb.mxu0 %v2043_v22 }
  0x69   : > { %799 = vmatpush.bf16.msra.mxu3 %v2010_v63 }
  0x6c   : > { %975 = vmatpush.bf16.msrb.mxu0 %v2053_v16 }
  0x6d   : > { %800 = vmatpush.bf16.msra.mxu3 %v2023_v9 }
  0x70   : > { %976 = vmatpush.bf16.msrb.mxu0 %v2063_v31 }
  0x71   : > { %801 = vmatpush.bf16.msra.mxu3 %v2033_v15 }
  0x74   : > { %977 = vmatpush.bf16.msrb.mxu0 %v2071_v34 }
  0x75   : > { %958 = vmatpush.bf16.msrb.mxu3 %v1916_v7 }
  0x78   : > { %978 = vmatpush.bf16.msrb.mxu0 %v2082_v40 }
  0x79   : > { %959 = vmatpush.bf16.msrb.mxu3 %v1926_v11 }
  0x7d   : > { %960 = vmatpush.bf16.msrb.mxu3 %v1938_v18 }
  0x81   : > { %961 = vmatpush.bf16.msrb.mxu3 %v1952_v26 }
  0x85   : > { %962 = vmatpush.bf16.msrb.mxu3 %v1960_v30 }
  0x89   : > { %963 = vmatpush.bf16.msrb.mxu3 %v1970_v36 }
  0x8d   : > { %964 = vmatpush.bf16.msrb.mxu3 %v1981_v43 }
  0x91   : > { %965 = vmatpush.bf16.msrb.mxu3 %v1996_v54 }
  0x98   : > { %v398_v41 = vpop.f32.mrf.mxu0 }
  0x99   : > { %v399_v57 = vadd.f32 %v398_v41, %v318_v44 }
  0xa0   : > { %v400_v45 = vpop.f32.mrf.mxu0  ;;  %v427_v21 = vpop.f32.mrf.mxu1 }
  0xa1   : > { %v2144_v46 = vadd.f32 %v400_v45, %v318_v44  ;;  %v428_v24 = vadd.f32 %v427_v21, %v2162_v10  ;;  %v2170_v45 = vperm.slane %v532_v51, 2 }
  0xa8   : > { %v403_v47 = vpop.f32.mrf.mxu0 }
  0xa9   : > { %v2146_v48 = vadd.f32 %v403_v47, %v318_v44 }
  0xb0   : > { %v405_v49 = vpop.f32.mrf.mxu0 }
  0xb1   : > { %v2151_v50 = vadd.f32 %v405_v49, %v318_v44 }
  0xb7   : > { %v683_v56 = vpop.f32.mrf.mxu3 }
  0xb8   : > { %v684_v58 = vadd.f32 %v683_v56, %v2153_v52  ;;  %v408_v59 = vpop.f32.mrf.mxu0 }
  0xb9   : > { %v2156_v60 = vadd.f32 %v408_v59, %v318_v44 }
  0xba   : > { %v713_v61 = vadd.f32 %v684_v58, %v399_v57 }
  0xbc   : > { %v1695_v62 = vmul.f32 -1.442695, %v713_v61 }
  0xbe   : > { %1768 = vpow2.f32 %v1695_v62  ;;  %v2173_v62 = vperm.slane %v316_v42, 2 }
  0xbf   : > { %v685_v0 = vpop.f32.mrf.mxu3 }
  0xc0   : > { %v410_v1 = vpop.f32.mrf.mxu0 }
  0xc1   : > { %v2158_v2 = vadd.f32 %v410_v1, %v318_v44  ;;  %v456_v1 = vpop.f32.mrf.mxu2 }
  0xc4   : > { %v1769_v4 = vpop.eup %1768 }
  0xc5   : > { %v717_v5 = vadd.f32 1.0, %v1769_v4 }
  0xc7   : > { %1770 = vrcp.f32 %v717_v5  ;;  %v729_v56 = vand.u32 2147483648, %v717_v5  ;;  %vm723_vm2 = vweird.f32 %v717_v5  ;;  %v727_v58 = vand.u32 2147483647, %v717_v5 }
  0xc8   : > { %v413_v6 = vpop.f32.mrf.mxu0 }
  0xc9   : > { %v2160_v8 = vadd.f32 %v413_v6, %v318_v44  ;;  %v730_v0 = vor.u32 1.1754944e-38, %v729_v56  ;;  %vm728_vm4 = vcmp.eq.f32.partialorder %v727_v58, 8.507059e+37  ;;  %v457_v6 = vadd.f32 %v456_v1, %v2173_v62  ;;  %v458_v56 = vpop.f32.mrf.mxu2 }
  0xcb   : > { %2417 = vst [vmem:[#allocation3_spill] sm:$0xff] %v2160_v8 }
  0xcd   : > { %v1771_v13 = vpop.eup %1770 }
  0xce   : > { %v719_v28 = vmul.f32 %v1771_v13, %v717_v5  ;;  %vm724_vm1 = vweird.f32 %v1771_v13 }
  0xcf   : > { %vm725_vm3 = vmor %vm723_vm2, %vm724_vm1 }
  0xd0   : > { %v415_v12 = vpop.f32.mrf.mxu0  ;;  %v720_v37 = vsub.f32 1.0, %v719_v28 }
  0xd1   : > { %v2164_v19 = vadd.f32 %v415_v12, %v318_v44  ;;  %v2214_v58 = vpop.f32.mrf.mxu2 }
  0xd2   : > { %v721_v39 = vmul.f32 %v1771_v13, %v720_v37 }
  0xd3   : > { %2418 = vst [vmem:[#allocation4_spill] sm:$0xff] %v2164_v19 }
  0xd4   : > { %v722_v44 = vadd.f32 %v1771_v13, %v721_v39 }
  0xd6   : > { %v726_v61 = vsel %vm725_vm3, %v1771_v13, %v722_v44 }
  0xd7   : > { %v696_v25 = vpop.f32.mrf.mxu3  ;;  %v731_v51 = vsel %vm728_vm4, %v730_v0, %v726_v61 }
  0xd8   : > { %v697_v29 = vadd.f32 %v696_v25, %v2166_v20  ;;  %v709_v33 = vpop.f32.mrf.mxu0 }
  0xd9   : > { %v710_v59 = vadd.f32 %v709_v33, %v2170_v45  ;;  %v2218_v61 = vpop.f32.mrf.mxu2 }
  0xda   : > { %v733_v32 = vadd.f32 %v697_v29, %v428_v24 }
  0xdb   : > { %v753_v4 = vmul.f32 %v731_v51, %v710_v59 }
  0xdc   : > { %v1696_v38 = vmul.f32 -1.442695, %v733_v32 }
  0xdd   : > { %v754_v24 = vadd.f32 %v753_v4, %v457_v6 }
  0xde   : > { %1772 = vpow2.f32 %v1696_v38 }
  0xdf   : > { %v698_v41 = vpop.f32.mrf.mxu3 }
  0xe0   : > { %v711_v47 = vpop.f32.mrf.mxu0 }
  0xe1   : > { %v2222_v1 = vpop.f32.mrf.mxu2 }
  0xe4   : > { %v1773_v49 = vpop.eup %1772 }
  0xe5   : > { %v737_v57 = vadd.f32 1.0, %v1773_v49  ;;  %v429_v49 = vpop.f32.mrf.mxu1 }
  0xe7   : > { %1774 = vrcp.f32 %v737_v57  ;;  %v749_v5 = vand.u32 2147483648, %v737_v57  ;;  %v747_v29 = vand.u32 2147483647, %v737_v57  ;;  %vm743_vm6 = vweird.f32 %v737_v57 }
  0xe8   : > { %1776 = vtanh.f32 %v754_v24 }
  0xe9   : > { %v750_v13 = vor.u32 1.1754944e-38, %v749_v5  ;;  %vm748_vm8 = vcmp.eq.f32.partialorder %v747_v29, 8.507059e+37  ;;  %v2226_v4 = vpop.f32.mrf.mxu2 }
  0xed   : > { %v1775_v12 = vpop.eup %1774 }
  0xee   : > { %v739_v21 = vmul.f32 %v1775_v12, %v737_v57  ;;  %vm744_vm5 = vweird.f32 %v1775_v12  ;;  %v1777_v38 = vpop.eup %1776  ;;  %v2212_v57 = vpop.f32.mrf.mxu1 }
  0xef   : > { %vm745_vm7 = vmor %vm743_vm6, %vm744_vm5 }
  0xf0   : > { %v740_v25 = vsub.f32 1.0, %v739_v21 }
  0xf2   : > { %v741_v28 = vmul.f32 %v1775_v12, %v740_v25 }
  0xf4   : > { %v742_v42 = vadd.f32 %v1775_v12, %v741_v28 }
  0xf6   : > { %v746_v32 = vsel %vm745_vm7, %v1775_v12, %v742_v42  ;;  %v2216_v59 = vpop.f32.mrf.mxu1  ;;  %v2230_v12 = vpop.f32.mrf.mxu2 }
  0xf7   : > { %v751_v33 = vsel %vm748_vm8, %v750_v13, %v746_v32  ;;  %2420 = vst [vmem:[#allocation6_spill] sm:$0xff] %v2230_v12  ;;  %v430_v13 = vadd.f32 %v429_v49, %v2162_v10 }
  0xf8   : > { %v756_v37 = vsub.f32 1.0, %v751_v33  ;;  %v758_v41 = vmul.f32 0.0, %v751_v33 }
  0xfa   : > { %v757_v39 = vmul.f32 %v1777_v38, %v756_v37 }
  0xfc   : > { %v2182_v44 = vadd.f32 %v758_v41, %v757_v39 }
  0xfe   : > { %760 = vst [vmem:[%s2180_s17] sm:$0xff] %v2182_v44  ;;  %v767_v47 = vpack.c.bf16 %v2182_v44, %v2182_v44  ;;  %v2220_v0 = vpop.f32.mrf.mxu1  ;;  %v2234_v24 = vpop.f32.mrf.mxu2 }
  0xff   : > { %2422 = vst [vmem:[#allocation8_spill] sm:$0xff] %v2234_v24 }
 0x100   : > { %776 = vmatmul.bf16.vlgmr.msrb.gmra.mxu1 %v767_v47  ;;  %789 = vmatmul.bf16.vlgmr.msrb.gmra.mxu2 %v767_v47 }
 0x101   : > { %802 = vmatmul.bf16.vlgmr.msra.gmra.mxu3 %v767_v47  ;;  %984 = vmatpush.bf16.msrb.mxu1 %v1935_v17 }
 0x102   : > { %1053 = vmatpush.bf16.msrb.mxu2 %v1916_v7  ;;  %1066 = vmatpush.bf16.msra.mxu3 %v1999_v55 }
 0x105   : > { %985 = vmatpush.bf16.msrb.mxu1 %v1945_v23 }
 0x106   : > { %1054 = vmatpush.bf16.msrb.mxu2 %v1926_v11  ;;  %1067 = vmatpush.bf16.msra.mxu3 %v2017_v3  ;;  %v2224_v51 = vpop.f32.mrf.mxu1 }
 0x109   : > { %986 = vmatpush.bf16.msrb.mxu1 %v1955_v27 }
 0x10a   : > { %1055 = vmatpush.bf16.msrb.mxu2 %v1938_v18  ;;  %1068 = vmatpush.bf16.msra.mxu3 %v2030_v14 }
 0x10d   : > { %987 = vmatpush.bf16.msrb.mxu1 %v1967_v35 }
 0x10e   : > { %1056 = vmatpush.bf16.msrb.mxu2 %v1952_v26  ;;  %1069 = vmatpush.bf16.msra.mxu3 %v2043_v22  ;;  %v2228_v6 = vpop.f32.mrf.mxu1 }
 0x10f   : > { %2419 = vst [vmem:[#allocation5_spill] sm:$0xff] %v2228_v6 }
 0x111   : > { %988 = vmatpush.bf16.msrb.mxu1 %v1993_v53 }
 0x112   : > { %1057 = vmatpush.bf16.msrb.mxu2 %v1960_v30  ;;  %1070 = vmatpush.bf16.msra.mxu3 %v2053_v16 }
 0x115   : > { %989 = vmatpush.bf16.msrb.mxu1 %v2010_v63 }
 0x116   : > { %1058 = vmatpush.bf16.msrb.mxu2 %v1970_v36  ;;  %1071 = vmatpush.bf16.msra.mxu3 %v2063_v31  ;;  %v2232_v21 = vpop.f32.mrf.mxu1 }
 0x117   : > { %2421 = vst [vmem:[#allocation7_spill] sm:$0xff] %v2232_v21 }
 0x119   : > { %990 = vmatpush.bf16.msrb.mxu1 %v2023_v9 }
 0x11a   : > { %1059 = vmatpush.bf16.msrb.mxu2 %v1981_v43  ;;  %1072 = vmatpush.bf16.msra.mxu3 %v2071_v34 }
 0x11d   : > { %991 = vmatpush.bf16.msrb.mxu1 %v2033_v15 }
 0x11e   : > { %1060 = vmatpush.bf16.msrb.mxu2 %v1996_v54  ;;  %1073 = vmatpush.bf16.msra.mxu3 %v2082_v40 }
 0x17d   : > { %v777_v25 = vpop.f32.mrf.mxu1 }
 0x17e   : > { %v778_v5 = vadd.f32 %v777_v25, %v2153_v52 }
 0x180   : > { %v807_v28 = vadd.f32 %v778_v5, %v2144_v46 }
 0x182   : > { %v1697_v29 = vmul.f32 -1.442695, %v807_v28 }
 0x183   : > { %v790_v42 = vpop.f32.mrf.mxu2 }
 0x184   : > { %1778 = vpow2.f32 %v1697_v29  ;;  %v791_v32 = vadd.f32 %v790_v42, %v2166_v20  ;;  %v803_v33 = vpop.f32.mrf.mxu3 }
 0x185   : > { %v779_v37 = vpop.f32.mrf.mxu1 }
 0x186   : > { %v827_v38 = vadd.f32 %v791_v32, %v430_v13 }
 0x188   : > { %v1698_v39 = vmul.f32 -1.442695, %v827_v38 }
 0x18a   : > { %v1779_v41 = vpop.eup %1778  ;;  %1780 = vpow2.f32 %v1698_v39  ;;  %v459_v39 = vadd.f32 %v458_v56, %v2173_v62 }
 0x18b   : > { %v811_v47 = vadd.f32 1.0, %v1779_v41  ;;  %v792_v24 = vpop.f32.mrf.mxu2 }
 0x18c   : > { %v805_v19 = vpop.f32.mrf.mxu3 }
 0x18d   : > { %1782 = vrcp.f32 %v811_v47  ;;  %v823_v49 = vand.u32 2147483648, %v811_v47  ;;  %v821_v42 = vand.u32 2147483647, %v811_v47  ;;  %vm817_vm10 = vweird.f32 %v811_v47 }
 0x18e   : > { %v804_v19 = vadd.f32 %v803_v33, %v2170_v45 }
 0x18f   : > { %v824_v32 = vor.u32 1.1754944e-38, %v823_v49  ;;  %vm822_vm12 = vcmp.eq.f32.partialorder %v821_v42, 8.507059e+37 }
 0x190   : > { %v1781_v25 = vpop.eup %1780 }
 0x191   : > { %v831_v21 = vadd.f32 1.0, %v1781_v25 }
 0x193   : > { %v1783_v46 = vpop.eup %1782  ;;  %1784 = vrcp.f32 %v831_v21  ;;  %v841_v8 = vand.u32 2147483647, %v831_v21  ;;  %vm837_vm14 = vweird.f32 %v831_v21 }
 0x194   : > { %v813_v5 = vmul.f32 %v1783_v46, %v811_v47  ;;  %vm818_vm9 = vweird.f32 %v1783_v46 }
 0x195   : > { %vm819_vm11 = vmor %vm817_vm10, %vm818_vm9  ;;  %vm842_vm0 = vcmp.eq.f32.partialorder %v841_v8, 8.507059e+37 }
 0x196   : > { %v814_v28 = vsub.f32 1.0, %v813_v5  ;;  %v843_v5 = vand.u32 2147483648, %v831_v21 }
 0x198   : > { %v815_v29 = vmul.f32 %v1783_v46, %v814_v28  ;;  %v844_v47 = vor.u32 1.1754944e-38, %v843_v5 }
 0x199   : > { %v1785_v12 = vpop.eup %1784 }
 0x19a   : > { %v833_v37 = vmul.f32 %v1785_v12, %v831_v21  ;;  %v816_v13 = vadd.f32 %v1783_v46, %v815_v29  ;;  %vm838_vm13 = vweird.f32 %v1785_v12 }
 0x19b   : > { %vm839_vm15 = vmor %vm837_vm14, %vm838_vm13 }
 0x19c   : > { %v834_v38 = vsub.f32 1.0, %v833_v37  ;;  %v820_v24 = vsel %vm819_vm11, %v1783_v46, %v816_v13 }
 0x19d   : > { %v825_v41 = vsel %vm822_vm12, %v824_v32, %v820_v24 }
 0x19e   : > { %v835_v25 = vmul.f32 %v1785_v12, %v834_v38  ;;  %v847_v28 = vmul.f32 %v825_v41, %v804_v19 }
 0x1a0   : > { %v836_v6 = vadd.f32 %v1785_v12, %v835_v25  ;;  %v848_v29 = vadd.f32 %v847_v28, %v459_v39 }
 0x1a2   : > { %v840_v49 = vsel %vm839_vm15, %v1785_v12, %v836_v6  ;;  %1786 = vtanh.f32 %v848_v29  ;;  %v433_v6 = vadd.f32 %v2212_v57, %v2162_v10 }
 0x1a3   : > { %v845_v33 = vsel %vm842_vm0, %v844_v47, %v840_v49 }
 0x1a4   : > { %v850_v46 = vsub.f32 1.0, %v845_v33  ;;  %v852_v56 = vmul.f32 %v845_v33, %v2182_v44 }
 0x1a8   : > { %v1787_v42 = vpop.eup %1786 }
 0x1a9   : > { %v851_v37 = vmul.f32 %v1787_v42, %v850_v46 }
 0x1ab   : > { %v2243_v13 = vadd.f32 %v852_v56, %v851_v37 }
 0x1ad   : > { %1699 = vst [vmem:[%s2180_s17 + $0x8] sm:$0xff] %v2243_v13  ;;  %v862_v21 = vpack.c.bf16 %v2243_v13, %v2243_v13 }
 0x1af   : > { %871 = vmatmul.bf16.vlgmr.msra.gmra.mxu0 %v862_v21  ;;  %884 = vmatmul.bf16.vlgmr.msra.gmra.mxu1 %v862_v21 }
 0x1b0   : > { %897 = vmatmul.bf16.vlgmr.msra.gmra.mxu2 %v862_v21  ;;  %1079 = vmatpush.bf16.msra.mxu0 %v1935_v17 }
 0x1b1   : > { %1148 = vmatpush.bf16.msra.mxu1 %v1916_v7  ;;  %1161 = vmatpush.bf16.msra.mxu2 %v1999_v55 }
 0x1b4   : > { %1080 = vmatpush.bf16.msra.mxu0 %v1945_v23 }
 0x1b5   : > { %1149 = vmatpush.bf16.msra.mxu1 %v1926_v11  ;;  %1162 = vmatpush.bf16.msra.mxu2 %v2017_v3 }
 0x1b8   : > { %1081 = vmatpush.bf16.msra.mxu0 %v1955_v27 }
 0x1b9   : > { %1150 = vmatpush.bf16.msra.mxu1 %v1938_v18  ;;  %1163 = vmatpush.bf16.msra.mxu2 %v2030_v14 }
 0x1bc   : > { %1082 = vmatpush.bf16.msra.mxu0 %v1967_v35 }
 0x1bd   : > { %1151 = vmatpush.bf16.msra.mxu1 %v1952_v26  ;;  %1164 = vmatpush.bf16.msra.mxu2 %v2043_v22 }
 0x1c0   : > { %1083 = vmatpush.bf16.msra.mxu0 %v1993_v53 }
 0x1c1   : > { %1152 = vmatpush.bf16.msra.mxu1 %v1960_v30  ;;  %1165 = vmatpush.bf16.msra.mxu2 %v2053_v16 }
 0x1c4   : > { %1084 = vmatpush.bf16.msra.mxu0 %v2010_v63 }
 0x1c5   : > { %1153 = vmatpush.bf16.msra.mxu1 %v1970_v36  ;;  %1166 = vmatpush.bf16.msra.mxu2 %v2063_v31 }
 0x1c8   : > { %1085 = vmatpush.bf16.msra.mxu0 %v2023_v9 }
 0x1c9   : > { %1154 = vmatpush.bf16.msra.mxu1 %v1981_v43  ;;  %1167 = vmatpush.bf16.msra.mxu2 %v2071_v34 }
 0x1cc   : > { %1086 = vmatpush.bf16.msra.mxu0 %v2033_v15 }
 0x1cd   : > { %1155 = vmatpush.bf16.msra.mxu1 %v1996_v54  ;;  %1168 = vmatpush.bf16.msra.mxu2 %v2082_v40 }
 0x22c   : > { %v872_v8 = vpop.f32.mrf.mxu0  ;;  %v885_v44 = vpop.f32.mrf.mxu1 }
 0x22d   : > { %v873_v12 = vadd.f32 %v872_v8, %v2153_v52  ;;  %v886_v32 = vadd.f32 %v885_v44, %v2166_v20 }
 0x22f   : > { %v902_v38 = vadd.f32 %v873_v12, %v2146_v48  ;;  %v922_v19 = vadd.f32 %v886_v32, %v433_v6 }
 0x231   : > { %v1700_v24 = vmul.f32 -1.442695, %v902_v38  ;;  %v1701_v39 = vmul.f32 -1.442695, %v922_v19 }
 0x233   : > { %1788 = vpow2.f32 %v1700_v24  ;;  %v898_v41 = vpop.f32.mrf.mxu2 }
 0x234   : > { %1790 = vpow2.f32 %v1701_v39  ;;  %v874_v25 = vpop.f32.mrf.mxu0  ;;  %v887_v5 = vpop.f32.mrf.mxu1  ;;  %v899_v38 = vadd.f32 %v898_v41, %v2170_v45 }
 0x235   : > { %v462_v25 = vadd.f32 %v2214_v58, %v2173_v62 }
 0x239   : > { %v1789_v28 = vpop.eup %1788 }
 0x23a   : > { %v1791_v29 = vpop.eup %1790  ;;  %v906_v47 = vadd.f32 1.0, %v1789_v28 }
 0x23b   : > { %v926_v49 = vadd.f32 1.0, %v1791_v29  ;;  %v900_v33 = vpop.f32.mrf.mxu2 }
 0x23c   : > { %1792 = vrcp.f32 %v906_v47  ;;  %v918_v21 = vand.u32 2147483648, %v906_v47  ;;  %v916_v44 = vand.u32 2147483647, %v906_v47  ;;  %vm912_vm2 = vweird.f32 %v906_v47 }
 0x23d   : > { %1794 = vrcp.f32 %v926_v49  ;;  %v938_v5 = vand.u32 2147483648, %v926_v49  ;;  %vm932_vm6 = vweird.f32 %v926_v49  ;;  %v936_v29 = vand.u32 2147483647, %v926_v49 }
 0x23e   : > { %v919_v32 = vor.u32 1.1754944e-38, %v918_v21  ;;  %vm917_vm4 = vcmp.eq.f32.partialorder %v916_v44, 8.507059e+37 }
 0x23f   : > { %vm937_vm8 = vcmp.eq.f32.partialorder %v936_v29, 8.507059e+37 }
 0x242   : > { %v1793_v57 = vpop.eup %1792 }
 0x243   : > { %v1795_v46 = vpop.eup %1794  ;;  %v908_v42 = vmul.f32 %v1793_v57, %v906_v47  ;;  %vm913_vm1 = vweird.f32 %v1793_v57 }
 0x244   : > { %v928_v37 = vmul.f32 %v1795_v46, %v926_v49  ;;  %vm914_vm3 = vmor %vm912_vm2, %vm913_vm1  ;;  %vm933_vm5 = vweird.f32 %v1795_v46  ;;  %v435_v49 = vadd.f32 %v2216_v59, %v2162_v10 }
 0x245   : > { %v909_v48 = vsub.f32 1.0, %v908_v42  ;;  %vm934_vm7 = vmor %vm932_vm6, %vm933_vm5  ;;  %v939_v42 = vor.u32 1.1754944e-38, %v938_v5 }
 0x246   : > { %v929_v56 = vsub.f32 1.0, %v928_v37 }
 0x247   : > { %v910_v8 = vmul.f32 %v1793_v57, %v909_v48 }
 0x248   : > { %v930_v6 = vmul.f32 %v1795_v46, %v929_v56 }
 0x249   : > { %v911_v12 = vadd.f32 %v1793_v57, %v910_v8 }
 0x24a   : > { %v931_v39 = vadd.f32 %v1795_v46, %v930_v6 }
 0x24b   : > { %v915_v19 = vsel %vm914_vm3, %v1793_v57, %v911_v12 }
 0x24c   : > { %v920_v24 = vsel %vm917_vm4, %v919_v32, %v915_v19  ;;  %v935_v47 = vsel %vm934_vm7, %v1795_v46, %v931_v39 }
 0x24d   : > { %v942_v28 = vmul.f32 %v920_v24, %v899_v38  ;;  %v940_v41 = vsel %vm937_vm8, %v939_v42, %v935_v47 }
 0x24e   : > { %v945_v57 = vsub.f32 1.0, %v940_v41  ;;  %v947_v56 = vmul.f32 %v940_v41, %v2243_v13 }
 0x24f   : > { %v943_v33 = vadd.f32 %v942_v28, %v462_v25 }
 0x251   : > { %1796 = vtanh.f32 %v943_v33 }
 0x257   : > { %v1797_v37 = vpop.eup %1796 }
 0x258   : > { %v946_v48 = vmul.f32 %v1797_v37, %v945_v57 }
 0x25a   : > { %v2282_v21 = vadd.f32 %v947_v56, %v946_v48 }
 0x25c   : > { %1702 = vst [vmem:[%s2180_s17 + $0x10] sm:$0xff] %v2282_v21  ;;  %v957_v58 = vpack.c.bf16 %v2282_v21, %v2282_v21 }
 0x25e   : > { %966 = vmatmul.bf16.vlgmr.msrb.gmra.mxu3 %v957_v58  ;;  %979 = vmatmul.bf16.vlgmr.msrb.gmra.mxu0 %v957_v58 }
 0x25f   : > { %992 = vmatmul.bf16.vlgmr.msrb.gmra.mxu1 %v957_v58  ;;  %1174 = vmatpush.bf16.msrb.mxu3 %v1935_v17 }
 0x260   : > { %1243 = vmatpush.bf16.msrb.mxu0 %v1916_v7  ;;  %1256 = vmatpush.bf16.msrb.mxu1 %v1999_v55 }
 0x263   : > { %1175 = vmatpush.bf16.msrb.mxu3 %v1945_v23 }
 0x264   : > { %1244 = vmatpush.bf16.msrb.mxu0 %v1926_v11  ;;  %1257 = vmatpush.bf16.msrb.mxu1 %v2017_v3 }
 0x267   : > { %1176 = vmatpush.bf16.msrb.mxu3 %v1955_v27 }
 0x268   : > { %1245 = vmatpush.bf16.msrb.mxu0 %v1938_v18  ;;  %1258 = vmatpush.bf16.msrb.mxu1 %v2030_v14 }
 0x26b   : > { %1177 = vmatpush.bf16.msrb.mxu3 %v1967_v35 }
 0x26c   : > { %1246 = vmatpush.bf16.msrb.mxu0 %v1952_v26  ;;  %1259 = vmatpush.bf16.msrb.mxu1 %v2043_v22 }
 0x26f   : > { %1178 = vmatpush.bf16.msrb.mxu3 %v1993_v53 }
 0x270   : > { %1247 = vmatpush.bf16.msrb.mxu0 %v1960_v30  ;;  %1260 = vmatpush.bf16.msrb.mxu1 %v2053_v16 }
 0x273   : > { %1179 = vmatpush.bf16.msrb.mxu3 %v2010_v63 }
 0x274   : > { %1248 = vmatpush.bf16.msrb.mxu0 %v1970_v36  ;;  %1261 = vmatpush.bf16.msrb.mxu1 %v2063_v31 }
 0x277   : > { %1180 = vmatpush.bf16.msrb.mxu3 %v2023_v9 }
 0x278   : > { %1249 = vmatpush.bf16.msrb.mxu0 %v1981_v43  ;;  %1262 = vmatpush.bf16.msrb.mxu1 %v2071_v34 }
 0x27b   : > { %1181 = vmatpush.bf16.msrb.mxu3 %v2033_v15 }
 0x27c   : > { %1250 = vmatpush.bf16.msrb.mxu0 %v1996_v54  ;;  %1263 = vmatpush.bf16.msrb.mxu1 %v2082_v40 }
 0x2db   : > { %v980_v13 = vpop.f32.mrf.mxu0 }
 0x2dc   : > { %v981_v46 = vadd.f32 %v980_v13, %v2166_v20  ;;  %v993_v8 = vpop.f32.mrf.mxu1 }
 0x2de   : > { %v1017_v44 = vadd.f32 %v981_v46, %v435_v49  ;;  %v994_v46 = vadd.f32 %v993_v8, %v2170_v45 }
 0x2e0   : > { %v1704_v6 = vmul.f32 -1.442695, %v1017_v44 }
 0x2e1   : > { %v967_v12 = vpop.f32.mrf.mxu3 }
 0x2e2   : > { %1798 = vpow2.f32 %v1704_v6  ;;  %v968_v32 = vadd.f32 %v967_v12, %v2153_v52 }
 0x2e3   : > { %v982_v38 = vpop.f32.mrf.mxu0 }
 0x2e4   : > { %v997_v19 = vadd.f32 %v968_v32, %v2151_v50  ;;  %v995_v24 = vpop.f32.mrf.mxu1  ;;  %v464_v32 = vadd.f32 %v2218_v61, %v2173_v62 }
 0x2e6   : > { %v1703_v39 = vmul.f32 -1.442695, %v997_v19 }
 0x2e8   : > { %v1799_v25 = vpop.eup %1798  ;;  %1800 = vpow2.f32 %v1703_v39 }
 0x2e9   : > { %v1021_v5 = vadd.f32 1.0, %v1799_v25  ;;  %v969_v28 = vpop.f32.mrf.mxu3 }
 0x2eb   : > { %1802 = vrcp.f32 %v1021_v5  ;;  %v1033_v38 = vand.u32 2147483648, %v1021_v5  ;;  %vm1027_vm14 = vweird.f32 %v1021_v5  ;;  %v1031_v24 = vand.u32 2147483647, %v1021_v5 }
 0x2ed   : > { %v1034_v28 = vor.u32 1.1754944e-38, %v1033_v38  ;;  %vm1032_vm0 = vcmp.eq.f32.partialorder %v1031_v24, 8.507059e+37 }
 0x2ee   : > { %v1801_v59 = vpop.eup %1800 }
 0x2ef   : > { %v1001_v29 = vadd.f32 1.0, %v1801_v59 }
 0x2f1   : > { %1804 = vrcp.f32 %v1001_v29  ;;  %v1803_v33 = vpop.eup %1802  ;;  %v1013_v48 = vand.u32 2147483648, %v1001_v29  ;;  %v1011_v50 = vand.u32 2147483647, %v1001_v29  ;;  %vm1007_vm10 = vweird.f32 %v1001_v29 }
 0x2f2   : > { %v1023_v47 = vmul.f32 %v1803_v33, %v1021_v5  ;;  %vm1028_vm13 = vweird.f32 %v1803_v33 }
 0x2f3   : > { %v1014_v49 = vor.u32 1.1754944e-38, %v1013_v48  ;;  %vm1012_vm12 = vcmp.eq.f32.partialorder %v1011_v50, 8.507059e+37  ;;  %vm1029_vm15 = vmor %vm1027_vm14, %vm1028_vm13 }
 0x2f4   : > { %v1024_v57 = vsub.f32 1.0, %v1023_v47 }
 0x2f6   : > { %v1025_v58 = vmul.f32 %v1803_v33, %v1024_v57 }
 0x2f7   : > { %v1805_v42 = vpop.eup %1804 }
 0x2f8   : > { %v1003_v41 = vmul.f32 %v1805_v42, %v1001_v29  ;;  %vm1008_vm9 = vweird.f32 %v1805_v42  ;;  %v1026_v12 = vadd.f32 %v1803_v33, %v1025_v58 }
 0x2f9   : > { %vm1009_vm11 = vmor %vm1007_vm10, %vm1008_vm9 }
 0x2fa   : > { %v1004_v37 = vsub.f32 1.0, %v1003_v41  ;;  %v1030_v25 = vsel %vm1029_vm15, %v1803_v33, %v1026_v12 }
 0x2fb   : > { %v1035_v8 = vsel %vm1032_vm0, %v1034_v28, %v1030_v25 }
 0x2fc   : > { %v1005_v56 = vmul.f32 %v1805_v42, %v1004_v37  ;;  %v1040_v59 = vsub.f32 1.0, %v1035_v8 }
 0x2fe   : > { %v1006_v13 = vadd.f32 %v1805_v42, %v1005_v56 }
 0x300   : > { %v1010_v44 = vsel %vm1009_vm11, %v1805_v42, %v1006_v13  ;;  %v1042_v42 = vmul.f32 %v1035_v8, %v2282_v21 }
 0x301   : > { %v1015_v6 = vsel %vm1012_vm12, %v1014_v49, %v1010_v44 }
 0x302   : > { %v1037_v19 = vmul.f32 %v1015_v6, %v994_v46 }
 0x304   : > { %v1038_v39 = vadd.f32 %v1037_v19, %v464_v32  ;;  %v467_v32 = vadd.f32 %v2222_v1, %v2173_v62 }
 0x306   : > { %1806 = vtanh.f32 %v1038_v39 }
 0x30c   : > { %v1807_v29 = vpop.eup %1806 }
 0x30d   : > { %v1041_v47 = vmul.f32 %v1807_v29, %v1040_v59 }
 0x30f   : > { %v2321_v41 = vadd.f32 %v1042_v42, %v1041_v47 }
 0x311   : > { %1705 = vst [vmem:[%s2180_s17 + $0x18] sm:$0xff] %v2321_v41  ;;  %v1052_v61 = vpack.c.bf16 %v2321_v41, %v2321_v41 }
 0x313   : > { %1061 = vmatmul.bf16.vlgmr.msrb.gmra.mxu2 %v1052_v61  ;;  %1074 = vmatmul.bf16.vlgmr.msra.gmra.mxu3 %v1052_v61 }
 0x314   : > { %1087 = vmatmul.bf16.vlgmr.msra.gmra.mxu0 %v1052_v61  ;;  %1269 = vmatpush.bf16.msrb.mxu2 %v1935_v17 }
 0x315   : > { %1338 = vmatpush.bf16.msra.mxu3 %v1916_v7  ;;  %1351 = vmatpush.bf16.msra.mxu0 %v1999_v55 }
 0x318   : > { %1270 = vmatpush.bf16.msrb.mxu2 %v1945_v23 }
 0x319   : > { %1339 = vmatpush.bf16.msra.mxu3 %v1926_v11  ;;  %1352 = vmatpush.bf16.msra.mxu0 %v2017_v3 }
 0x31c   : > { %1271 = vmatpush.bf16.msrb.mxu2 %v1955_v27 }
 0x31d   : > { %1340 = vmatpush.bf16.msra.mxu3 %v1938_v18  ;;  %1353 = vmatpush.bf16.msra.mxu0 %v2030_v14 }
 0x320   : > { %1272 = vmatpush.bf16.msrb.mxu2 %v1967_v35 }
 0x321   : > { %1341 = vmatpush.bf16.msra.mxu3 %v1952_v26  ;;  %1354 = vmatpush.bf16.msra.mxu0 %v2043_v22  ;;  %v438_v26 = vadd.f32 %v2220_v0, %v2162_v10 }
 0x324   : > { %1273 = vmatpush.bf16.msrb.mxu2 %v1993_v53 }
 0x325   : > { %1342 = vmatpush.bf16.msra.mxu3 %v1960_v30  ;;  %1355 = vmatpush.bf16.msra.mxu0 %v2053_v16 }
 0x328   : > { %1274 = vmatpush.bf16.msrb.mxu2 %v2010_v63 }
 0x329   : > { %1343 = vmatpush.bf16.msra.mxu3 %v1970_v36  ;;  %1356 = vmatpush.bf16.msra.mxu0 %v2063_v31 }
 0x32c   : > { %1275 = vmatpush.bf16.msrb.mxu2 %v2023_v9 }
 0x32d   : > { %1344 = vmatpush.bf16.msra.mxu3 %v1981_v43  ;;  %1357 = vmatpush.bf16.msra.mxu0 %v2071_v34 }
 0x330   : > { %1276 = vmatpush.bf16.msrb.mxu2 %v2033_v15 }
 0x331   : > { %1345 = vmatpush.bf16.msra.mxu3 %v1996_v54  ;;  %1358 = vmatpush.bf16.msra.mxu0 %v2082_v40 }
 0x391   : > { %v1088_v7 = vpop.f32.mrf.mxu0 }
 0x392   : > { %v1089_v46 = vadd.f32 %v1088_v7, %v2170_v45 }
 0x396   : > { %v1062_v11 = vpop.f32.mrf.mxu2  ;;  %v1075_v18 = vpop.f32.mrf.mxu3 }
 0x397   : > { %v1063_v30 = vadd.f32 %v1062_v11, %v2153_v52  ;;  %v1076_v36 = vadd.f32 %v1075_v18, %v2166_v20 }
 0x399   : > { %v1092_v43 = vadd.f32 %v1063_v30, %v2156_v60  ;;  %v1112_v55 = vadd.f32 %v1076_v36, %v438_v26  ;;  %v1090_v3 = vpop.f32.mrf.mxu0 }
 0x39b   : > { %v1706_v14 = vmul.f32 -1.442695, %v1092_v43  ;;  %v1707_v22 = vmul.f32 -1.442695, %v1112_v55 }
 0x39d   : > { %1808 = vpow2.f32 %v1706_v14 }
 0x39e   : > { %1810 = vpow2.f32 %v1707_v22  ;;  %v1064_v54 = vpop.f32.mrf.mxu2  ;;  %v1077_v16 = vpop.f32.mrf.mxu3 }
 0x3a3   : > { %v1809_v31 = vpop.eup %1808 }
 0x3a4   : > { %v1811_v34 = vpop.eup %1810  ;;  %v1096_v40 = vadd.f32 1.0, %v1809_v31 }
 0x3a5   : > { %v1116_v21 = vadd.f32 1.0, %v1811_v34 }
 0x3a6   : > { %1812 = vrcp.f32 %v1096_v40  ;;  %v1108_v60 = vand.u32 2147483648, %v1096_v40  ;;  %v1106_v50 = vand.u32 2147483647, %v1096_v40  ;;  %vm1102_vm2 = vweird.f32 %v1096_v40 }
 0x3a7   : > { %1814 = vrcp.f32 %v1116_v21  ;;  %v1128_v19 = vand.u32 2147483648, %v1116_v21  ;;  %vm1122_vm6 = vweird.f32 %v1116_v21  ;;  %v1126_v24 = vand.u32 2147483647, %v1116_v21 }
 0x3a8   : > { %v1109_v49 = vor.u32 1.1754944e-38, %v1108_v60  ;;  %vm1107_vm4 = vcmp.eq.f32.partialorder %v1106_v50, 8.507059e+37 }
 0x3a9   : > { %v1129_v28 = vor.u32 1.1754944e-38, %v1128_v19  ;;  %vm1127_vm8 = vcmp.eq.f32.partialorder %v1126_v24, 8.507059e+37 }
 0x3ac   : > { %v1813_v0 = vpop.eup %1812 }
 0x3ad   : > { %v1815_v5 = vpop.eup %1814  ;;  %v1098_v33 = vmul.f32 %v1813_v0, %v1096_v40  ;;  %vm1103_vm1 = vweird.f32 %v1813_v0 }
 0x3ae   : > { %v1118_v57 = vmul.f32 %v1815_v5, %v1116_v21  ;;  %vm1104_vm3 = vmor %vm1102_vm2, %vm1103_vm1  ;;  %vm1123_vm5 = vweird.f32 %v1815_v5 }
 0x3af   : > { %v1099_v37 = vsub.f32 1.0, %v1098_v33  ;;  %vm1124_vm7 = vmor %vm1122_vm6, %vm1123_vm5  ;;  %v469_v33 = vadd.f32 %v2226_v4, %v2173_v62 }
 0x3b0   : > { %v1119_v48 = vsub.f32 1.0, %v1118_v57 }
 0x3b1   : > { %v1100_v56 = vmul.f32 %v1813_v0, %v1099_v37 }
 0x3b2   : > { %v1120_v58 = vmul.f32 %v1815_v5, %v1119_v48 }
 0x3b3   : > { %v1101_v13 = vadd.f32 %v1813_v0, %v1100_v56 }
 0x3b4   : > { %v1121_v12 = vadd.f32 %v1815_v5, %v1120_v58 }
 0x3b5   : > { %v1105_v44 = vsel %vm1104_vm3, %v1813_v0, %v1101_v13 }
 0x3b6   : > { %v1110_v6 = vsel %vm1107_vm4, %v1109_v49, %v1105_v44  ;;  %v1125_v25 = vsel %vm1124_vm7, %v1815_v5, %v1121_v12 }
 0x3b7   : > { %v1132_v38 = vmul.f32 %v1110_v6, %v1089_v46  ;;  %v1130_v8 = vsel %vm1127_vm8, %v1129_v28, %v1125_v25 }
 0x3b8   : > { %v1135_v59 = vsub.f32 1.0, %v1130_v8  ;;  %v1137_v42 = vmul.f32 %v1130_v8, %v2321_v41 }
 0x3b9   : > { %v1133_v39 = vadd.f32 %v1132_v38, %v467_v32 }
 0x3bb   : > { %1816 = vtanh.f32 %v1133_v39  ;;  %v2423_v39 = vld [vmem:[#allocation5_spill] sm:$0xff] }
 0x3bc   : > { %v443_v25 = vadd.f32 %v2423_v39, %v2162_v10 }
 0x3c1   : > { %v1817_v29 = vpop.eup %1816 }
 0x3c2   : > { %v1136_v47 = vmul.f32 %v1817_v29, %v1135_v59  ;;  %v2424_v59 = vld [vmem:[#allocation3_spill] sm:$0xff] }
 0x3c4   : > { %v2360_v61 = vadd.f32 %v1137_v42, %v1136_v47 }
 0x3c6   : > { %1708 = vst [vmem:[%s2180_s17 + $0x20] sm:$0xff] %v2360_v61  ;;  %v1147_v1 = vpack.c.bf16 %v2360_v61, %v2360_v61 }
 0x3c8   : > { %1156 = vmatmul.bf16.vlgmr.msra.gmra.mxu1 %v1147_v1  ;;  %1169 = vmatmul.bf16.vlgmr.msra.gmra.mxu2 %v1147_v1 }
 0x3c9   : > { %1182 = vmatmul.bf16.vlgmr.msrb.gmra.mxu3 %v1147_v1  ;;  %1364 = vmatpush.bf16.msra.mxu1 %v1935_v17 }
 0x3cd   : > { %1365 = vmatpush.bf16.msra.mxu1 %v1945_v23  ;;  %v440_v23 = vadd.f32 %v2224_v51, %v2162_v10 }
 0x3d1   : > { %1366 = vmatpush.bf16.msra.mxu1 %v1955_v27 }
 0x3d5   : > { %1367 = vmatpush.bf16.msra.mxu1 %v1967_v35 }
 0x3d9   : > { %1368 = vmatpush.bf16.msra.mxu1 %v1993_v53 }
 0x3dd   : > { %1369 = vmatpush.bf16.msra.mxu1 %v2010_v63 }
 0x3e1   : > { %1370 = vmatpush.bf16.msra.mxu1 %v2023_v9 }
 0x3e5   : > { %1371 = vmatpush.bf16.msra.mxu1 %v2033_v15 }
 0x445   : > { %v1157_v41 = vpop.f32.mrf.mxu1 }
 0x446   : > { %v1158_v7 = vadd.f32 %v1157_v41, %v2153_v52 }
 0x448   : > { %v1187_v11 = vadd.f32 %v1158_v7, %v2158_v2 }
 0x44a   : > { %v1709_v17 = vmul.f32 -1.442695, %v1187_v11 }
 0x44b   : > { %v1170_v18 = vpop.f32.mrf.mxu2 }
 0x44c   : > { %1818 = vpow2.f32 %v1709_v17  ;;  %v1171_v27 = vadd.f32 %v1170_v18, %v2166_v20  ;;  %v1183_v35 = vpop.f32.mrf.mxu3 }
 0x44d   : > { %v1159_v53 = vpop.f32.mrf.mxu1  ;;  %v1184_v0 = vadd.f32 %v1183_v35, %v2170_v45 }
 0x44e   : > { %v1207_v63 = vadd.f32 %v1171_v27, %v440_v23 }
 0x450   : > { %v1710_v26 = vmul.f32 -1.442695, %v1207_v63 }
 0x452   : > { %v1819_v9 = vpop.eup %1818  ;;  %1820 = vpow2.f32 %v1710_v26 }
 0x453   : > { %v1191_v15 = vadd.f32 1.0, %v1819_v9  ;;  %v1172_v30 = vpop.f32.mrf.mxu2 }
 0x454   : > { %v1185_v36 = vpop.f32.mrf.mxu3 }
 0x455   : > { %1822 = vrcp.f32 %v1191_v15  ;;  %v1203_v51 = vand.u32 2147483648, %v1191_v15  ;;  %v1201_v54 = vand.u32 2147483647, %v1191_v15  ;;  %vm1197_vm10 = vweird.f32 %v1191_v15 }
 0x457   : > { %v1204_v40 = vor.u32 1.1754944e-38, %v1203_v51  ;;  %vm1202_vm12 = vcmp.eq.f32.partialorder %v1201_v54, 8.507059e+37 }
 0x458   : > { %v1821_v43 = vpop.eup %1820 }
 0x459   : > { %v1211_v2 = vadd.f32 1.0, %v1821_v43 }
 0x45b   : > { %v1823_v55 = vpop.eup %1822  ;;  %1824 = vrcp.f32 %v1211_v2  ;;  %v1223_v60 = vand.u32 2147483648, %v1211_v2  ;;  %v1221_v56 = vand.u32 2147483647, %v1211_v2  ;;  %vm1217_vm14 = vweird.f32 %v1211_v2 }
 0x45c   : > { %v1193_v3 = vmul.f32 %v1823_v55, %v1191_v15  ;;  %vm1198_vm9 = vweird.f32 %v1823_v55 }
 0x45d   : > { %vm1199_vm11 = vmor %vm1197_vm10, %vm1198_vm9  ;;  %v1224_v13 = vor.u32 1.1754944e-38, %v1223_v60  ;;  %vm1222_vm0 = vcmp.eq.f32.partialorder %v1221_v56, 8.507059e+37 }
 0x45e   : > { %v1194_v14 = vsub.f32 1.0, %v1193_v3 }
 0x460   : > { %v1195_v22 = vmul.f32 %v1823_v55, %v1194_v14 }
 0x461   : > { %v1825_v16 = vpop.eup %1824 }
 0x462   : > { %v1213_v31 = vmul.f32 %v1825_v16, %v1211_v2  ;;  %v1196_v34 = vadd.f32 %v1823_v55, %v1195_v22  ;;  %vm1218_vm13 = vweird.f32 %v1825_v16 }
 0x463   : > { %vm1219_vm15 = vmor %vm1217_vm14, %vm1218_vm13 }
 0x464   : > { %v1214_v21 = vsub.f32 1.0, %v1213_v31  ;;  %v1200_v5 = vsel %vm1199_vm11, %v1823_v55, %v1196_v34 }
 0x465   : > { %v1205_v57 = vsel %vm1202_vm12, %v1204_v40, %v1200_v5 }
 0x466   : > { %v1215_v37 = vmul.f32 %v1825_v16, %v1214_v21  ;;  %v1227_v48 = vmul.f32 %v1205_v57, %v1184_v0 }
 0x468   : > { %v1216_v50 = vadd.f32 %v1825_v16, %v1215_v37  ;;  %v1228_v58 = vadd.f32 %v1227_v48, %v469_v33 }
 0x46a   : > { %v1220_v49 = vsel %vm1219_vm15, %v1825_v16, %v1216_v50  ;;  %1826 = vtanh.f32 %v1228_v58  ;;  %v2425_v16 = vld [vmem:[#allocation6_spill] sm:$0xff] }
 0x46b   : > { %v1225_v46 = vsel %vm1222_vm0, %v1224_v13, %v1220_v49  ;;  %v472_v31 = vadd.f32 %v2425_v16, %v2173_v62  ;;  %v2426_v49 = vld [vmem:[#allocation7_spill] sm:$0xff] }
 0x46c   : > { %v1230_v44 = vsub.f32 1.0, %v1225_v46  ;;  %v1232_v4 = vmul.f32 %v1225_v46, %v2360_v61  ;;  %v445_v46 = vadd.f32 %v2426_v49, %v2162_v10 }
 0x470   : > { %v1827_v6 = vpop.eup %1826 }
 0x471   : > { %v1231_v12 = vmul.f32 %v1827_v6, %v1230_v44 }
 0x473   : > { %v2383_v32 = vadd.f32 %v1232_v4, %v1231_v12 }
 0x475   : > { %1711 = vst [vmem:[%s2180_s17 + $0x28] sm:$0xff] %v2383_v32  ;;  %v1242_v38 = vpack.c.bf16 %v2383_v32, %v2383_v32 }
 0x477   : > { %1251 = vmatmul.bf16.vlgmr.msrb.gmra.mxu0 %v1242_v38  ;;  %1264 = vmatmul.bf16.vlgmr.msrb.gmra.mxu1 %v1242_v38 }
 0x478   : > { %1277 = vmatmul.bf16.vlgmr.msrb.gmra.mxu2 %v1242_v38 }
 0x4f4   : > { %v1252_v19 = vpop.f32.mrf.mxu0  ;;  %v1265_v24 = vpop.f32.mrf.mxu1 }
 0x4f5   : > { %v1253_v28 = vadd.f32 %v1252_v19, %v2153_v52  ;;  %v1266_v8 = vadd.f32 %v1265_v24, %v2166_v20  ;;  %v2427_v24 = vld [vmem:[#allocation4_spill] sm:$0xff] }
 0x4f7   : > { %v1282_v29 = vadd.f32 %v1253_v28, %v2424_v59  ;;  %v1302_v47 = vadd.f32 %v1266_v8, %v443_v25 }
 0x4f9   : > { %v1712_v42 = vmul.f32 -1.442695, %v1282_v29  ;;  %v1713_v61 = vmul.f32 -1.442695, %v1302_v47 }
 0x4fb   : > { %1828 = vpow2.f32 %v1712_v42  ;;  %v1278_v1 = vpop.f32.mrf.mxu2 }
 0x4fc   : > { %1830 = vpow2.f32 %v1713_v61  ;;  %v1254_v41 = vpop.f32.mrf.mxu0  ;;  %v1267_v7 = vpop.f32.mrf.mxu1  ;;  %v1279_v14 = vadd.f32 %v1278_v1, %v2170_v45 }
 0x501   : > { %v1829_v11 = vpop.eup %1828 }
 0x502   : > { %v1831_v17 = vpop.eup %1830  ;;  %v1286_v18 = vadd.f32 1.0, %v1829_v11 }
 0x503   : > { %v1306_v23 = vadd.f32 1.0, %v1831_v17  ;;  %v1280_v27 = vpop.f32.mrf.mxu2 }
 0x504   : > { %1832 = vrcp.f32 %v1286_v18  ;;  %v1298_v30 = vand.u32 2147483648, %v1286_v18  ;;  %v1296_v43 = vand.u32 2147483647, %v1286_v18  ;;  %vm1292_vm2 = vweird.f32 %v1286_v18 }
 0x505   : > { %1834 = vrcp.f32 %v1306_v23  ;;  %v1318_v34 = vand.u32 2147483648, %v1306_v23  ;;  %vm1312_vm6 = vweird.f32 %v1306_v23  ;;  %v1316_v21 = vand.u32 2147483647, %v1306_v23 }
 0x506   : > { %v1299_v3 = vor.u32 1.1754944e-38, %v1298_v30  ;;  %vm1297_vm4 = vcmp.eq.f32.partialorder %v1296_v43, 8.507059e+37 }
 0x507   : > { %v1319_v33 = vor.u32 1.1754944e-38, %v1318_v34  ;;  %vm1317_vm8 = vcmp.eq.f32.partialorder %v1316_v21, 8.507059e+37 }
 0x50a   : > { %v1833_v35 = vpop.eup %1832 }
 0x50b   : > { %v1835_v53 = vpop.eup %1834  ;;  %v1288_v63 = vmul.f32 %v1833_v35, %v1286_v18  ;;  %vm1293_vm1 = vweird.f32 %v1833_v35 }
 0x50c   : > { %v1308_v26 = vmul.f32 %v1835_v53, %v1306_v23  ;;  %vm1294_vm3 = vmor %vm1292_vm2, %vm1293_vm1  ;;  %vm1313_vm5 = vweird.f32 %v1835_v53 }
 0x50d   : > { %v1289_v9 = vsub.f32 1.0, %v1288_v63  ;;  %vm1314_vm7 = vmor %vm1312_vm6, %vm1313_vm5 }
 0x50e   : > { %v1309_v15 = vsub.f32 1.0, %v1308_v26 }
 0x50f   : > { %v1290_v36 = vmul.f32 %v1833_v35, %v1289_v9  ;;  %v2428_v9 = vld [vmem:[#allocation8_spill] sm:$0xff] }
 0x510   : > { %v1310_v2 = vmul.f32 %v1835_v53, %v1309_v15  ;;  %v474_v15 = vadd.f32 %v2428_v9, %v2173_v62 }
 0x511   : > { %v1291_v55 = vadd.f32 %v1833_v35, %v1290_v36 }
 0x512   : > { %v1311_v54 = vadd.f32 %v1835_v53, %v1310_v2 }
 0x513   : > { %v1295_v51 = vsel %vm1294_vm3, %v1833_v35, %v1291_v55 }
 0x514   : > { %v1300_v22 = vsel %vm1297_vm4, %v1299_v3, %v1295_v51  ;;  %v1315_v5 = vsel %vm1314_vm7, %v1835_v53, %v1311_v54 }
 0x515   : > { %v1322_v40 = vmul.f32 %v1300_v22, %v1279_v14  ;;  %v1320_v57 = vsel %vm1317_vm8, %v1319_v33, %v1315_v5 }
 0x516   : > { %v1325_v37 = vsub.f32 1.0, %v1320_v57  ;;  %v1327_v56 = vmul.f32 %v1320_v57, %v2383_v32 }
 0x517   : > { %v1323_v0 = vadd.f32 %v1322_v40, %v472_v31 }
 0x519   : > { %1836 = vtanh.f32 %v1323_v0 }
 0x51f   : > { %v1837_v60 = vpop.eup %1836 }
 0x520   : > { %v1326_v48 = vmul.f32 %v1837_v60, %v1325_v37 }
 0x522   : > { %v1328_v50 = vadd.f32 %v1327_v56, %v1326_v48 }
 0x524   : > { %1714 = vst [vmem:[%s2180_s17 + $0x30] sm:$0xff] %v1328_v50  ;;  %v1337_v58 = vpack.c.bf16 %v1328_v50, %v1328_v50 }
 0x526   : > { %1346 = vmatmul.bf16.vlgmr.msra.gmra.mxu3 %v1337_v58  ;;  %1359 = vmatmul.bf16.vlgmr.msra.gmra.mxu0 %v1337_v58 }
 0x527   : > { %1372 = vmatmul.bf16.vlgmr.msra.gmra.mxu1 %v1337_v58 }
 0x5a3   : > { %v1360_v13 = vpop.f32.mrf.mxu0 }
 0x5a4   : > { %v1361_v44 = vadd.f32 %v1360_v13, %v2166_v20  ;;  %v1373_v6 = vpop.f32.mrf.mxu1 }
 0x5a5   : > { %v1374_v35 = vadd.f32 %v1373_v6, %v2170_v45 }
 0x5a6   : > { %v1397_v12 = vadd.f32 %v1361_v44, %v445_v46 }
 0x5a8   : > { %v1716_v4 = vmul.f32 -1.442695, %v1397_v12 }
 0x5a9   : > { %v1347_v38 = vpop.f32.mrf.mxu3 }
 0x5aa   : > { %1838 = vpow2.f32 %v1716_v4  ;;  %v1348_v19 = vadd.f32 %v1347_v38, %v2153_v52 }
 0x5ab   : > { %v1362_v32 = vpop.f32.mrf.mxu0 }
 0x5ac   : > { %v1377_v39 = vadd.f32 %v1348_v19, %v2427_v24  ;;  %v1375_v25 = vpop.f32.mrf.mxu1 }
 0x5ae   : > { %v1715_v28 = vmul.f32 -1.442695, %v1377_v39 }
 0x5b0   : > { %v1839_v8 = vpop.eup %1838  ;;  %1840 = vpow2.f32 %v1715_v28 }
 0x5b1   : > { %v1401_v59 = vadd.f32 1.0, %v1839_v8  ;;  %v1349_v29 = vpop.f32.mrf.mxu3 }
 0x5b3   : > { %1842 = vrcp.f32 %v1401_v59  ;;  %v1413_v30 = vand.u32 2147483648, %v1401_v59  ;;  %vm1407_vm14 = vweird.f32 %v1401_v59  ;;  %v1411_v43 = vand.u32 2147483647, %v1401_v59 }
 0x5b5   : > { %v1414_v3 = vor.u32 1.1754944e-38, %v1413_v30  ;;  %vm1412_vm0 = vcmp.eq.f32.partialorder %v1411_v43, 8.507059e+37 }
 0x5b6   : > { %v1841_v10 = vpop.eup %1840 }
 0x5b7   : > { %v1381_v47 = vadd.f32 1.0, %v1841_v10 }
 0x5b9   : > { %1844 = vrcp.f32 %v1381_v47  ;;  %v1843_v20 = vpop.eup %1842  ;;  %v1393_v52 = vand.u32 2147483648, %v1381_v47  ;;  %v1391_v17 = vand.u32 2147483647, %v1381_v47  ;;  %vm1387_vm10 = vweird.f32 %v1381_v47 }
 0x5ba   : > { %v1403_v42 = vmul.f32 %v1843_v20, %v1401_v59  ;;  %vm1408_vm13 = vweird.f32 %v1843_v20 }
 0x5bb   : > { %v1394_v27 = vor.u32 1.1754944e-38, %v1393_v52  ;;  %vm1392_vm12 = vcmp.eq.f32.partialorder %v1391_v17, 8.507059e+37  ;;  %vm1409_vm15 = vmor %vm1407_vm14, %vm1408_vm13 }
 0x5bc   : > { %v1404_v41 = vsub.f32 1.0, %v1403_v42 }
 0x5be   : > { %v1405_v18 = vmul.f32 %v1843_v20, %v1404_v41 }
 0x5bf   : > { %v1845_v61 = vpop.eup %1844 }
 0x5c0   : > { %v1383_v1 = vmul.f32 %v1845_v61, %v1381_v47  ;;  %vm1388_vm9 = vweird.f32 %v1845_v61  ;;  %v1406_v63 = vadd.f32 %v1843_v20, %v1405_v18 }
 0x5c1   : > { %vm1389_vm11 = vmor %vm1387_vm10, %vm1388_vm9 }
 0x5c2   : > { %v1384_v7 = vsub.f32 1.0, %v1383_v1  ;;  %v1410_v55 = vsel %vm1409_vm15, %v1843_v20, %v1406_v63 }
 0x5c3   : > { %v1415_v45 = vsel %vm1412_vm0, %v1414_v3, %v1410_v55 }
 0x5c4   : > { %v1385_v11 = vmul.f32 %v1845_v61, %v1384_v7  ;;  %v1420_v14 = vsub.f32 1.0, %v1415_v45  ;;  %v1422_v22 = vmul.f32 %v1415_v45, %v1328_v50 }
 0x5c6   : > { %v1386_v23 = vadd.f32 %v1845_v61, %v1385_v11 }
 0x5c8   : > { %v1390_v53 = vsel %vm1389_vm11, %v1845_v61, %v1386_v23 }
 0x5c9   : > { %v1395_v26 = vsel %vm1392_vm12, %v1394_v27, %v1390_v53 }
 0x5ca   : > { %v1417_v36 = vmul.f32 %v1395_v26, %v1374_v35 }
 0x5cc   : > { %v1418_v2 = vadd.f32 %v1417_v36, %v474_v15 }
 0x5ce   : > { %1846 = vtanh.f32 %v1418_v2 }
 0x5d4   : > { %v1847_v51 = vpop.eup %1846 }
 0x5d5   : > { %v1421_v54 = vmul.f32 %v1847_v51, %v1420_v14 }
 0x5d7   : > { %v1423_v16 = vadd.f32 %v1422_v22, %v1421_v54 }
 0x5d9   : > { %1717 = vst [vmem:[%s2180_s17 + $0x38] sm:$0xff] %v1423_v16 }
 0x5da PF: > { %s15_s18 = sadd.s32 1, %s1854_s18  }
 0x5db   : > { %p12_p4 = scmp.ge.s32.totalorder %s15_s18, 4  }
 0x5dd   :  { %14 = sbr.rel (!%p12_p4) target bundleno = 1 (0x1), region = 97 }

// kernel: attentive_reader_forward.3
= control target key start
LH: loop header
LB: loop body
LE: loop exit
PB: predicated region body
PF: predicated region fallthrough
CT: control target
= control target key end

     0   :  { %s2915_s18 = smov 0   ;;  %s3843_s0 = inlined_call_operand.vmem [shape: bf16[2,128,32], index: 0, kind: input, shape index: {}]   ;;  %s3844_s1 = inlined_call_operand.vmem [shape: bf16[2,32,384], index: 1, kind: input, shape index: {}]   ;;  %s3845_s2 = inlined_call_operand.vmem [shape: bf16[2,128,384], index: 2, kind: input, shape index: {}]   ;;  %s3846_s3 = inlined_call_operand.vmem [shape: f32[2,1,384], index: 3, kind: input, shape index: {}]   ;;  %s3847_s4 = inlined_call_operand.vmem [shape: f32[2,1,384], index: 4, kind: input, shape index: {}]   ;;  %s3848_s5 = inlined_call_operand.vmem [shape: f32[2,16,8,128], index: 5, kind: output, shape index: {}]  }
   0x1 LB: > { %s2428_s19 = sadd.s32 4294967295, %s2882_s18   ;;  %p2432_p0 = scmp.ge.s32.totalorder %s2882_s18, 1  ;;  %s2882_s18 = sphi %s2915_s18, %s15_s18  }
   0x2   : > { %p225_p1 = scmp.lt.s32.totalorder %s2882_s18, 3 }
   0x4   : > { %p226_p2 = pnand %p2432_p0, %p225_p1 }
   0x6   : > { %229 = sbr.rel (%p226_p2) target bundleno = 2938 (0xb7a), region = 40 }
   0xb   : > { %p271_p3 = scmp.lt.s32.totalorder %s2428_s19, 1  ;;  %vm404_vm0 = vcmask 261120   ;;  %v2884_v59 = vmov 0  }
   0xd   : > { %s3908_s19 = smov (!%p271_p3, %s2428_s19), 1 }
   0xe   : > { %s2705_s20 = smul.u32 192, %s3908_s19  ;;  %s2664_s28 = sshll.u32 %s3908_s19, 6 }
   0xf   : > { %s2704_s24 = smul.u32 48, %s3908_s19  ;;  %s2963_s6 = scalar_lea.vmem %s3843_s0, %s2664_s28 }
  0x10   : > { %s2929_s23 = scalar_lea.vmem %s3845_s2, %s2705_s20  ;;  %v2973_v23 = vld [vmem:[%s2963_s6] sm:$0xff]  ;;  %s2706_s7 = smul.u32 3, %s3908_s19 }
  0x11   : > { %v2605_v0 = vld [vmem:[%s2929_s23 + $0xa8] sm:$0xf]  ;;  %v2702_v1 = vld [vmem:[%s2929_s23 + $0xb0] sm:$0xf0]  ;;  %v2593_v2 = vld [vmem:[%s2929_s23 + $0x90] sm:$0xf]  ;;  %s2946_s27 = scalar_lea.vmem %s3844_s1, %s2704_s24 }
  0x12   : > { %v2935_v3 = vor.u32 %v2702_v1, %v2605_v0  ;;  %v2699_v4 = vld [vmem:[%s2929_s23 + $0x98] sm:$0xf0]  ;;  %v2581_v6 = vld [vmem:[%s2929_s23 + $0x78] sm:$0xf]  ;;  %v2696_v7 = vld [vmem:[%s2929_s23 + $0x80] sm:$0xf0]  ;;  %s289_s10 = scalar_lea.vmem %s3846_s3, %s2706_s7  ;;  %s293_s13 = scalar_lea.vmem %s3847_s4, %s2706_s7 }
  0x13   : > { %v2939_v5 = vor.u32 %v2699_v4, %v2593_v2  ;;  %v2949_v8 = vor.u32 %v2696_v7, %v2581_v6  ;;  %v2485_v9 = vld [vmem:[%s2946_s27 + $0x18] sm:$0xf]  ;;  %v2678_v10 = vld [vmem:[%s2946_s27 + $0x20] sm:$0xf0]  ;;  %v2569_v11 = vld [vmem:[%s2929_s23 + $0x60] sm:$0xf] }
  0x14   : > { %798 = vmatpush.bf16.msra.mxu3 %v2935_v3  ;;  %v2693_v12 = vld [vmem:[%s2929_s23 + $0x68] sm:$0xf0]  ;;  %v2486_v13 = vor.u32 %v2678_v10, %v2485_v9  ;;  %v2607_v15 = vld [vmem:[%s2929_s23 + $0xb4] sm:$0xf0]  ;;  %v2473_v16 = vld [vmem:[%s2946_s27] sm:$0xf] }
  0x15   : > { %v2701_v14 = vld [vmem:[%s2929_s23 + $0xac] sm:$0xf]  ;;  %v2966_v18 = vor.u32 %v2693_v12, %v2569_v11  ;;  %v2557_v20 = vld [vmem:[%s2929_s23 + $0x48] sm:$0xf]  ;;  %v2690_v21 = vld [vmem:[%s2929_s23 + $0x50] sm:$0xf0] }
  0x16   : > { %435 = vmatpush.bf16.msra.mxu0 %v2486_v13  ;;  %v2675_v17 = vld [vmem:[%s2946_s27 + $0x8] sm:$0xf0]  ;;  %v2970_v22 = vor.u32 %v2701_v14, %v2607_v15  ;;  %v2698_v24 = vld [vmem:[%s2929_s23 + $0x94] sm:$0xf]  ;;  %v2595_v25 = vld [vmem:[%s2929_s23 + $0x9c] sm:$0xf0]  ;;  %v2978_v26 = vor.u32 %v2690_v21, %v2557_v20 }
  0x17   : > { %v2474_v19 = vor.u32 %v2675_v17, %v2473_v16  ;;  %v2545_v27 = vld [vmem:[%s2929_s23 + $0x30] sm:$0xf]  ;;  %v2687_v28 = vld [vmem:[%s2929_s23 + $0x38] sm:$0xf0]  ;;  %v2983_v29 = vor.u32 %v2698_v24, %v2595_v25  ;;  %v2583_v31 = vld [vmem:[%s2929_s23 + $0x84] sm:$0xf0] }
  0x18   : > { %799 = vmatpush.bf16.msra.mxu3 %v2939_v5  ;;  %v2695_v30 = vld [vmem:[%s2929_s23 + $0x7c] sm:$0xf]  ;;  %v2990_v32 = vor.u32 %v2687_v28, %v2545_v27  ;;  %v2533_v33 = vld [vmem:[%s2929_s23 + $0x18] sm:$0xf]  ;;  %v2684_v34 = vld [vmem:[%s2929_s23 + $0x20] sm:$0xf0] }
  0x19   : > { %v2995_v35 = vor.u32 %v2695_v30, %v2583_v31  ;;  %v2692_v36 = vld [vmem:[%s2929_s23 + $0x64] sm:$0xf]  ;;  %v2571_v37 = vld [vmem:[%s2929_s23 + $0x6c] sm:$0xf0]  ;;  %v3000_v38 = vor.u32 %v2684_v34, %v2533_v33  ;;  %v2521_v39 = vld [vmem:[%s2929_s23] sm:$0xf] }
  0x1a   : > { %436 = vmatpush.bf16.msra.mxu0 %v2474_v19  ;;  %v2681_v40 = vld [vmem:[%s2929_s23 + $0x8] sm:$0xf0]  ;;  %v3005_v41 = vor.u32 %v2692_v36, %v2571_v37  ;;  %v2559_v43 = vld [vmem:[%s2929_s23 + $0x54] sm:$0xf0]  ;;  %v2677_v45 = vld [vmem:[%s2946_s27 + $0x1c] sm:$0xf] }
  0x1b   : > { %v2689_v42 = vld [vmem:[%s2929_s23 + $0x4c] sm:$0xf]  ;;  %v3010_v44 = vor.u32 %v2681_v40, %v2521_v39  ;;  %v2487_v46 = vld [vmem:[%s2946_s27 + $0x24] sm:$0xf0]  ;;  %v2686_v49 = vld [vmem:[%s2929_s23 + $0x34] sm:$0xf] }
  0x1c   : > { %800 = vmatpush.bf16.msra.mxu3 %v2949_v8  ;;  %v2490_v47 = vor.u32 %v2677_v45, %v2487_v46  ;;  %v3015_v48 = vor.u32 %v2689_v42, %v2559_v43  ;;  %v2547_v50 = vld [vmem:[%s2929_s23 + $0x3c] sm:$0xf0]  ;;  %v2613_v51 = vld [vmem:[%s2929_s23 + $0xb0] sm:$0xf]  ;;  %v2703_v52 = vld [vmem:[%s2929_s23 + $0xb8] sm:$0xf0] }
  0x1d   : > { %2495 = vmatmul.msk.bf16.vlgmr.msra.gmra.mxu0 %vm404_vm0, %v2973_v23  ;;  %v2674_v53 = vld [vmem:[%s2946_s27 + $0x4] sm:$0xf]  ;;  %v2475_v54 = vld [vmem:[%s2946_s27 + $0xc] sm:$0xf0]  ;;  %v3026_v56 = vor.u32 %v2686_v49, %v2547_v50  ;;  %v2683_v57 = vld [vmem:[%s2929_s23 + $0x1c] sm:$0xf]  ;;  %v3029_v58 = vor.u32 %v2703_v52, %v2613_v51 }
  0x1e   : > { %905 = vmatpush.bf16.msrb.mxu0 %v2970_v22  ;;  %484 = vmatpush.bf16.msra.mxu1 %v2490_v47  ;;  %v2478_v55 = vor.u32 %v2674_v53, %v2475_v54  ;;  %v2535_v60 = vld [vmem:[%s2929_s23 + $0x24] sm:$0xf0]  ;;  %v2601_v61 = vld [vmem:[%s2929_s23 + $0x98] sm:$0xf]  ;;  %v2700_v62 = vld [vmem:[%s2929_s23 + $0xa0] sm:$0xf0] }
  0x1f   : > { %v3038_v63 = vor.u32 %v2683_v57, %v2535_v60  ;;  %v2680_v0 = vld [vmem:[%s2929_s23 + $0x4] sm:$0xf]  ;;  %v3041_v1 = vor.u32 %v2700_v62, %v2601_v61  ;;  %v2523_v2 = vld [vmem:[%s2929_s23 + $0xc] sm:$0xf0]  ;;  %v2589_v4 = vld [vmem:[%s2929_s23 + $0x80] sm:$0xf] }
  0x20   : > { %801 = vmatpush.bf16.msra.mxu3 %v2966_v18  ;;  %v2697_v6 = vld [vmem:[%s2929_s23 + $0x88] sm:$0xf0]  ;;  %v3051_v7 = vor.u32 %v2680_v0, %v2523_v2  ;;  %v2577_v10 = vld [vmem:[%s2929_s23 + $0x68] sm:$0xf]  ;;  %v2694_v11 = vld [vmem:[%s2929_s23 + $0x70] sm:$0xf0] }
  0x21   : > { %v3053_v9 = vor.u32 %v2697_v6, %v2589_v4  ;;  %v2493_v12 = vld [vmem:[%s2946_s27 + $0x20] sm:$0xf]  ;;  %v2679_v13 = vld [vmem:[%s2946_s27 + $0x28] sm:$0xf0]  ;;  %v3063_v14 = vor.u32 %v2694_v11, %v2577_v10  ;;  %v2565_v16 = vld [vmem:[%s2929_s23 + $0x50] sm:$0xf] }
  0x22   : > { %906 = vmatpush.bf16.msrb.mxu0 %v2983_v29  ;;  %485 = vmatpush.bf16.msra.mxu1 %v2478_v55  ;;  %v2494_v15 = vor.u32 %v2679_v13, %v2493_v12  ;;  %v2691_v17 = vld [vmem:[%s2929_s23 + $0x58] sm:$0xf0]  ;;  %v2481_v19 = vld [vmem:[%s2946_s27 + $0x8] sm:$0xf]  ;;  %v2676_v20 = vld [vmem:[%s2946_s27 + $0x10] sm:$0xf0] }
  0x23   : > { %v3072_v21 = vor.u32 %v2691_v17, %v2565_v16  ;;  %v2482_v24 = vor.u32 %v2676_v20, %v2481_v19  ;;  %v2553_v25 = vld [vmem:[%s2929_s23 + $0x38] sm:$0xf]  ;;  %v2688_v27 = vld [vmem:[%s2929_s23 + $0x40] sm:$0xf0]  ;;  %v2541_v30 = vld [vmem:[%s2929_s23 + $0x20] sm:$0xf] }
  0x24   : > { %802 = vmatpush.bf16.msra.mxu3 %v2978_v26  ;;  %533 = vmatpush.bf16.msra.mxu2 %v2494_v15  ;;  %v3079_v28 = vor.u32 %v2688_v27, %v2553_v25  ;;  %v2685_v31 = vld [vmem:[%s2929_s23 + $0x28] sm:$0xf0]  ;;  %v2529_v34 = vld [vmem:[%s2929_s23 + $0x8] sm:$0xf]  ;;  %v2682_v36 = vld [vmem:[%s2929_s23 + $0x10] sm:$0xf0] }
  0x25   : > { %2503 = vmatmul.msk.bf16.vlgmr.msra.gmra.mxu1 %vm404_vm0, %v2973_v23  ;;  %v3089_v33 = vor.u32 %v2685_v31, %v2541_v30  ;;  %v2667_v37 = vld [vmem:[%s2963_s6 + $0x8] sm:$0xff]  ;;  %v2668_v39 = vld [vmem:[%s2963_s6 + $0x10] sm:$0xff]  ;;  %v2669_v40 = vld [vmem:[%s2963_s6 + $0x18] sm:$0xff]  ;;  %s2665_s14 = sshll.u32 %s3908_s19, 7 }
  0x26   : > { %907 = vmatpush.bf16.msrb.mxu0 %v2995_v35  ;;  %918 = vmatpush.bf16.msrb.mxu1 %v3029_v58  ;;  %v2670_v42 = vld [vmem:[%s2963_s6 + $0x20] sm:$0xff]  ;;  %v2671_v43 = vld [vmem:[%s2963_s6 + $0x28] sm:$0xff]  ;;  %v2672_v57 = vld [vmem:[%s2963_s6 + $0x30] sm:$0xff]  ;;  %s3222_s17 = scalar_lea.vmem %s3848_s5, %s2665_s14 }
  0x27   : > { %v324_v45 = vld [vmem:[%s289_s10] sm:$0x7]  ;;  %v2673_v6 = vld [vmem:[%s2963_s6 + $0x38] sm:$0xff] }
  0x28   : > { %803 = vmatpush.bf16.msra.mxu3 %v2990_v32  ;;  %534 = vmatpush.bf16.msra.mxu2 %v2482_v24  ;;  %v656_v46 = vld [vmem:[%s293_s13] sm:$0x7]  ;;  %v3178_v49 = vperm.slane %v324_v45, 0  ;;  %v3188_v60 = vperm.slane %v324_v45, 1 }
  0x29   : > { %v3180_v50 = vperm.slane %v656_v46, 0  ;;  %v3190_v0 = vperm.slane %v656_v46, 1 }
  0x2a   : > { %908 = vmatpush.bf16.msrb.mxu0 %v3005_v41  ;;  %919 = vmatpush.bf16.msrb.mxu1 %v3041_v1 }
  0x2b   : > { %2511 = vmatmul.msk.bf16.vlgmr.msra.gmra.mxu2 %vm404_vm0, %v2973_v23  ;;  %v3099_v23 = vor.u32 %v2682_v36, %v2529_v34 }
  0x2c   : > { %804 = vmatpush.bf16.msra.mxu3 %v3000_v38  ;;  %987 = vmatpush.bf16.msrb.mxu2 %v2935_v3 }
  0x2d   : > { %2496 = vmatmul.msk.bf16.gmra.mxu0 %vm404_vm0, %v2667_v37 }
  0x2e   : > { %909 = vmatpush.bf16.msrb.mxu0 %v3015_v48  ;;  %920 = vmatpush.bf16.msrb.mxu1 %v3053_v9 }
  0x30   : > { %805 = vmatpush.bf16.msra.mxu3 %v3010_v44  ;;  %988 = vmatpush.bf16.msrb.mxu2 %v2939_v5 }
  0x32   : > { %910 = vmatpush.bf16.msrb.mxu0 %v3026_v56  ;;  %921 = vmatpush.bf16.msrb.mxu1 %v3063_v14 }
  0x33   : > { %806 = vmatmul.bf16.vlgmr.msra.gmra.mxu3 %v2884_v59 }
  0x34   : > { %811 = vmatpush.bf16.msrb.mxu3 %v2970_v22  ;;  %989 = vmatpush.bf16.msrb.mxu2 %v2949_v8 }
  0x35   : > { %2504 = vmatmul.msk.bf16.gmra.mxu1 %vm404_vm0, %v2667_v37 }
  0x36   : > { %911 = vmatpush.bf16.msrb.mxu0 %v3038_v63  ;;  %922 = vmatpush.bf16.msrb.mxu1 %v3072_v21 }
  0x38   : > { %812 = vmatpush.bf16.msrb.mxu3 %v2983_v29  ;;  %990 = vmatpush.bf16.msrb.mxu2 %v2966_v18 }
  0x3a   : > { %912 = vmatpush.bf16.msrb.mxu0 %v3051_v7  ;;  %923 = vmatpush.bf16.msrb.mxu1 %v3079_v28 }
  0x3b   : > { %2512 = vmatmul.msk.bf16.gmra.mxu2 %vm404_vm0, %v2667_v37 }
  0x3c   : > { %813 = vmatpush.bf16.msrb.mxu3 %v2995_v35  ;;  %991 = vmatpush.bf16.msrb.mxu2 %v2978_v26 }
  0x3d   : > { %2497 = vmatmul.msk.bf16.gmra.mxu0 %vm404_vm0, %v2668_v39 }
  0x3e   : > { %1013 = vmatpush.bf16.msra.mxu0 %v3029_v58  ;;  %924 = vmatpush.bf16.msrb.mxu1 %v3089_v33 }
  0x40   : > { %814 = vmatpush.bf16.msrb.mxu3 %v3005_v41  ;;  %992 = vmatpush.bf16.msrb.mxu2 %v2990_v32 }
  0x42   : > { %1014 = vmatpush.bf16.msra.mxu0 %v3041_v1  ;;  %925 = vmatpush.bf16.msrb.mxu1 %v3099_v23 }
  0x44   : > { %815 = vmatpush.bf16.msrb.mxu3 %v3015_v48  ;;  %993 = vmatpush.bf16.msrb.mxu2 %v3000_v38 }
  0x45   : > { %2505 = vmatmul.msk.bf16.gmra.mxu1 %vm404_vm0, %v2668_v39 }
  0x46   : > { %1015 = vmatpush.bf16.msra.mxu0 %v3053_v9  ;;  %1082 = vmatpush.bf16.msra.mxu1 %v2935_v3 }
  0x48   : > { %816 = vmatpush.bf16.msrb.mxu3 %v3026_v56  ;;  %994 = vmatpush.bf16.msrb.mxu2 %v3010_v44 }
  0x4a   : > { %1016 = vmatpush.bf16.msra.mxu0 %v3063_v14  ;;  %1083 = vmatpush.bf16.msra.mxu1 %v2939_v5 }
  0x4b   : > { %2513 = vmatmul.msk.bf16.gmra.mxu2 %vm404_vm0, %v2668_v39 }
  0x4c   : > { %817 = vmatpush.bf16.msrb.mxu3 %v3038_v63  ;;  %1095 = vmatpush.bf16.msra.mxu2 %v2970_v22 }
  0x4d   : > { %2498 = vmatmul.msk.bf16.gmra.mxu0 %vm404_vm0, %v2669_v40 }
  0x4e   : > { %1017 = vmatpush.bf16.msra.mxu0 %v3072_v21  ;;  %1084 = vmatpush.bf16.msra.mxu1 %v2949_v8 }
  0x50   : > { %818 = vmatpush.bf16.msrb.mxu3 %v3051_v7  ;;  %1096 = vmatpush.bf16.msra.mxu2 %v2983_v29 }
  0x52   : > { %1018 = vmatpush.bf16.msra.mxu0 %v3079_v28  ;;  %1085 = vmatpush.bf16.msra.mxu1 %v2966_v18 }
  0x53   : > { %819 = vmatmul.bf16.vlgmr.msrb.gmra.mxu3 %v2884_v59 }
  0x54   : > { %824 = vmatpush.bf16.msra.mxu3 %v3029_v58  ;;  %1097 = vmatpush.bf16.msra.mxu2 %v2995_v35 }
  0x55   : > { %2506 = vmatmul.msk.bf16.gmra.mxu1 %vm404_vm0, %v2669_v40 }
  0x56   : > { %1019 = vmatpush.bf16.msra.mxu0 %v3089_v33  ;;  %1086 = vmatpush.bf16.msra.mxu1 %v2978_v26 }
  0x58   : > { %825 = vmatpush.bf16.msra.mxu3 %v3041_v1  ;;  %1098 = vmatpush.bf16.msra.mxu2 %v3005_v41 }
  0x5a   : > { %1020 = vmatpush.bf16.msra.mxu0 %v3099_v23  ;;  %1087 = vmatpush.bf16.msra.mxu1 %v2990_v32 }
  0x5b   : > { %2514 = vmatmul.msk.bf16.gmra.mxu2 %vm404_vm0, %v2669_v40 }
  0x5c   : > { %826 = vmatpush.bf16.msra.mxu3 %v3053_v9  ;;  %1099 = vmatpush.bf16.msra.mxu2 %v3015_v48 }
  0x5d   : > { %2499 = vmatmul.msk.bf16.gmra.mxu0 %vm404_vm0, %v2670_v42 }
  0x5e   : > { %1088 = vmatpush.bf16.msra.mxu1 %v3000_v38 }
  0x60   : > { %827 = vmatpush.bf16.msra.mxu3 %v3063_v14  ;;  %1100 = vmatpush.bf16.msra.mxu2 %v3026_v56 }
  0x62   : > { %1089 = vmatpush.bf16.msra.mxu1 %v3010_v44 }
  0x64   : > { %828 = vmatpush.bf16.msra.mxu3 %v3072_v21  ;;  %1101 = vmatpush.bf16.msra.mxu2 %v3038_v63 }
  0x65   : > { %2507 = vmatmul.msk.bf16.gmra.mxu1 %vm404_vm0, %v2670_v42 }
  0x68   : > { %829 = vmatpush.bf16.msra.mxu3 %v3079_v28  ;;  %1102 = vmatpush.bf16.msra.mxu2 %v3051_v7 }
  0x6b   : > { %2515 = vmatmul.msk.bf16.gmra.mxu2 %vm404_vm0, %v2670_v42  ;;  %v3204_v42 = vperm.slane %v324_v45, 2 }
  0x6c   : > { %830 = vmatpush.bf16.msra.mxu3 %v3089_v33 }
  0x6d   : > { %2500 = vmatmul.msk.bf16.gmra.mxu0 %vm404_vm0, %v2671_v43 }
  0x70   : > { %831 = vmatpush.bf16.msra.mxu3 %v3099_v23 }
  0x73   : > { %832 = vmatmul.bf16.vlgmr.msra.gmra.mxu3 %v2884_v59 }
  0x74   : > { %892 = vmatpush.bf16.msrb.mxu3 %v2935_v3 }
  0x75   : > { %2508 = vmatmul.msk.bf16.gmra.mxu1 %vm404_vm0, %v2671_v43 }
  0x78   : > { %893 = vmatpush.bf16.msrb.mxu3 %v2939_v5 }
  0x7b   : > { %2516 = vmatmul.msk.bf16.gmra.mxu2 %vm404_vm0, %v2671_v43  ;;  %v3206_v43 = vperm.slane %v656_v46, 2 }
  0x7c   : > { %894 = vmatpush.bf16.msrb.mxu3 %v2949_v8 }
  0x7d   : > { %2501 = vmatmul.msk.bf16.gmra.mxu0 %vm404_vm0, %v2672_v57 }
  0x80   : > { %895 = vmatpush.bf16.msrb.mxu3 %v2966_v18 }
  0x84   : > { %896 = vmatpush.bf16.msrb.mxu3 %v2978_v26 }
  0x85   : > { %2509 = vmatmul.msk.bf16.gmra.mxu1 %vm404_vm0, %v2672_v57 }
  0x88   : > { %897 = vmatpush.bf16.msrb.mxu3 %v2990_v32 }
  0x8b   : > { %2517 = vmatmul.msk.bf16.gmra.mxu2 %vm404_vm0, %v2672_v57 }
  0x8c   : > { %898 = vmatpush.bf16.msrb.mxu3 %v3000_v38 }
  0x8d   : > { %2502 = vmatmul.msk.bf16.gmra.mxu0 %vm404_vm0, %v2673_v6 }
  0x90   : > { %899 = vmatpush.bf16.msrb.mxu3 %v3010_v44 }
  0x94   : > { %1000 = vmatpush.bf16.msra.mxu3 %v2970_v22 }
  0x95   : > { %2510 = vmatmul.msk.bf16.gmra.mxu1 %vm404_vm0, %v2673_v6 }
  0x98   : > { %1001 = vmatpush.bf16.msra.mxu3 %v2983_v29 }
  0x9a   : > { %v438_v51 = vpop.f32.mrf.mxu0 }
  0x9b   : > { %v439_v52 = vadd.f32 %v438_v51, %v3178_v49  ;;  %2518 = vmatmul.msk.bf16.gmra.mxu2 %vm404_vm0, %v2673_v6 }
  0x9c   : > { %1002 = vmatpush.bf16.msra.mxu3 %v2995_v35 }
  0xa0   : > { %1003 = vmatpush.bf16.msra.mxu3 %v3005_v41 }
  0xa2   : > { %v487_v62 = vpop.f32.mrf.mxu1  ;;  %v3202_v40 = vpop.f32.mrf.mxu0 }
  0xa3   : > { %v488_v4 = vadd.f32 %v487_v62, %v3188_v60 }
  0xa4   : > { %1004 = vmatpush.bf16.msra.mxu3 %v3015_v48 }
  0xa8   : > { %1005 = vmatpush.bf16.msra.mxu3 %v3026_v56 }
  0xaa   : > { %v3208_v51 = vpop.f32.mrf.mxu1  ;;  %v3214_v6 = vpop.f32.mrf.mxu0 }
  0xac   : > { %1006 = vmatpush.bf16.msra.mxu3 %v3038_v63 }
  0xb0   : > { %1007 = vmatpush.bf16.msra.mxu3 %v3051_v7 }
  0xb6   : > { %v807_v47 = vpop.f32.mrf.mxu3 }
  0xb7   : > { %v808_v53 = vadd.f32 %v807_v47, %v3180_v50 }
  0xb9   : > { %v837_v55 = vadd.f32 %v808_v53, %v439_v52 }
  0xbb   : > { %v2615_v59 = vmul.f32 -1.442695, %v837_v55 }
  0xbd   : > { %2716 = vpow2.f32 %v2615_v59 }
  0xbe   : > { %v809_v54 = vpop.f32.mrf.mxu3 }
  0xbf   : > { %v536_v54 = vpop.f32.mrf.mxu2 }
  0xc0   : > { %v537_v57 = vadd.f32 %v536_v54, %v3204_v42 }
  0xc3   : > { %v2717_v61 = vpop.eup %2716 }
  0xc4   : > { %v841_v2 = vadd.f32 1.0, %v2717_v61 }
  0xc6   : > { %2718 = vrcp.f32 %v841_v2  ;;  %vm847_vm1 = vweird.f32 %v841_v2  ;;  %v853_v31 = vand.u32 2147483648, %v841_v2  ;;  %v851_v36 = vand.u32 2147483647, %v841_v2 }
  0xc8   : > { %v854_v52 = vor.u32 1.1754944e-38, %v853_v31  ;;  %vm852_vm4 = vcmp.eq.f32.partialorder %v851_v36, 8.507059e+37 }
  0xcc   : > { %v2719_v16 = vpop.eup %2718 }
  0xcd   : > { %v843_v17 = vmul.f32 %v2719_v16, %v841_v2  ;;  %vm848_vm2 = vweird.f32 %v2719_v16 }
  0xce   : > { %vm3198_vm3 = vmor %vm847_vm1, %vm848_vm2 }
  0xcf   : > { %v844_v24 = vsub.f32 1.0, %v843_v17 }
  0xd1   : > { %v845_v25 = vmul.f32 %v2719_v16, %v844_v24 }
  0xd3   : > { %v846_v34 = vadd.f32 %v2719_v16, %v845_v25 }
  0xd5   : > { %v850_v53 = vsel %vm3198_vm3, %v2719_v16, %v846_v34 }
  0xd6   : > { %v820_v10 = vpop.f32.mrf.mxu3  ;;  %v855_v45 = vsel %vm852_vm4, %v854_v52, %v850_v53 }
  0xd7   : > { %v821_v11 = vadd.f32 %v820_v10, %v3190_v0 }
  0xd9   : > { %v857_v12 = vadd.f32 %v821_v11, %v488_v4  ;;  %v3216_v11 = vpop.f32.mrf.mxu1 }
  0xdb   : > { %v2616_v13 = vmul.f32 -1.442695, %v857_v12 }
  0xdd   : > { %2720 = vpow2.f32 %v2616_v13 }
  0xde   : > { %v822_v15 = vpop.f32.mrf.mxu3 }
  0xe3   : > { %v2721_v19 = vpop.eup %2720 }
  0xe4   : > { %v861_v20 = vadd.f32 1.0, %v2721_v19 }
  0xe6   : > { %2722 = vrcp.f32 %v861_v20  ;;  %vm867_vm5 = vweird.f32 %v861_v20  ;;  %v873_v61 = vand.u32 2147483648, %v861_v20  ;;  %v871_v2 = vand.u32 2147483647, %v861_v20 }
  0xe8   : > { %v874_v12 = vor.u32 1.1754944e-38, %v873_v61  ;;  %vm872_vm8 = vcmp.eq.f32.partialorder %v871_v2, 8.507059e+37 }
  0xec   : > { %v2723_v27 = vpop.eup %2722 }
  0xed   : > { %v863_v30 = vmul.f32 %v2723_v27, %v861_v20  ;;  %vm868_vm6 = vweird.f32 %v2723_v27  ;;  %v3224_v20 = vpop.f32.mrf.mxu0 }
  0xee   : > { %vm869_vm7 = vmor %vm867_vm5, %vm868_vm6 }
  0xef   : > { %v864_v37 = vsub.f32 1.0, %v863_v30 }
  0xf1   : > { %v865_v47 = vmul.f32 %v2723_v27, %v864_v37 }
  0xf3   : > { %v866_v46 = vadd.f32 %v2723_v27, %v865_v47 }
  0xf5   : > { %v870_v10 = vsel %vm869_vm7, %v2723_v27, %v866_v46  ;;  %v3228_v27 = vpop.f32.mrf.mxu1  ;;  %v3237_v31 = vpop.f32.mrf.mxu0 }
  0xf6   : > { %v833_v55 = vpop.f32.mrf.mxu3  ;;  %v875_v15 = vsel %vm872_vm8, %v874_v12, %v870_v10 }
  0xf7   : > { %v834_v59 = vadd.f32 %v833_v55, %v3206_v43  ;;  %v880_v16 = vsub.f32 1.0, %v875_v15  ;;  %v882_v24 = vmul.f32 0.0, %v875_v15 }
  0xf9   : > { %v877_v62 = vmul.f32 %v855_v45, %v834_v59 }
  0xfb   : > { %v878_v4 = vadd.f32 %v877_v62, %v537_v57 }
  0xfd   : > { %2724 = vtanh.f32 %v878_v4  ;;  %v3240_v34 = vpop.f32.mrf.mxu1  ;;  %v3250_v36 = vpop.f32.mrf.mxu0 }
  0xfe   : > { %v835_v13 = vpop.f32.mrf.mxu3 }
 0x103   : > { %v2725_v17 = vpop.eup %2724 }
 0x104   : > { %v881_v19 = vmul.f32 %v2725_v17, %v880_v16 }
 0x105   : > { %v3252_v37 = vpop.f32.mrf.mxu1  ;;  %v3260_v39 = vpop.f32.mrf.mxu0 }
 0x106   : > { %v3226_v25 = vadd.f32 %v882_v24, %v881_v19  ;;  %v490_v24 = vadd.f32 %v3208_v51, %v3188_v60 }
 0x108   : > { %884 = vst [vmem:[%s3222_s17] sm:$0xff] %v3226_v25  ;;  %v891_v30 = vpack.c.bf16 %v3226_v25, %v3226_v25 }
 0x10a   : > { %900 = vmatmul.bf16.vlgmr.msrb.gmra.mxu3 %v891_v30  ;;  %913 = vmatmul.bf16.vlgmr.msrb.gmra.mxu0 %v891_v30 }
 0x10b   : > { %926 = vmatmul.bf16.vlgmr.msrb.gmra.mxu1 %v891_v30  ;;  %1108 = vmatpush.bf16.msrb.mxu3 %v3029_v58 }
 0x10c   : > { %1177 = vmatpush.bf16.msrb.mxu0 %v2935_v3  ;;  %1190 = vmatpush.bf16.msrb.mxu1 %v2970_v22 }
 0x10d   : > { %v3263_v47 = vpop.f32.mrf.mxu1  ;;  %v3270_v52 = vpop.f32.mrf.mxu0 }
 0x10e   : > { %3851 = vst [vmem:[#allocation3_spill] sm:$0xff] %v3270_v52 }
 0x10f   : > { %1109 = vmatpush.bf16.msrb.mxu3 %v3041_v1 }
 0x110   : > { %1178 = vmatpush.bf16.msrb.mxu0 %v2939_v5  ;;  %1191 = vmatpush.bf16.msrb.mxu1 %v2983_v29 }
 0x113   : > { %1110 = vmatpush.bf16.msrb.mxu3 %v3053_v9 }
 0x114   : > { %1179 = vmatpush.bf16.msrb.mxu0 %v2949_v8  ;;  %1192 = vmatpush.bf16.msrb.mxu1 %v2995_v35 }
 0x115   : > { %v3272_v53 = vpop.f32.mrf.mxu1  ;;  %v3274_v54 = vpop.f32.mrf.mxu0 }
 0x116   : > { %3852 = vst [vmem:[#allocation4_spill] sm:$0xff] %v3272_v53 }
 0x117   : > { %1111 = vmatpush.bf16.msrb.mxu3 %v3063_v14  ;;  %3853 = vst [vmem:[#allocation5_spill] sm:$0xff] %v3274_v54 }
 0x118   : > { %1180 = vmatpush.bf16.msrb.mxu0 %v2966_v18  ;;  %1193 = vmatpush.bf16.msrb.mxu1 %v3005_v41 }
 0x11b   : > { %1112 = vmatpush.bf16.msrb.mxu3 %v3072_v21 }
 0x11c   : > { %1181 = vmatpush.bf16.msrb.mxu0 %v2978_v26  ;;  %1194 = vmatpush.bf16.msrb.mxu1 %v3015_v48 }
 0x11d   : > { %v3276_v55 = vpop.f32.mrf.mxu1  ;;  %v3278_v57 = vpop.f32.mrf.mxu0 }
 0x11e   : > { %3854 = vst [vmem:[#allocation6_spill] sm:$0xff] %v3276_v55 }
 0x11f   : > { %1113 = vmatpush.bf16.msrb.mxu3 %v3079_v28  ;;  %3855 = vst [vmem:[#allocation7_spill] sm:$0xff] %v3278_v57 }
 0x120   : > { %1182 = vmatpush.bf16.msrb.mxu0 %v2990_v32  ;;  %1195 = vmatpush.bf16.msrb.mxu1 %v3026_v56 }
 0x123   : > { %1114 = vmatpush.bf16.msrb.mxu3 %v3089_v33 }
 0x124   : > { %1183 = vmatpush.bf16.msrb.mxu0 %v3000_v38  ;;  %1196 = vmatpush.bf16.msrb.mxu1 %v3038_v63 }
 0x125   : > { %v3280_v59 = vpop.f32.mrf.mxu1  ;;  %v3282_v45 = vpop.f32.mrf.mxu0 }
 0x126   : > { %3856 = vst [vmem:[#allocation8_spill] sm:$0xff] %v3280_v59 }
 0x127   : > { %1115 = vmatpush.bf16.msrb.mxu3 %v3099_v23  ;;  %3857 = vst [vmem:[#allocation9_spill] sm:$0xff] %v3282_v45 }
 0x128   : > { %1184 = vmatpush.bf16.msrb.mxu0 %v3010_v44  ;;  %1197 = vmatpush.bf16.msrb.mxu1 %v3051_v7 }
 0x12d   : > { %v3284_v46 = vpop.f32.mrf.mxu1  ;;  %v3286_v61 = vpop.f32.mrf.mxu0 }
 0x12e   : > { %3858 = vst [vmem:[#allocation10_spill] sm:$0xff] %v3284_v46 }
 0x12f   : > { %3859 = vst [vmem:[#allocation11_spill] sm:$0xff] %v3286_v61 }
 0x135   : > { %v3288_v62 = vpop.f32.mrf.mxu1  ;;  %v3290_v2 = vpop.f32.mrf.mxu0 }
 0x136   : > { %3860 = vst [vmem:[#allocation12_spill] sm:$0xff] %v3288_v62 }
 0x137   : > { %3861 = vst [vmem:[#allocation13_spill] sm:$0xff] %v3290_v2 }
 0x13d   : > { %v3292_v4 = vpop.f32.mrf.mxu1  ;;  %v3294_v10 = vpop.f32.mrf.mxu0 }
 0x13e   : > { %3862 = vst [vmem:[#allocation14_spill] sm:$0xff] %v3292_v4 }
 0x13f   : > { %3863 = vst [vmem:[#allocation15_spill] sm:$0xff] %v3294_v10 }
 0x145   : > { %v3296_v12 = vpop.f32.mrf.mxu1  ;;  %v3298_v13 = vpop.f32.mrf.mxu0 }
 0x146   : > { %3864 = vst [vmem:[#allocation16_spill] sm:$0xff] %v3296_v12  ;;  %v441_v12 = vadd.f32 %v3202_v40, %v3178_v49 }
 0x147   : > { %3865 = vst [vmem:[#allocation17_spill] sm:$0xff] %v3298_v13 }
 0x14d   : > { %v3300_v15 = vpop.f32.mrf.mxu1  ;;  %v3302_v16 = vpop.f32.mrf.mxu0 }
 0x14e   : > { %3866 = vst [vmem:[#allocation18_spill] sm:$0xff] %v3300_v15 }
 0x14f   : > { %3867 = vst [vmem:[#allocation19_spill] sm:$0xff] %v3302_v16 }
 0x155   : > { %v3304_v17 = vpop.f32.mrf.mxu1 }
 0x156   : > { %3868 = vst [vmem:[#allocation20_spill] sm:$0xff] %v3304_v17 }
 0x187   : > { %v914_v19 = vpop.f32.mrf.mxu0 }
 0x188   : > { %v915_v30 = vadd.f32 %v914_v19, %v3190_v0  ;;  %v927_v2 = vpop.f32.mrf.mxu1 }
 0x18a   : > { %v951_v4 = vadd.f32 %v915_v30, %v490_v24 }
 0x18c   : > { %v2618_v62 = vmul.f32 -1.442695, %v951_v4 }
 0x18d   : > { %v901_v10 = vpop.f32.mrf.mxu3 }
 0x18e   : > { %2726 = vpow2.f32 %v2618_v62  ;;  %v902_v15 = vadd.f32 %v901_v10, %v3180_v50 }
 0x18f   : > { %v916_v13 = vpop.f32.mrf.mxu0 }
 0x190   : > { %v931_v16 = vadd.f32 %v902_v15, %v441_v12  ;;  %v929_v61 = vpop.f32.mrf.mxu1  ;;  %v538_v15 = vpop.f32.mrf.mxu2 }
 0x192   : > { %v2617_v17 = vmul.f32 -1.442695, %v931_v16  ;;  %v928_v16 = vadd.f32 %v927_v2, %v3206_v43 }
 0x194   : > { %v2727_v46 = vpop.eup %2726  ;;  %2728 = vpow2.f32 %v2617_v17 }
 0x195   : > { %v955_v45 = vadd.f32 1.0, %v2727_v46  ;;  %v903_v51 = vpop.f32.mrf.mxu3 }
 0x197   : > { %2730 = vrcp.f32 %v955_v45  ;;  %vm961_vm14 = vweird.f32 %v955_v45 }
 0x19a   : > { %v2729_v19 = vpop.eup %2728 }
 0x19b   : > { %v935_v57 = vadd.f32 1.0, %v2729_v19 }
 0x19d   : > { %2732 = vrcp.f32 %v935_v57  ;;  %v2731_v4 = vpop.eup %2730  ;;  %v947_v55 = vand.u32 2147483648, %v935_v57  ;;  %v945_v12 = vand.u32 2147483647, %v935_v57  ;;  %vm941_vm10 = vweird.f32 %v935_v57 }
 0x19e   : > { %v957_v24 = vmul.f32 %v2731_v4, %v955_v45  ;;  %vm962_vm13 = vweird.f32 %v2731_v4 }
 0x19f   : > { %v948_v46 = vor.u32 1.1754944e-38, %v947_v55  ;;  %vm946_vm12 = vcmp.eq.f32.partialorder %v945_v12, 8.507059e+37  ;;  %vm963_vm15 = vmor %vm961_vm14, %vm962_vm13  ;;  %v3314_v12 = vpop.f32.mrf.mxu2 }
 0x1a0   : > { %v958_v40 = vsub.f32 1.0, %v957_v24  ;;  %v539_v24 = vadd.f32 %v538_v15, %v3204_v42 }
 0x1a2   : > { %v959_v61 = vmul.f32 %v2731_v4, %v958_v40 }
 0x1a3   : > { %v2733_v30 = vpop.eup %2732 }
 0x1a4   : > { %v937_v59 = vmul.f32 %v2733_v30, %v935_v57  ;;  %vm942_vm9 = vweird.f32 %v2733_v30  ;;  %v960_v19 = vadd.f32 %v2731_v4, %v959_v61 }
 0x1a5   : > { %vm943_vm11 = vmor %vm941_vm10, %vm942_vm9 }
 0x1a6   : > { %v938_v62 = vsub.f32 1.0, %v937_v59  ;;  %v967_v59 = vand.u32 2147483648, %v955_v45  ;;  %v964_v57 = vsel %vm963_vm15, %v2731_v4, %v960_v19 }
 0x1a8   : > { %v939_v10 = vmul.f32 %v2733_v30, %v938_v62  ;;  %v965_v62 = vand.u32 2147483647, %v955_v45 }
 0x1aa   : > { %v940_v13 = vadd.f32 %v2733_v30, %v939_v10  ;;  %v968_v10 = vor.u32 1.1754944e-38, %v967_v59  ;;  %vm966_vm0 = vcmp.eq.f32.partialorder %v965_v62, 8.507059e+37 }
 0x1ac   : > { %v944_v17 = vsel %vm943_vm11, %v2733_v30, %v940_v13  ;;  %v969_v55 = vsel %vm966_vm0, %v968_v10, %v964_v57 }
 0x1ad   : > { %v949_v51 = vsel %vm946_vm12, %v948_v46, %v944_v17  ;;  %v974_v2 = vsub.f32 1.0, %v969_v55  ;;  %v976_v13 = vmul.f32 %v969_v55, %v3226_v25 }
 0x1ae   : > { %v971_v54 = vmul.f32 %v949_v51, %v928_v16 }
 0x1b0   : > { %v972_v40 = vadd.f32 %v971_v54, %v539_v24  ;;  %v3326_v54 = vpop.f32.mrf.mxu2 }
 0x1b2   : > { %2734 = vtanh.f32 %v972_v40 }
 0x1b8   : > { %v2735_v30 = vpop.eup %2734  ;;  %v3334_v25 = vpop.f32.mrf.mxu2 }
 0x1b9   : > { %v975_v61 = vmul.f32 %v2735_v30, %v974_v2  ;;  %v444_v30 = vadd.f32 %v3214_v6, %v3178_v49 }
 0x1bb   : > { %v3317_v15 = vadd.f32 %v976_v13, %v975_v61  ;;  %v493_v61 = vadd.f32 %v3216_v11, %v3188_v60 }
 0x1bd   : > { %2619 = vst [vmem:[%s3222_s17 + $0x8] sm:$0xff] %v3317_v15  ;;  %v986_v45 = vpack.c.bf16 %v3317_v15, %v3317_v15 }
 0x1bf   : > { %995 = vmatmul.bf16.vlgmr.msrb.gmra.mxu2 %v986_v45  ;;  %1008 = vmatmul.bf16.vlgmr.msra.gmra.mxu3 %v986_v45 }
 0x1c0   : > { %1021 = vmatmul.bf16.vlgmr.msra.gmra.mxu0 %v986_v45  ;;  %1203 = vmatpush.bf16.msrb.mxu2 %v3029_v58  ;;  %v3345_v4 = vpop.f32.mrf.mxu2 }
 0x1c1   : > { %1272 = vmatpush.bf16.msra.mxu3 %v2935_v3  ;;  %1285 = vmatpush.bf16.msra.mxu0 %v2970_v22 }
 0x1c4   : > { %1204 = vmatpush.bf16.msrb.mxu2 %v3041_v1 }
 0x1c5   : > { %1273 = vmatpush.bf16.msra.mxu3 %v2939_v5  ;;  %1286 = vmatpush.bf16.msra.mxu0 %v2983_v29 }
 0x1c8   : > { %1205 = vmatpush.bf16.msrb.mxu2 %v3053_v9  ;;  %v3353_v46 = vpop.f32.mrf.mxu2 }
 0x1c9   : > { %1274 = vmatpush.bf16.msra.mxu3 %v2949_v8  ;;  %1287 = vmatpush.bf16.msra.mxu0 %v2995_v35  ;;  %3869 = vst [vmem:[#allocation21_spill] sm:$0xff] %v3353_v46 }
 0x1cc   : > { %1206 = vmatpush.bf16.msrb.mxu2 %v3063_v14 }
 0x1cd   : > { %1275 = vmatpush.bf16.msra.mxu3 %v2966_v18  ;;  %1288 = vmatpush.bf16.msra.mxu0 %v3005_v41 }
 0x1d0   : > { %1207 = vmatpush.bf16.msrb.mxu2 %v3072_v21  ;;  %v3355_v16 = vpop.f32.mrf.mxu2 }
 0x1d1   : > { %1276 = vmatpush.bf16.msra.mxu3 %v2978_v26  ;;  %1289 = vmatpush.bf16.msra.mxu0 %v3015_v48  ;;  %3870 = vst [vmem:[#allocation22_spill] sm:$0xff] %v3355_v16 }
 0x1d4   : > { %1208 = vmatpush.bf16.msrb.mxu2 %v3079_v28 }
 0x1d5   : > { %1277 = vmatpush.bf16.msra.mxu3 %v2990_v32  ;;  %1290 = vmatpush.bf16.msra.mxu0 %v3026_v56 }
 0x1d8   : > { %1209 = vmatpush.bf16.msrb.mxu2 %v3089_v33  ;;  %v3357_v17 = vpop.f32.mrf.mxu2 }
 0x1d9   : > { %1278 = vmatpush.bf16.msra.mxu3 %v3000_v38  ;;  %1291 = vmatpush.bf16.msra.mxu0 %v3038_v63  ;;  %3871 = vst [vmem:[#allocation23_spill] sm:$0xff] %v3357_v17 }
 0x1dc   : > { %1210 = vmatpush.bf16.msrb.mxu2 %v3099_v23 }
 0x1dd   : > { %1279 = vmatpush.bf16.msra.mxu3 %v3010_v44  ;;  %1292 = vmatpush.bf16.msra.mxu0 %v3051_v7 }
 0x1e0   : > { %v3359_v51 = vpop.f32.mrf.mxu2 }
 0x1e1   : > { %3872 = vst [vmem:[#allocation24_spill] sm:$0xff] %v3359_v51 }
 0x1e8   : > { %v3361_v19 = vpop.f32.mrf.mxu2 }
 0x1e9   : > { %3873 = vst [vmem:[#allocation25_spill] sm:$0xff] %v3361_v19 }
 0x1f0   : > { %v3363_v24 = vpop.f32.mrf.mxu2 }
 0x1f1   : > { %3874 = vst [vmem:[#allocation26_spill] sm:$0xff] %v3363_v24 }
 0x1f8   : > { %v3365_v59 = vpop.f32.mrf.mxu2 }
 0x1f9   : > { %3875 = vst [vmem:[#allocation27_spill] sm:$0xff] %v3365_v59 }
 0x200   : > { %v3367_v62 = vpop.f32.mrf.mxu2 }
 0x201   : > { %3876 = vst [vmem:[#allocation28_spill] sm:$0xff] %v3367_v62 }
 0x208   : > { %v3369_v40 = vpop.f32.mrf.mxu2 }
 0x209   : > { %3877 = vst [vmem:[#allocation29_spill] sm:$0xff] %v3369_v40 }
 0x210   : > { %v3371_v57 = vpop.f32.mrf.mxu2 }
 0x211   : > { %3878 = vst [vmem:[#allocation30_spill] sm:$0xff] %v3371_v57 }
 0x23d   : > { %v1022_v10 = vpop.f32.mrf.mxu0 }
 0x242   : > { %v996_v55 = vpop.f32.mrf.mxu2  ;;  %v1009_v2 = vpop.f32.mrf.mxu3 }
 0x243   : > { %v997_v13 = vadd.f32 %v996_v55, %v3180_v50  ;;  %v1010_v45 = vadd.f32 %v1009_v2, %v3190_v0 }
 0x245   : > { %v1026_v59 = vadd.f32 %v997_v13, %v444_v30  ;;  %v1046_v24 = vadd.f32 %v1010_v45, %v493_v61  ;;  %v1024_v62 = vpop.f32.mrf.mxu0  ;;  %v542_v13 = vadd.f32 %v3314_v12, %v3204_v42 }
 0x247   : > { %v2620_v19 = vmul.f32 -1.442695, %v1026_v59  ;;  %v2621_v40 = vmul.f32 -1.442695, %v1046_v24 }
 0x249   : > { %2736 = vpow2.f32 %v2620_v19 }
 0x24a   : > { %2738 = vpow2.f32 %v2621_v40  ;;  %v998_v57 = vpop.f32.mrf.mxu2  ;;  %v1011_v51 = vpop.f32.mrf.mxu3 }
 0x24f   : > { %v2737_v17 = vpop.eup %2736 }
 0x250   : > { %v2739_v16 = vpop.eup %2738  ;;  %v1030_v53 = vadd.f32 1.0, %v2737_v17  ;;  %v1023_v17 = vadd.f32 %v1022_v10, %v3206_v43 }
 0x251   : > { %v1050_v6 = vadd.f32 1.0, %v2739_v16 }
 0x252   : > { %2740 = vrcp.f32 %v1030_v53  ;;  %v1042_v30 = vand.u32 2147483648, %v1030_v53  ;;  %v1040_v24 = vand.u32 2147483647, %v1030_v53  ;;  %vm1036_vm2 = vweird.f32 %v1030_v53 }
 0x253   : > { %2742 = vrcp.f32 %v1050_v6  ;;  %vm1056_vm6 = vweird.f32 %v1050_v6 }
 0x254   : > { %v1043_v51 = vor.u32 1.1754944e-38, %v1042_v30  ;;  %vm1041_vm4 = vcmp.eq.f32.partialorder %v1040_v24, 8.507059e+37 }
 0x258   : > { %v2741_v11 = vpop.eup %2740 }
 0x259   : > { %v2743_v52 = vpop.eup %2742  ;;  %v1032_v55 = vmul.f32 %v2741_v11, %v1030_v53  ;;  %vm1037_vm1 = vweird.f32 %v2741_v11 }
 0x25a   : > { %v1052_v46 = vmul.f32 %v2743_v52, %v1050_v6  ;;  %vm1038_vm3 = vmor %vm1036_vm2, %vm1037_vm1  ;;  %vm1057_vm5 = vweird.f32 %v2743_v52 }
 0x25b   : > { %v1033_v2 = vsub.f32 1.0, %v1032_v55  ;;  %v1060_v55 = vand.u32 2147483647, %v1050_v6  ;;  %vm1058_vm7 = vmor %vm1056_vm6, %vm1057_vm5 }
 0x25c   : > { %v1053_v61 = vsub.f32 1.0, %v1052_v46  ;;  %v1062_v46 = vand.u32 2147483648, %v1050_v6 }
 0x25d   : > { %v1034_v62 = vmul.f32 %v2741_v11, %v1033_v2  ;;  %vm1061_vm8 = vcmp.eq.f32.partialorder %v1060_v55, 8.507059e+37 }
 0x25e   : > { %v1054_v19 = vmul.f32 %v2743_v52, %v1053_v61  ;;  %v1063_v61 = vor.u32 1.1754944e-38, %v1062_v46 }
 0x25f   : > { %v1035_v59 = vadd.f32 %v2741_v11, %v1034_v62 }
 0x260   : > { %v1055_v57 = vadd.f32 %v2743_v52, %v1054_v19 }
 0x261   : > { %v1039_v16 = vsel %vm1038_vm3, %v2741_v11, %v1035_v59 }
 0x262   : > { %v1044_v40 = vsel %vm1041_vm4, %v1043_v51, %v1039_v16  ;;  %v1059_v53 = vsel %vm1058_vm7, %v2743_v52, %v1055_v57  ;;  %v495_v16 = vadd.f32 %v3228_v27, %v3188_v60 }
 0x263   : > { %v1066_v45 = vmul.f32 %v1044_v40, %v1023_v17  ;;  %v1064_v10 = vsel %vm1061_vm8, %v1063_v61, %v1059_v53 }
 0x264   : > { %v1069_v11 = vsub.f32 1.0, %v1064_v10  ;;  %v1071_v24 = vmul.f32 %v1064_v10, %v3317_v15  ;;  %v446_v15 = vadd.f32 %v3224_v20, %v3178_v49 }
 0x265   : > { %v1067_v2 = vadd.f32 %v1066_v45, %v542_v13 }
 0x267   : > { %2744 = vtanh.f32 %v1067_v2 }
 0x26d   : > { %v2745_v30 = vpop.eup %2744 }
 0x26e   : > { %v1070_v62 = vmul.f32 %v2745_v30, %v1069_v11 }
 0x270   : > { %v3383_v19 = vadd.f32 %v1071_v24, %v1070_v62 }
 0x272   : > { %2622 = vst [vmem:[%s3222_s17 + $0x10] sm:$0xff] %v3383_v19  ;;  %v1081_v12 = vpack.c.bf16 %v3383_v19, %v3383_v19 }
 0x274   : > { %1090 = vmatmul.bf16.vlgmr.msra.gmra.mxu1 %v1081_v12  ;;  %1103 = vmatmul.bf16.vlgmr.msra.gmra.mxu2 %v1081_v12 }
 0x275   : > { %1116 = vmatmul.bf16.vlgmr.msrb.gmra.mxu3 %v1081_v12  ;;  %1298 = vmatpush.bf16.msra.mxu1 %v3029_v58 }
 0x276   : > { %1367 = vmatpush.bf16.msra.mxu2 %v2935_v3  ;;  %1380 = vmatpush.bf16.msrb.mxu3 %v2970_v22 }
 0x279   : > { %1299 = vmatpush.bf16.msra.mxu1 %v3041_v1 }
 0x27a   : > { %1368 = vmatpush.bf16.msra.mxu2 %v2939_v5  ;;  %1381 = vmatpush.bf16.msrb.mxu3 %v2983_v29 }
 0x27d   : > { %1300 = vmatpush.bf16.msra.mxu1 %v3053_v9 }
 0x27e   : > { %1369 = vmatpush.bf16.msra.mxu2 %v2949_v8  ;;  %1382 = vmatpush.bf16.msrb.mxu3 %v2995_v35 }
 0x281   : > { %1301 = vmatpush.bf16.msra.mxu1 %v3063_v14 }
 0x282   : > { %1370 = vmatpush.bf16.msra.mxu2 %v2966_v18  ;;  %1383 = vmatpush.bf16.msrb.mxu3 %v3005_v41 }
 0x285   : > { %1302 = vmatpush.bf16.msra.mxu1 %v3072_v21 }
 0x286   : > { %1371 = vmatpush.bf16.msra.mxu2 %v2978_v26  ;;  %1384 = vmatpush.bf16.msrb.mxu3 %v3015_v48 }
 0x289   : > { %1303 = vmatpush.bf16.msra.mxu1 %v3079_v28 }
 0x28a   : > { %1372 = vmatpush.bf16.msra.mxu2 %v2990_v32  ;;  %1385 = vmatpush.bf16.msrb.mxu3 %v3026_v56 }
 0x28d   : > { %1304 = vmatpush.bf16.msra.mxu1 %v3089_v33 }
 0x28e   : > { %1373 = vmatpush.bf16.msra.mxu2 %v3000_v38  ;;  %1386 = vmatpush.bf16.msrb.mxu3 %v3038_v63 }
 0x291   : > { %1305 = vmatpush.bf16.msra.mxu1 %v3099_v23 }
 0x292   : > { %1374 = vmatpush.bf16.msra.mxu2 %v3010_v44  ;;  %1387 = vmatpush.bf16.msrb.mxu3 %v3051_v7 }
 0x2f1   : > { %v1091_v52 = vpop.f32.mrf.mxu1 }
 0x2f2   : > { %v1092_v6 = vadd.f32 %v1091_v52, %v3180_v50 }
 0x2f4   : > { %v1121_v59 = vadd.f32 %v1092_v6, %v446_v15 }
 0x2f6   : > { %v2623_v51 = vmul.f32 -1.442695, %v1121_v59 }
 0x2f7   : > { %v1104_v17 = vpop.f32.mrf.mxu2 }
 0x2f8   : > { %2746 = vpow2.f32 %v2623_v51  ;;  %v1105_v40 = vadd.f32 %v1104_v17, %v3190_v0  ;;  %v1117_v57 = vpop.f32.mrf.mxu3 }
 0x2f9   : > { %v1093_v13 = vpop.f32.mrf.mxu1  ;;  %v1118_v17 = vadd.f32 %v1117_v57, %v3206_v43 }
 0x2fa   : > { %v1141_v45 = vadd.f32 %v1105_v40, %v495_v16  ;;  %v544_v40 = vadd.f32 %v3326_v54, %v3204_v42 }
 0x2fc   : > { %v2624_v46 = vmul.f32 -1.442695, %v1141_v45 }
 0x2fe   : > { %v2747_v55 = vpop.eup %2746  ;;  %2748 = vpow2.f32 %v2624_v46 }
 0x2ff   : > { %v1125_v2 = vadd.f32 1.0, %v2747_v55  ;;  %v1106_v53 = vpop.f32.mrf.mxu2 }
 0x300   : > { %v1119_v20 = vpop.f32.mrf.mxu3 }
 0x301   : > { %2750 = vrcp.f32 %v1125_v2  ;;  %v1137_v27 = vand.u32 2147483648, %v1125_v2  ;;  %v1135_v12 = vand.u32 2147483647, %v1125_v2  ;;  %vm1131_vm10 = vweird.f32 %v1125_v2 }
 0x303   : > { %v1138_v59 = vor.u32 1.1754944e-38, %v1137_v27  ;;  %vm1136_vm12 = vcmp.eq.f32.partialorder %v1135_v12, 8.507059e+37 }
 0x304   : > { %v2749_v61 = vpop.eup %2748 }
 0x305   : > { %v1145_v10 = vadd.f32 1.0, %v2749_v61 }
 0x307   : > { %v2751_v11 = vpop.eup %2750  ;;  %2752 = vrcp.f32 %v1145_v10  ;;  %v1157_v46 = vand.u32 2147483648, %v1145_v10  ;;  %v1155_v53 = vand.u32 2147483647, %v1145_v10  ;;  %vm1151_vm14 = vweird.f32 %v1145_v10 }
 0x308   : > { %v1127_v30 = vmul.f32 %v2751_v11, %v1125_v2  ;;  %vm1132_vm9 = vweird.f32 %v2751_v11 }
 0x309   : > { %vm1133_vm11 = vmor %vm1131_vm10, %vm1132_vm9  ;;  %v1158_v61 = vor.u32 1.1754944e-38, %v1157_v46  ;;  %vm1156_vm0 = vcmp.eq.f32.partialorder %v1155_v53, 8.507059e+37 }
 0x30a   : > { %v1128_v62 = vsub.f32 1.0, %v1127_v30 }
 0x30c   : > { %v1129_v24 = vmul.f32 %v2751_v11, %v1128_v62 }
 0x30d   : > { %v2753_v52 = vpop.eup %2752 }
 0x30e   : > { %v1147_v15 = vmul.f32 %v2753_v52, %v1145_v10  ;;  %v1130_v6 = vadd.f32 %v2751_v11, %v1129_v24  ;;  %vm1152_vm13 = vweird.f32 %v2753_v52 }
 0x30f   : > { %vm1153_vm15 = vmor %vm1151_vm14, %vm1152_vm13 }
 0x310   : > { %v1148_v51 = vsub.f32 1.0, %v1147_v15  ;;  %v1134_v16 = vsel %vm1133_vm11, %v2751_v11, %v1130_v6  ;;  %v498_v15 = vadd.f32 %v3240_v34, %v3188_v60 }
 0x311   : > { %v1139_v13 = vsel %vm1136_vm12, %v1138_v59, %v1134_v16 }
 0x312   : > { %v1149_v45 = vmul.f32 %v2753_v52, %v1148_v51  ;;  %v1161_v55 = vmul.f32 %v1139_v13, %v1118_v17 }
 0x314   : > { %v1150_v20 = vadd.f32 %v2753_v52, %v1149_v45  ;;  %v1162_v2 = vadd.f32 %v1161_v55, %v544_v40 }
 0x316   : > { %v1154_v30 = vsel %vm1153_vm15, %v2753_v52, %v1150_v20  ;;  %2754 = vtanh.f32 %v1162_v2  ;;  %v449_v52 = vadd.f32 %v3237_v31, %v3178_v49 }
 0x317   : > { %v1159_v57 = vsel %vm1156_vm0, %v1158_v61, %v1154_v30 }
 0x318   : > { %v1164_v11 = vsub.f32 1.0, %v1159_v57  ;;  %v1166_v54 = vmul.f32 %v1159_v57, %v3383_v19 }
 0x31c   : > { %v2755_v62 = vpop.eup %2754 }
 0x31d   : > { %v1165_v27 = vmul.f32 %v2755_v62, %v1164_v11 }
 0x31f   : > { %v3423_v24 = vadd.f32 %v1166_v54, %v1165_v27 }
 0x321   : > { %2625 = vst [vmem:[%s3222_s17 + $0x18] sm:$0xff] %v3423_v24  ;;  %v1176_v10 = vpack.c.bf16 %v3423_v24, %v3423_v24 }
 0x323   : > { %1185 = vmatmul.bf16.vlgmr.msrb.gmra.mxu0 %v1176_v10  ;;  %1198 = vmatmul.bf16.vlgmr.msrb.gmra.mxu1 %v1176_v10 }
 0x324   : > { %1211 = vmatmul.bf16.vlgmr.msrb.gmra.mxu2 %v1176_v10  ;;  %1393 = vmatpush.bf16.msrb.mxu0 %v3029_v58 }
 0x325   : > { %1462 = vmatpush.bf16.msrb.mxu1 %v2935_v3  ;;  %1475 = vmatpush.bf16.msrb.mxu2 %v2970_v22 }
 0x328   : > { %1394 = vmatpush.bf16.msrb.mxu0 %v3041_v1 }
 0x329   : > { %1463 = vmatpush.bf16.msrb.mxu1 %v2939_v5  ;;  %1476 = vmatpush.bf16.msrb.mxu2 %v2983_v29 }
 0x32c   : > { %1395 = vmatpush.bf16.msrb.mxu0 %v3053_v9 }
 0x32d   : > { %1464 = vmatpush.bf16.msrb.mxu1 %v2949_v8  ;;  %1477 = vmatpush.bf16.msrb.mxu2 %v2995_v35 }
 0x330   : > { %1396 = vmatpush.bf16.msrb.mxu0 %v3063_v14 }
 0x331   : > { %1465 = vmatpush.bf16.msrb.mxu1 %v2966_v18  ;;  %1478 = vmatpush.bf16.msrb.mxu2 %v3005_v41 }
 0x334   : > { %1397 = vmatpush.bf16.msrb.mxu0 %v3072_v21 }
 0x335   : > { %1466 = vmatpush.bf16.msrb.mxu1 %v2978_v26  ;;  %1479 = vmatpush.bf16.msrb.mxu2 %v3015_v48 }
 0x338   : > { %1398 = vmatpush.bf16.msrb.mxu0 %v3079_v28 }
 0x339   : > { %1467 = vmatpush.bf16.msrb.mxu1 %v2990_v32  ;;  %1480 = vmatpush.bf16.msrb.mxu2 %v3026_v56 }
 0x33c   : > { %1399 = vmatpush.bf16.msrb.mxu0 %v3089_v33 }
 0x33d   : > { %1468 = vmatpush.bf16.msrb.mxu1 %v3000_v38  ;;  %1481 = vmatpush.bf16.msrb.mxu2 %v3038_v63 }
 0x340   : > { %1400 = vmatpush.bf16.msrb.mxu0 %v3099_v23 }
 0x341   : > { %1469 = vmatpush.bf16.msrb.mxu1 %v3010_v44  ;;  %1482 = vmatpush.bf16.msrb.mxu2 %v3051_v7 }
 0x3a0   : > { %v1186_v19 = vpop.f32.mrf.mxu0  ;;  %v1199_v12 = vpop.f32.mrf.mxu1 }
 0x3a1   : > { %v1187_v6 = vadd.f32 %v1186_v19, %v3180_v50  ;;  %v1200_v59 = vadd.f32 %v1199_v12, %v3190_v0 }
 0x3a3   : > { %v1216_v51 = vadd.f32 %v1187_v6, %v449_v52  ;;  %v1236_v17 = vadd.f32 %v1200_v59, %v498_v15 }
 0x3a5   : > { %v2626_v16 = vmul.f32 -1.442695, %v1216_v51  ;;  %v2627_v40 = vmul.f32 -1.442695, %v1236_v17  ;;  %v547_v17 = vadd.f32 %v3334_v25, %v3204_v42 }
 0x3a7   : > { %2756 = vpow2.f32 %v2626_v16  ;;  %v1212_v13 = vpop.f32.mrf.mxu2 }
 0x3a8   : > { %2758 = vpow2.f32 %v2627_v40  ;;  %v1188_v45 = vpop.f32.mrf.mxu0  ;;  %v1201_v46 = vpop.f32.mrf.mxu1  ;;  %v1213_v15 = vadd.f32 %v1212_v13, %v3206_v43 }
 0x3ad   : > { %v2757_v55 = vpop.eup %2756 }
 0x3ae   : > { %v2759_v53 = vpop.eup %2758  ;;  %v1220_v20 = vadd.f32 1.0, %v2757_v55 }
 0x3af   : > { %v1240_v31 = vadd.f32 1.0, %v2759_v53  ;;  %v1214_v2 = vpop.f32.mrf.mxu2 }
 0x3b0   : > { %2760 = vrcp.f32 %v1220_v20  ;;  %v1232_v27 = vand.u32 2147483648, %v1220_v20  ;;  %v1230_v10 = vand.u32 2147483647, %v1220_v20  ;;  %vm1226_vm2 = vweird.f32 %v1220_v20 }
 0x3b1   : > { %2762 = vrcp.f32 %v1240_v31  ;;  %v1252_v16 = vand.u32 2147483648, %v1240_v31  ;;  %vm1246_vm6 = vweird.f32 %v1240_v31  ;;  %v1250_v45 = vand.u32 2147483647, %v1240_v31 }
 0x3b2   : > { %v1233_v52 = vor.u32 1.1754944e-38, %v1232_v27  ;;  %vm1231_vm4 = vcmp.eq.f32.partialorder %v1230_v10, 8.507059e+37  ;;  %v451_v10 = vadd.f32 %v3250_v36, %v3178_v49 }
 0x3b3   : > { %v1253_v53 = vor.u32 1.1754944e-38, %v1252_v16  ;;  %vm1251_vm8 = vcmp.eq.f32.partialorder %v1250_v45, 8.507059e+37 }
 0x3b6   : > { %v2761_v34 = vpop.eup %2760 }
 0x3b7   : > { %v2763_v61 = vpop.eup %2762  ;;  %v1222_v30 = vmul.f32 %v2761_v34, %v1220_v20  ;;  %vm1227_vm1 = vweird.f32 %v2761_v34 }
 0x3b8   : > { %v1242_v57 = vmul.f32 %v2763_v61, %v1240_v31  ;;  %vm1228_vm3 = vmor %vm1226_vm2, %vm1227_vm1  ;;  %vm1247_vm5 = vweird.f32 %v2763_v61  ;;  %v500_v31 = vadd.f32 %v3252_v37, %v3188_v60 }
 0x3b9   : > { %v1223_v11 = vsub.f32 1.0, %v1222_v30  ;;  %vm1248_vm7 = vmor %vm1246_vm6, %vm1247_vm5 }
 0x3ba   : > { %v1243_v62 = vsub.f32 1.0, %v1242_v57 }
 0x3bb   : > { %v1224_v54 = vmul.f32 %v2761_v34, %v1223_v11 }
 0x3bc   : > { %v1244_v19 = vmul.f32 %v2763_v61, %v1243_v62 }
 0x3bd   : > { %v1225_v12 = vadd.f32 %v2761_v34, %v1224_v54 }
 0x3be   : > { %v1245_v51 = vadd.f32 %v2763_v61, %v1244_v19 }
 0x3bf   : > { %v1229_v6 = vsel %vm1228_vm3, %v2761_v34, %v1225_v12 }
 0x3c0   : > { %v1234_v59 = vsel %vm1231_vm4, %v1233_v52, %v1229_v6  ;;  %v1249_v55 = vsel %vm1248_vm7, %v2763_v61, %v1245_v51 }
 0x3c1   : > { %v1256_v40 = vmul.f32 %v1234_v59, %v1213_v15  ;;  %v1254_v13 = vsel %vm1251_vm8, %v1253_v53, %v1249_v55 }
 0x3c2   : > { %v1259_v20 = vsub.f32 1.0, %v1254_v13  ;;  %v1261_v30 = vmul.f32 %v1254_v13, %v3423_v24 }
 0x3c3   : > { %v1257_v46 = vadd.f32 %v1256_v40, %v547_v17 }
 0x3c5   : > { %2764 = vtanh.f32 %v1257_v46 }
 0x3cb   : > { %v2765_v2 = vpop.eup %2764 }
 0x3cc   : > { %v1260_v34 = vmul.f32 %v2765_v2, %v1259_v20 }
 0x3ce   : > { %v3463_v57 = vadd.f32 %v1261_v30, %v1260_v34 }
 0x3d0   : > { %2628 = vst [vmem:[%s3222_s17 + $0x20] sm:$0xff] %v3463_v57  ;;  %v1271_v25 = vpack.c.bf16 %v3463_v57, %v3463_v57 }
 0x3d2   : > { %1280 = vmatmul.bf16.vlgmr.msra.gmra.mxu3 %v1271_v25  ;;  %1293 = vmatmul.bf16.vlgmr.msra.gmra.mxu0 %v1271_v25 }
 0x3d3   : > { %1306 = vmatmul.bf16.vlgmr.msra.gmra.mxu1 %v1271_v25  ;;  %1488 = vmatpush.bf16.msra.mxu3 %v3029_v58 }
 0x3d4   : > { %1557 = vmatpush.bf16.msra.mxu0 %v2935_v3  ;;  %1570 = vmatpush.bf16.msra.mxu1 %v2970_v22 }
 0x3d7   : > { %1489 = vmatpush.bf16.msra.mxu3 %v3041_v1 }
 0x3d8   : > { %1558 = vmatpush.bf16.msra.mxu0 %v2939_v5  ;;  %1571 = vmatpush.bf16.msra.mxu1 %v2983_v29 }
 0x3db   : > { %1490 = vmatpush.bf16.msra.mxu3 %v3053_v9 }
 0x3dc   : > { %1559 = vmatpush.bf16.msra.mxu0 %v2949_v8  ;;  %1572 = vmatpush.bf16.msra.mxu1 %v2995_v35 }
 0x3df   : > { %1491 = vmatpush.bf16.msra.mxu3 %v3063_v14 }
 0x3e0   : > { %1560 = vmatpush.bf16.msra.mxu0 %v2966_v18  ;;  %1573 = vmatpush.bf16.msra.mxu1 %v3005_v41 }
 0x3e3   : > { %1492 = vmatpush.bf16.msra.mxu3 %v3072_v21 }
 0x3e4   : > { %1561 = vmatpush.bf16.msra.mxu0 %v2978_v26  ;;  %1574 = vmatpush.bf16.msra.mxu1 %v3015_v48 }
 0x3e7   : > { %1493 = vmatpush.bf16.msra.mxu3 %v3079_v28 }
 0x3e8   : > { %1562 = vmatpush.bf16.msra.mxu0 %v2990_v32  ;;  %1575 = vmatpush.bf16.msra.mxu1 %v3026_v56 }
 0x3eb   : > { %1494 = vmatpush.bf16.msra.mxu3 %v3089_v33 }
 0x3ec   : > { %1563 = vmatpush.bf16.msra.mxu0 %v3000_v38  ;;  %1576 = vmatpush.bf16.msra.mxu1 %v3038_v63 }
 0x3ef   : > { %1495 = vmatpush.bf16.msra.mxu3 %v3099_v23 }
 0x3f0   : > { %1564 = vmatpush.bf16.msra.mxu0 %v3010_v44  ;;  %1577 = vmatpush.bf16.msra.mxu1 %v3051_v7 }
 0x44f   : > { %v1294_v24 = vpop.f32.mrf.mxu0 }
 0x450   : > { %v1295_v61 = vadd.f32 %v1294_v24, %v3190_v0  ;;  %v1307_v11 = vpop.f32.mrf.mxu1 }
 0x451   : > { %v1308_v24 = vadd.f32 %v1307_v11, %v3206_v43 }
 0x452   : > { %v1331_v62 = vadd.f32 %v1295_v61, %v500_v31 }
 0x454   : > { %v2630_v27 = vmul.f32 -1.442695, %v1331_v62 }
 0x455   : > { %v1281_v54 = vpop.f32.mrf.mxu3 }
 0x456   : > { %2766 = vpow2.f32 %v2630_v27  ;;  %v1282_v19 = vadd.f32 %v1281_v54, %v3180_v50  ;;  %v549_v27 = vadd.f32 %v3345_v4, %v3204_v42 }
 0x457   : > { %v1296_v12 = vpop.f32.mrf.mxu0 }
 0x458   : > { %v1311_v52 = vadd.f32 %v1282_v19, %v451_v10  ;;  %v1309_v15 = vpop.f32.mrf.mxu1 }
 0x45a   : > { %v2629_v6 = vmul.f32 -1.442695, %v1311_v52 }
 0x45c   : > { %v2767_v59 = vpop.eup %2766  ;;  %2768 = vpow2.f32 %v2629_v6 }
 0x45d   : > { %v1335_v51 = vadd.f32 1.0, %v2767_v59  ;;  %v1283_v37 = vpop.f32.mrf.mxu3 }
 0x45f   : > { %2770 = vrcp.f32 %v1335_v51  ;;  %v1347_v54 = vand.u32 2147483648, %v1335_v51  ;;  %vm1341_vm14 = vweird.f32 %v1335_v51  ;;  %v1345_v19 = vand.u32 2147483647, %v1335_v51 }
 0x461   : > { %v1348_v15 = vor.u32 1.1754944e-38, %v1347_v54  ;;  %vm1346_vm0 = vcmp.eq.f32.partialorder %v1345_v19, 8.507059e+37 }
 0x462   : > { %v2769_v17 = vpop.eup %2768 }
 0x463   : > { %v1315_v16 = vadd.f32 1.0, %v2769_v17 }
 0x465   : > { %2772 = vrcp.f32 %v1315_v16  ;;  %v2771_v40 = vpop.eup %2770  ;;  %v1327_v13 = vand.u32 2147483648, %v1315_v16  ;;  %v1325_v2 = vand.u32 2147483647, %v1315_v16  ;;  %vm1321_vm10 = vweird.f32 %v1315_v16 }
 0x466   : > { %v1337_v45 = vmul.f32 %v2771_v40, %v1335_v51  ;;  %vm1342_vm13 = vweird.f32 %v2771_v40 }
 0x467   : > { %v1328_v25 = vor.u32 1.1754944e-38, %v1327_v13  ;;  %vm1326_vm12 = vcmp.eq.f32.partialorder %v1325_v2, 8.507059e+37  ;;  %vm1343_vm15 = vmor %vm1341_vm14, %vm1342_vm13 }
 0x468   : > { %v1338_v36 = vsub.f32 1.0, %v1337_v45  ;;  %v454_v45 = vadd.f32 %v3260_v39, %v3178_v49 }
 0x46a   : > { %v1339_v34 = vmul.f32 %v2771_v40, %v1338_v36 }
 0x46b   : > { %v2773_v46 = vpop.eup %2772 }
 0x46c   : > { %v1317_v55 = vmul.f32 %v2773_v46, %v1315_v16  ;;  %vm1322_vm9 = vweird.f32 %v2773_v46  ;;  %v1340_v62 = vadd.f32 %v2771_v40, %v1339_v34 }
 0x46d   : > { %vm1323_vm11 = vmor %vm1321_vm10, %vm1322_vm9 }
 0x46e   : > { %v1318_v53 = vsub.f32 1.0, %v1317_v55  ;;  %v1344_v52 = vsel %vm1343_vm15, %v2771_v40, %v1340_v62 }
 0x46f   : > { %v1349_v11 = vsel %vm1346_vm0, %v1348_v15, %v1344_v52 }
 0x470   : > { %v1319_v20 = vmul.f32 %v2773_v46, %v1318_v53  ;;  %v1354_v6 = vsub.f32 1.0, %v1349_v11  ;;  %v1356_v17 = vmul.f32 %v1349_v11, %v3463_v57 }
 0x472   : > { %v1320_v30 = vadd.f32 %v2773_v46, %v1319_v20 }
 0x474   : > { %v1324_v31 = vsel %vm1323_vm11, %v2773_v46, %v1320_v30  ;;  %v503_v46 = vadd.f32 %v3263_v47, %v3188_v60 }
 0x475   : > { %v1329_v61 = vsel %vm1326_vm12, %v1328_v25, %v1324_v31 }
 0x476   : > { %v1351_v10 = vmul.f32 %v1329_v61, %v1308_v24 }
 0x478   : > { %v1352_v12 = vadd.f32 %v1351_v10, %v549_v27 }
 0x47a   : > { %2774 = vtanh.f32 %v1352_v12 }
 0x480   : > { %v2775_v59 = vpop.eup %2774 }
 0x481   : > { %v1355_v37 = vmul.f32 %v2775_v59, %v1354_v6 }
 0x483   : > { %v3503_v16 = vadd.f32 %v1356_v17, %v1355_v37 }
 0x485   : > { %2631 = vst [vmem:[%s3222_s17 + $0x28] sm:$0xff] %v3503_v16  ;;  %v1366_v4 = vpack.c.bf16 %v3503_v16, %v3503_v16 }
 0x487   : > { %1375 = vmatmul.bf16.vlgmr.msra.gmra.mxu2 %v1366_v4  ;;  %1388 = vmatmul.bf16.vlgmr.msrb.gmra.mxu3 %v1366_v4 }
 0x488   : > { %1401 = vmatmul.bf16.vlgmr.msrb.gmra.mxu0 %v1366_v4  ;;  %1583 = vmatpush.bf16.msra.mxu2 %v3029_v58 }
 0x489   : > { %1652 = vmatpush.bf16.msrb.mxu3 %v2935_v3  ;;  %1665 = vmatpush.bf16.msrb.mxu0 %v2970_v22 }
 0x48c   : > { %1584 = vmatpush.bf16.msra.mxu2 %v3041_v1 }
 0x48d   : > { %1653 = vmatpush.bf16.msrb.mxu3 %v2939_v5  ;;  %1666 = vmatpush.bf16.msrb.mxu0 %v2983_v29 }
 0x490   : > { %1585 = vmatpush.bf16.msra.mxu2 %v3053_v9 }
 0x491   : > { %1654 = vmatpush.bf16.msrb.mxu3 %v2949_v8  ;;  %1667 = vmatpush.bf16.msrb.mxu0 %v2995_v35 }
 0x494   : > { %1586 = vmatpush.bf16.msra.mxu2 %v3063_v14 }
 0x495   : > { %1655 = vmatpush.bf16.msrb.mxu3 %v2966_v18  ;;  %1668 = vmatpush.bf16.msrb.mxu0 %v3005_v41 }
 0x498   : > { %1587 = vmatpush.bf16.msra.mxu2 %v3072_v21 }
 0x499   : > { %1656 = vmatpush.bf16.msrb.mxu3 %v2978_v26  ;;  %1669 = vmatpush.bf16.msrb.mxu0 %v3015_v48 }
 0x49c   : > { %1588 = vmatpush.bf16.msra.mxu2 %v3079_v28 }
 0x49d   : > { %1657 = vmatpush.bf16.msrb.mxu3 %v2990_v32  ;;  %1670 = vmatpush.bf16.msrb.mxu0 %v3026_v56 }
 0x4a0   : > { %1589 = vmatpush.bf16.msra.mxu2 %v3089_v33 }
 0x4a1   : > { %1658 = vmatpush.bf16.msrb.mxu3 %v3000_v38  ;;  %1671 = vmatpush.bf16.msrb.mxu0 %v3038_v63 }
 0x4a4   : > { %1590 = vmatpush.bf16.msra.mxu2 %v3099_v23 }
 0x4a5   : > { %1659 = vmatpush.bf16.msrb.mxu3 %v3010_v44  ;;  %1672 = vmatpush.bf16.msrb.mxu0 %v3051_v7 }
 0x505   : > { %v1402_v57 = vpop.f32.mrf.mxu0 }
 0x506   : > { %v1403_v37 = vadd.f32 %v1402_v57, %v3206_v43 }
 0x50a   : > { %v1376_v51 = vpop.f32.mrf.mxu2  ;;  %v1389_v40 = vpop.f32.mrf.mxu3 }
 0x50b   : > { %v1377_v55 = vadd.f32 %v1376_v51, %v3180_v50  ;;  %v1390_v36 = vadd.f32 %v1389_v40, %v3190_v0  ;;  %v3879_v40 = vld [vmem:[#allocation21_spill] sm:$0xff] }
 0x50d   : > { %v1406_v53 = vadd.f32 %v1377_v55, %v454_v45  ;;  %v1426_v13 = vadd.f32 %v1390_v36, %v503_v46  ;;  %v1404_v20 = vpop.f32.mrf.mxu0  ;;  %v552_v45 = vadd.f32 %v3879_v40, %v3204_v42 }
 0x50f   : > { %v2632_v2 = vmul.f32 -1.442695, %v1406_v53  ;;  %v2633_v34 = vmul.f32 -1.442695, %v1426_v13 }
 0x511   : > { %2776 = vpow2.f32 %v2632_v2 }
 0x512   : > { %2778 = vpow2.f32 %v2633_v34  ;;  %v1378_v30 = vpop.f32.mrf.mxu2  ;;  %v1391_v25 = vpop.f32.mrf.mxu3 }
 0x517   : > { %v2777_v24 = vpop.eup %2776 }
 0x518   : > { %v2779_v31 = vpop.eup %2778  ;;  %v1410_v61 = vadd.f32 1.0, %v2777_v24 }
 0x519   : > { %v1430_v39 = vadd.f32 1.0, %v2779_v31 }
 0x51a   : > { %2780 = vrcp.f32 %v1410_v61  ;;  %v1422_v19 = vand.u32 2147483648, %v1410_v61  ;;  %v1420_v15 = vand.u32 2147483647, %v1410_v61  ;;  %vm1416_vm2 = vweird.f32 %v1410_v61 }
 0x51b   : > { %2782 = vrcp.f32 %v1430_v39  ;;  %v1442_v55 = vand.u32 2147483648, %v1430_v39  ;;  %vm1436_vm6 = vweird.f32 %v1430_v39  ;;  %v1440_v36 = vand.u32 2147483647, %v1430_v39 }
 0x51c   : > { %v1423_v59 = vor.u32 1.1754944e-38, %v1422_v19  ;;  %vm1421_vm4 = vcmp.eq.f32.partialorder %v1420_v15, 8.507059e+37 }
 0x51d   : > { %v1443_v20 = vor.u32 1.1754944e-38, %v1442_v55  ;;  %vm1441_vm8 = vcmp.eq.f32.partialorder %v1440_v36, 8.507059e+37 }
 0x520   : > { %v2781_v47 = vpop.eup %2780 }
 0x521   : > { %v2783_v62 = vpop.eup %2782  ;;  %v1412_v27 = vmul.f32 %v2781_v47, %v1410_v61  ;;  %vm1417_vm1 = vweird.f32 %v2781_v47  ;;  %v3880_v61 = vld [vmem:[#allocation3_spill] sm:$0xff] }
 0x522   : > { %v1432_v54 = vmul.f32 %v2783_v62, %v1430_v39  ;;  %vm1418_vm3 = vmor %vm1416_vm2, %vm1417_vm1  ;;  %vm1437_vm5 = vweird.f32 %v2783_v62  ;;  %v456_v39 = vadd.f32 %v3880_v61, %v3178_v49 }
 0x523   : > { %v1413_v10 = vsub.f32 1.0, %v1412_v27  ;;  %vm1438_vm7 = vmor %vm1436_vm6, %vm1437_vm5 }
 0x524   : > { %v1433_v12 = vsub.f32 1.0, %v1432_v54 }
 0x525   : > { %v1414_v52 = vmul.f32 %v2781_v47, %v1413_v10  ;;  %v3881_v10 = vld [vmem:[#allocation4_spill] sm:$0xff] }
 0x526   : > { %v1434_v11 = vmul.f32 %v2783_v62, %v1433_v12  ;;  %v505_v19 = vadd.f32 %v3881_v10, %v3188_v60 }
 0x527   : > { %v1415_v6 = vadd.f32 %v2781_v47, %v1414_v52 }
 0x528   : > { %v1435_v51 = vadd.f32 %v2783_v62, %v1434_v11 }
 0x529   : > { %v1419_v17 = vsel %vm1418_vm3, %v2781_v47, %v1415_v6 }
 0x52a   : > { %v1424_v4 = vsel %vm1421_vm4, %v1423_v59, %v1419_v17  ;;  %v1439_v13 = vsel %vm1438_vm7, %v2783_v62, %v1435_v51 }
 0x52b   : > { %v1446_v46 = vmul.f32 %v1424_v4, %v1403_v37  ;;  %v1444_v57 = vsel %vm1441_vm8, %v1443_v20, %v1439_v13 }
 0x52c   : > { %v1449_v2 = vsub.f32 1.0, %v1444_v57  ;;  %v1451_v25 = vmul.f32 %v1444_v57, %v3503_v16 }
 0x52d   : > { %v1447_v53 = vadd.f32 %v1446_v46, %v552_v45 }
 0x52f   : > { %2784 = vtanh.f32 %v1447_v53 }
 0x535   : > { %v2785_v34 = vpop.eup %2784 }
 0x536   : > { %v1450_v30 = vmul.f32 %v2785_v34, %v1449_v2 }
 0x538   : > { %v3543_v24 = vadd.f32 %v1451_v25, %v1450_v30 }
 0x53a   : > { %2634 = vst [vmem:[%s3222_s17 + $0x30] sm:$0xff] %v3543_v24  ;;  %v1461_v31 = vpack.c.bf16 %v3543_v24, %v3543_v24 }
 0x53c   : > { %1470 = vmatmul.bf16.vlgmr.msrb.gmra.mxu1 %v1461_v31  ;;  %1483 = vmatmul.bf16.vlgmr.msrb.gmra.mxu2 %v1461_v31 }
 0x53d   : > { %1496 = vmatmul.bf16.vlgmr.msra.gmra.mxu3 %v1461_v31  ;;  %1678 = vmatpush.bf16.msrb.mxu1 %v3029_v58 }
 0x53e   : > { %1747 = vmatpush.bf16.msrb.mxu2 %v2935_v3  ;;  %1760 = vmatpush.bf16.msra.mxu3 %v2970_v22 }
 0x541   : > { %1679 = vmatpush.bf16.msrb.mxu1 %v3041_v1 }
 0x542   : > { %1748 = vmatpush.bf16.msrb.mxu2 %v2939_v5  ;;  %1761 = vmatpush.bf16.msra.mxu3 %v2983_v29 }
 0x545   : > { %1680 = vmatpush.bf16.msrb.mxu1 %v3053_v9 }
 0x546   : > { %1749 = vmatpush.bf16.msrb.mxu2 %v2949_v8  ;;  %1762 = vmatpush.bf16.msra.mxu3 %v2995_v35 }
 0x549   : > { %1681 = vmatpush.bf16.msrb.mxu1 %v3063_v14 }
 0x54a   : > { %1750 = vmatpush.bf16.msrb.mxu2 %v2966_v18  ;;  %1763 = vmatpush.bf16.msra.mxu3 %v3005_v41 }
 0x54d   : > { %1682 = vmatpush.bf16.msrb.mxu1 %v3072_v21 }
 0x54e   : > { %1751 = vmatpush.bf16.msrb.mxu2 %v2978_v26  ;;  %1764 = vmatpush.bf16.msra.mxu3 %v3015_v48 }
 0x551   : > { %1683 = vmatpush.bf16.msrb.mxu1 %v3079_v28 }
 0x552   : > { %1752 = vmatpush.bf16.msrb.mxu2 %v2990_v32  ;;  %1765 = vmatpush.bf16.msra.mxu3 %v3026_v56 }
 0x555   : > { %1684 = vmatpush.bf16.msrb.mxu1 %v3089_v33 }
 0x556   : > { %1753 = vmatpush.bf16.msrb.mxu2 %v3000_v38  ;;  %1766 = vmatpush.bf16.msra.mxu3 %v3038_v63 }
 0x559   : > { %1685 = vmatpush.bf16.msrb.mxu1 %v3099_v23 }
 0x55a   : > { %1754 = vmatpush.bf16.msrb.mxu2 %v3010_v44  ;;  %1767 = vmatpush.bf16.msra.mxu3 %v3051_v7 }
 0x5b9   : > { %v1471_v16 = vpop.f32.mrf.mxu1 }
 0x5ba   : > { %v1472_v47 = vadd.f32 %v1471_v16, %v3180_v50  ;;  %v3882_v16 = vld [vmem:[#allocation22_spill] sm:$0xff] }
 0x5bb   : > { %v554_v61 = vadd.f32 %v3882_v16, %v3204_v42 }
 0x5bc   : > { %v1501_v62 = vadd.f32 %v1472_v47, %v456_v39 }
 0x5be   : > { %v2635_v27 = vmul.f32 -1.442695, %v1501_v62 }
 0x5bf   : > { %v1484_v54 = vpop.f32.mrf.mxu2 }
 0x5c0   : > { %2786 = vpow2.f32 %v2635_v27  ;;  %v1485_v12 = vadd.f32 %v1484_v54, %v3190_v0  ;;  %v1497_v52 = vpop.f32.mrf.mxu3 }
 0x5c1   : > { %v1473_v15 = vpop.f32.mrf.mxu1  ;;  %v1498_v25 = vadd.f32 %v1497_v52, %v3206_v43 }
 0x5c2   : > { %v1521_v11 = vadd.f32 %v1485_v12, %v505_v19 }
 0x5c4   : > { %v2636_v6 = vmul.f32 -1.442695, %v1521_v11 }
 0x5c6   : > { %v2787_v59 = vpop.eup %2786  ;;  %2788 = vpow2.f32 %v2636_v6 }
 0x5c7   : > { %v1505_v37 = vadd.f32 1.0, %v2787_v59  ;;  %v1486_v17 = vpop.f32.mrf.mxu2 }
 0x5c8   : > { %v1499_v4 = vpop.f32.mrf.mxu3 }
 0x5c9   : > { %2790 = vrcp.f32 %v1505_v37  ;;  %v1517_v36 = vand.u32 2147483648, %v1505_v37  ;;  %v1515_v13 = vand.u32 2147483647, %v1505_v37  ;;  %vm1511_vm10 = vweird.f32 %v1505_v37 }
 0x5cb   : > { %v1518_v34 = vor.u32 1.1754944e-38, %v1517_v36  ;;  %vm1516_vm12 = vcmp.eq.f32.partialorder %v1515_v13, 8.507059e+37 }
 0x5cc   : > { %v2789_v51 = vpop.eup %2788 }
 0x5cd   : > { %v1525_v40 = vadd.f32 1.0, %v2789_v51 }
 0x5cf   : > { %v2791_v45 = vpop.eup %2790  ;;  %2792 = vrcp.f32 %v1525_v40  ;;  %v1537_v62 = vand.u32 2147483648, %v1525_v40  ;;  %v1535_v54 = vand.u32 2147483647, %v1525_v40  ;;  %vm1531_vm14 = vweird.f32 %v1525_v40 }
 0x5d0   : > { %v1507_v46 = vmul.f32 %v2791_v45, %v1505_v37  ;;  %vm1512_vm9 = vweird.f32 %v2791_v45 }
 0x5d1   : > { %vm1513_vm11 = vmor %vm1511_vm10, %vm1512_vm9  ;;  %v1538_v12 = vor.u32 1.1754944e-38, %v1537_v62  ;;  %vm1536_vm0 = vcmp.eq.f32.partialorder %v1535_v54, 8.507059e+37 }
 0x5d2   : > { %v1508_v55 = vsub.f32 1.0, %v1507_v46  ;;  %v3884_v46 = vld [vmem:[#allocation6_spill] sm:$0xff] }
 0x5d4   : > { %v1509_v53 = vmul.f32 %v2791_v45, %v1508_v55  ;;  %v508_v55 = vadd.f32 %v3884_v46, %v3188_v60 }
 0x5d5   : > { %v2793_v20 = vpop.eup %2792 }
 0x5d6   : > { %v1527_v57 = vmul.f32 %v2793_v20, %v1525_v40  ;;  %v1510_v2 = vadd.f32 %v2791_v45, %v1509_v53  ;;  %vm1532_vm13 = vweird.f32 %v2793_v20  ;;  %v3883_v40 = vld [vmem:[#allocation5_spill] sm:$0xff] }
 0x5d7   : > { %vm1533_vm15 = vmor %vm1531_vm14, %vm1532_vm13 }
 0x5d8   : > { %v1528_v30 = vsub.f32 1.0, %v1527_v57  ;;  %v1514_v31 = vsel %vm1513_vm11, %v2791_v45, %v1510_v2  ;;  %v459_v45 = vadd.f32 %v3883_v40, %v3178_v49 }
 0x5d9   : > { %v1519_v39 = vsel %vm1516_vm12, %v1518_v34, %v1514_v31 }
 0x5da   : > { %v1529_v47 = vmul.f32 %v2793_v20, %v1528_v30  ;;  %v1541_v27 = vmul.f32 %v1519_v39, %v1498_v25 }
 0x5dc   : > { %v1530_v10 = vadd.f32 %v2793_v20, %v1529_v47  ;;  %v1542_v19 = vadd.f32 %v1541_v27, %v554_v61 }
 0x5de   : > { %v1534_v15 = vsel %vm1533_vm15, %v2793_v20, %v1530_v10  ;;  %2794 = vtanh.f32 %v1542_v19 }
 0x5df   : > { %v1539_v52 = vsel %vm1536_vm0, %v1538_v12, %v1534_v15 }
 0x5e0   : > { %v1544_v11 = vsub.f32 1.0, %v1539_v52  ;;  %v1546_v37 = vmul.f32 %v1539_v52, %v3543_v24 }
 0x5e4   : > { %v2795_v6 = vpop.eup %2794 }
 0x5e5   : > { %v1545_v59 = vmul.f32 %v2795_v6, %v1544_v11 }
 0x5e7   : > { %v3583_v17 = vadd.f32 %v1546_v37, %v1545_v59 }
 0x5e9   : > { %2637 = vst [vmem:[%s3222_s17 + $0x38] sm:$0xff] %v3583_v17  ;;  %v1556_v4 = vpack.c.bf16 %v3583_v17, %v3583_v17 }
 0x5eb   : > { %1565 = vmatmul.bf16.vlgmr.msra.gmra.mxu0 %v1556_v4  ;;  %1578 = vmatmul.bf16.vlgmr.msra.gmra.mxu1 %v1556_v4 }
 0x5ec   : > { %1591 = vmatmul.bf16.vlgmr.msra.gmra.mxu2 %v1556_v4  ;;  %1773 = vmatpush.bf16.msra.mxu0 %v3029_v58 }
 0x5ed   : > { %1842 = vmatpush.bf16.msra.mxu1 %v2935_v3  ;;  %1855 = vmatpush.bf16.msra.mxu2 %v2970_v22 }
 0x5f0   : > { %1774 = vmatpush.bf16.msra.mxu0 %v3041_v1 }
 0x5f1   : > { %1843 = vmatpush.bf16.msra.mxu1 %v2939_v5  ;;  %1856 = vmatpush.bf16.msra.mxu2 %v2983_v29 }
 0x5f4   : > { %1775 = vmatpush.bf16.msra.mxu0 %v3053_v9 }
 0x5f5   : > { %1844 = vmatpush.bf16.msra.mxu1 %v2949_v8  ;;  %1857 = vmatpush.bf16.msra.mxu2 %v2995_v35 }
 0x5f8   : > { %1776 = vmatpush.bf16.msra.mxu0 %v3063_v14 }
 0x5f9   : > { %1845 = vmatpush.bf16.msra.mxu1 %v2966_v18  ;;  %1858 = vmatpush.bf16.msra.mxu2 %v3005_v41 }
 0x5fc   : > { %1777 = vmatpush.bf16.msra.mxu0 %v3072_v21 }
 0x5fd   : > { %1846 = vmatpush.bf16.msra.mxu1 %v2978_v26  ;;  %1859 = vmatpush.bf16.msra.mxu2 %v3015_v48 }
 0x600   : > { %1778 = vmatpush.bf16.msra.mxu0 %v3079_v28 }
 0x601   : > { %1847 = vmatpush.bf16.msra.mxu1 %v2990_v32  ;;  %1860 = vmatpush.bf16.msra.mxu2 %v3026_v56 }
 0x604   : > { %1779 = vmatpush.bf16.msra.mxu0 %v3089_v33 }
 0x605   : > { %1848 = vmatpush.bf16.msra.mxu1 %v3000_v38  ;;  %1861 = vmatpush.bf16.msra.mxu2 %v3038_v63 }
 0x608   : > { %1780 = vmatpush.bf16.msra.mxu0 %v3099_v23 }
 0x609   : > { %1849 = vmatpush.bf16.msra.mxu1 %v3010_v44  ;;  %1862 = vmatpush.bf16.msra.mxu2 %v3051_v7 }
 0x668   : > { %v1566_v24 = vpop.f32.mrf.mxu0  ;;  %v1579_v51 = vpop.f32.mrf.mxu1 }
 0x669   : > { %v1567_v36 = vadd.f32 %v1566_v24, %v3180_v50  ;;  %v1580_v53 = vadd.f32 %v1579_v51, %v3190_v0 }
 0x66b   : > { %v1596_v13 = vadd.f32 %v1567_v36, %v459_v45  ;;  %v1616_v20 = vadd.f32 %v1580_v53, %v508_v55  ;;  %v3885_v45 = vld [vmem:[#allocation23_spill] sm:$0xff] }
 0x66c   : > { %v557_v46 = vadd.f32 %v3885_v45, %v3204_v42 }
 0x66d   : > { %v2638_v57 = vmul.f32 -1.442695, %v1596_v13  ;;  %v2639_v2 = vmul.f32 -1.442695, %v1616_v20 }
 0x66f   : > { %2796 = vpow2.f32 %v2638_v57  ;;  %v1592_v34 = vpop.f32.mrf.mxu2 }
 0x670   : > { %2798 = vpow2.f32 %v2639_v2  ;;  %v1568_v30 = vpop.f32.mrf.mxu0  ;;  %v1581_v25 = vpop.f32.mrf.mxu1  ;;  %v1593_v4 = vadd.f32 %v1592_v34, %v3206_v43 }
 0x675   : > { %v2797_v31 = vpop.eup %2796 }
 0x676   : > { %v2799_v16 = vpop.eup %2798  ;;  %v1600_v61 = vadd.f32 1.0, %v2797_v31 }
 0x677   : > { %v1620_v39 = vadd.f32 1.0, %v2799_v16  ;;  %v1594_v47 = vpop.f32.mrf.mxu2 }
 0x678   : > { %2800 = vrcp.f32 %v1600_v61  ;;  %v1612_v15 = vand.u32 2147483648, %v1600_v61  ;;  %v1610_v11 = vand.u32 2147483647, %v1600_v61  ;;  %vm1606_vm2 = vweird.f32 %v1600_v61 }
 0x679   : > { %2802 = vrcp.f32 %v1620_v39  ;;  %v1632_v55 = vand.u32 2147483648, %v1620_v39  ;;  %vm1626_vm6 = vweird.f32 %v1620_v39  ;;  %v1630_v53 = vand.u32 2147483647, %v1620_v39 }
 0x67a   : > { %v1613_v37 = vor.u32 1.1754944e-38, %v1612_v15  ;;  %vm1611_vm4 = vcmp.eq.f32.partialorder %v1610_v11, 8.507059e+37 }
 0x67b   : > { %v1633_v57 = vor.u32 1.1754944e-38, %v1632_v55  ;;  %vm1631_vm8 = vcmp.eq.f32.partialorder %v1630_v53, 8.507059e+37 }
 0x67e   : > { %v2801_v62 = vpop.eup %2800 }
 0x67f   : > { %v2803_v27 = vpop.eup %2802  ;;  %v1602_v54 = vmul.f32 %v2801_v62, %v1600_v61  ;;  %vm1607_vm1 = vweird.f32 %v2801_v62 }
 0x680   : > { %v1622_v10 = vmul.f32 %v2803_v27, %v1620_v39  ;;  %vm1608_vm3 = vmor %vm1606_vm2, %vm1607_vm1  ;;  %vm1627_vm5 = vweird.f32 %v2803_v27  ;;  %v3886_v39 = vld [vmem:[#allocation8_spill] sm:$0xff] }
 0x681   : > { %v1603_v19 = vsub.f32 1.0, %v1602_v54  ;;  %vm1628_vm7 = vmor %vm1626_vm6, %vm1627_vm5  ;;  %v510_v47 = vadd.f32 %v3886_v39, %v3188_v60 }
 0x682   : > { %v1623_v12 = vsub.f32 1.0, %v1622_v10 }
 0x683   : > { %v1604_v52 = vmul.f32 %v2801_v62, %v1603_v19 }
 0x684   : > { %v1624_v6 = vmul.f32 %v2803_v27, %v1623_v12  ;;  %v3887_v12 = vld [vmem:[#allocation7_spill] sm:$0xff] }
 0x685   : > { %v1605_v59 = vadd.f32 %v2801_v62, %v1604_v52  ;;  %v461_v15 = vadd.f32 %v3887_v12, %v3178_v49 }
 0x686   : > { %v1625_v40 = vadd.f32 %v2803_v27, %v1624_v6 }
 0x687   : > { %v1609_v24 = vsel %vm1608_vm3, %v2801_v62, %v1605_v59 }
 0x688   : > { %v1614_v51 = vsel %vm1611_vm4, %v1613_v37, %v1609_v24  ;;  %v1629_v20 = vsel %vm1628_vm7, %v2803_v27, %v1625_v40 }
 0x689   : > { %v1636_v36 = vmul.f32 %v1614_v51, %v1593_v4  ;;  %v1634_v2 = vsel %vm1631_vm8, %v1633_v57, %v1629_v20 }
 0x68a   : > { %v1639_v34 = vsub.f32 1.0, %v1634_v2  ;;  %v1641_v31 = vmul.f32 %v1634_v2, %v3583_v17 }
 0x68b   : > { %v1637_v13 = vadd.f32 %v1636_v36, %v557_v46 }
 0x68d   : > { %2804 = vtanh.f32 %v1637_v13 }
 0x693   : > { %v2805_v30 = vpop.eup %2804 }
 0x694   : > { %v1640_v25 = vmul.f32 %v2805_v30, %v1639_v34 }
 0x696   : > { %v3623_v16 = vadd.f32 %v1641_v31, %v1640_v25 }
 0x698   : > { %2640 = vst [vmem:[%s3222_s17 + $0x40] sm:$0xff] %v3623_v16  ;;  %v1651_v61 = vpack.c.bf16 %v3623_v16, %v3623_v16 }
 0x69a   : > { %1660 = vmatmul.bf16.vlgmr.msrb.gmra.mxu3 %v1651_v61  ;;  %1673 = vmatmul.bf16.vlgmr.msrb.gmra.mxu0 %v1651_v61 }
 0x69b   : > { %1686 = vmatmul.bf16.vlgmr.msrb.gmra.mxu1 %v1651_v61  ;;  %1868 = vmatpush.bf16.msrb.mxu3 %v3029_v58 }
 0x69c   : > { %1937 = vmatpush.bf16.msrb.mxu0 %v2935_v3  ;;  %1950 = vmatpush.bf16.msrb.mxu1 %v2970_v22 }
 0x69f   : > { %1869 = vmatpush.bf16.msrb.mxu3 %v3041_v1 }
 0x6a0   : > { %1938 = vmatpush.bf16.msrb.mxu0 %v2939_v5  ;;  %1951 = vmatpush.bf16.msrb.mxu1 %v2983_v29 }
 0x6a3   : > { %1870 = vmatpush.bf16.msrb.mxu3 %v3053_v9 }
 0x6a4   : > { %1939 = vmatpush.bf16.msrb.mxu0 %v2949_v8  ;;  %1952 = vmatpush.bf16.msrb.mxu1 %v2995_v35 }
 0x6a7   : > { %1871 = vmatpush.bf16.msrb.mxu3 %v3063_v14 }
 0x6a8   : > { %1940 = vmatpush.bf16.msrb.mxu0 %v2966_v18  ;;  %1953 = vmatpush.bf16.msrb.mxu1 %v3005_v41 }
 0x6ab   : > { %1872 = vmatpush.bf16.msrb.mxu3 %v3072_v21 }
 0x6ac   : > { %1941 = vmatpush.bf16.msrb.mxu0 %v2978_v26  ;;  %1954 = vmatpush.bf16.msrb.mxu1 %v3015_v48 }
 0x6af   : > { %1873 = vmatpush.bf16.msrb.mxu3 %v3079_v28 }
 0x6b0   : > { %1942 = vmatpush.bf16.msrb.mxu0 %v2990_v32  ;;  %1955 = vmatpush.bf16.msrb.mxu1 %v3026_v56 }
 0x6b3   : > { %1874 = vmatpush.bf16.msrb.mxu3 %v3089_v33 }
 0x6b4   : > { %1943 = vmatpush.bf16.msrb.mxu0 %v3000_v38  ;;  %1956 = vmatpush.bf16.msrb.mxu1 %v3038_v63 }
 0x6b7   : > { %1875 = vmatpush.bf16.msrb.mxu3 %v3099_v23 }
 0x6b8   : > { %1944 = vmatpush.bf16.msrb.mxu0 %v3010_v44  ;;  %1957 = vmatpush.bf16.msrb.mxu1 %v3051_v7 }
 0x717   : > { %v1674_v17 = vpop.f32.mrf.mxu0 }
 0x718   : > { %v1675_v62 = vadd.f32 %v1674_v17, %v3190_v0  ;;  %v1687_v27 = vpop.f32.mrf.mxu1 }
 0x719   : > { %v1688_v61 = vadd.f32 %v1687_v27, %v3206_v43 }
 0x71a   : > { %v1711_v54 = vadd.f32 %v1675_v62, %v510_v47  ;;  %v3888_v62 = vld [vmem:[#allocation24_spill] sm:$0xff] }
 0x71c   : > { %v2642_v10 = vmul.f32 -1.442695, %v1711_v54  ;;  %v559_v54 = vadd.f32 %v3888_v62, %v3204_v42 }
 0x71d   : > { %v1661_v19 = vpop.f32.mrf.mxu3 }
 0x71e   : > { %2806 = vpow2.f32 %v2642_v10  ;;  %v1662_v52 = vadd.f32 %v1661_v19, %v3180_v50 }
 0x71f   : > { %v1676_v11 = vpop.f32.mrf.mxu0 }
 0x720   : > { %v1691_v6 = vadd.f32 %v1662_v52, %v461_v15  ;;  %v1689_v59 = vpop.f32.mrf.mxu1 }
 0x722   : > { %v2641_v37 = vmul.f32 -1.442695, %v1691_v6 }
 0x724   : > { %v2807_v4 = vpop.eup %2806  ;;  %2808 = vpow2.f32 %v2641_v37 }
 0x725   : > { %v1715_v24 = vadd.f32 1.0, %v2807_v4  ;;  %v1663_v51 = vpop.f32.mrf.mxu3 }
 0x727   : > { %2810 = vrcp.f32 %v1715_v24  ;;  %v1727_v10 = vand.u32 2147483648, %v1715_v24  ;;  %vm1721_vm14 = vweird.f32 %v1715_v24  ;;  %v1725_v12 = vand.u32 2147483647, %v1715_v24 }
 0x729   : > { %v1728_v11 = vor.u32 1.1754944e-38, %v1727_v10  ;;  %vm1726_vm0 = vcmp.eq.f32.partialorder %v1725_v12, 8.507059e+37 }
 0x72a   : > { %v2809_v40 = vpop.eup %2808 }
 0x72b   : > { %v1695_v45 = vadd.f32 1.0, %v2809_v40 }
 0x72d   : > { %2812 = vrcp.f32 %v1695_v45  ;;  %v2811_v46 = vpop.eup %2810  ;;  %v1707_v57 = vand.u32 2147483648, %v1695_v45  ;;  %v1705_v34 = vand.u32 2147483647, %v1695_v45  ;;  %vm1701_vm10 = vweird.f32 %v1695_v45 }
 0x72e   : > { %v1717_v55 = vmul.f32 %v2811_v46, %v1715_v24  ;;  %vm1722_vm13 = vweird.f32 %v2811_v46 }
 0x72f   : > { %v1708_v31 = vor.u32 1.1754944e-38, %v1707_v57  ;;  %vm1706_vm12 = vcmp.eq.f32.partialorder %v1705_v34, 8.507059e+37  ;;  %vm1723_vm15 = vmor %vm1721_vm14, %vm1722_vm13 }
 0x730   : > { %v1718_v13 = vsub.f32 1.0, %v1717_v55 }
 0x732   : > { %v1719_v30 = vmul.f32 %v2811_v46, %v1718_v13 }
 0x733   : > { %v2813_v36 = vpop.eup %2812 }
 0x734   : > { %v1697_v53 = vmul.f32 %v2813_v36, %v1695_v45  ;;  %vm1702_vm9 = vweird.f32 %v2813_v36  ;;  %v1720_v39 = vadd.f32 %v2811_v46, %v1719_v30 }
 0x735   : > { %vm1703_vm11 = vmor %vm1701_vm10, %vm1702_vm9 }
 0x736   : > { %v1698_v20 = vsub.f32 1.0, %v1697_v53  ;;  %v1724_v52 = vsel %vm1723_vm15, %v2811_v46, %v1720_v39  ;;  %v3889_v46 = vld [vmem:[#allocation9_spill] sm:$0xff] }
 0x737   : > { %v1729_v27 = vsel %vm1726_vm0, %v1728_v11, %v1724_v52  ;;  %v464_v55 = vadd.f32 %v3889_v46, %v3178_v49 }
 0x738   : > { %v1699_v2 = vmul.f32 %v2813_v36, %v1698_v20  ;;  %v1734_v6 = vsub.f32 1.0, %v1729_v27  ;;  %v1736_v4 = vmul.f32 %v1729_v27, %v3623_v16 }
 0x73a   : > { %v1700_v25 = vadd.f32 %v2813_v36, %v1699_v2 }
 0x73c   : > { %v1704_v17 = vsel %vm1703_vm11, %v2813_v36, %v1700_v25  ;;  %v3890_v36 = vld [vmem:[#allocation10_spill] sm:$0xff] }
 0x73d   : > { %v1709_v47 = vsel %vm1706_vm12, %v1708_v31, %v1704_v17  ;;  %v513_v53 = vadd.f32 %v3890_v36, %v3188_v60 }
 0x73e   : > { %v1731_v19 = vmul.f32 %v1709_v47, %v1688_v61 }
 0x740   : > { %v1732_v15 = vadd.f32 %v1731_v19, %v559_v54 }
 0x742   : > { %2814 = vtanh.f32 %v1732_v15 }
 0x748   : > { %v2815_v59 = vpop.eup %2814 }
 0x749   : > { %v1735_v37 = vmul.f32 %v2815_v59, %v1734_v6 }
 0x74b   : > { %v3663_v51 = vadd.f32 %v1736_v4, %v1735_v37 }
 0x74d   : > { %2643 = vst [vmem:[%s3222_s17 + $0x48] sm:$0xff] %v3663_v51  ;;  %v1746_v40 = vpack.c.bf16 %v3663_v51, %v3663_v51 }
 0x74f   : > { %1755 = vmatmul.bf16.vlgmr.msrb.gmra.mxu2 %v1746_v40  ;;  %1768 = vmatmul.bf16.vlgmr.msra.gmra.mxu3 %v1746_v40 }
 0x750   : > { %1781 = vmatmul.bf16.vlgmr.msra.gmra.mxu0 %v1746_v40  ;;  %1963 = vmatpush.bf16.msrb.mxu2 %v3029_v58 }
 0x751   : > { %2032 = vmatpush.bf16.msra.mxu3 %v2935_v3  ;;  %2045 = vmatpush.bf16.msra.mxu0 %v2970_v22 }
 0x754   : > { %1964 = vmatpush.bf16.msrb.mxu2 %v3041_v1 }
 0x755   : > { %2033 = vmatpush.bf16.msra.mxu3 %v2939_v5  ;;  %2046 = vmatpush.bf16.msra.mxu0 %v2983_v29 }
 0x758   : > { %1965 = vmatpush.bf16.msrb.mxu2 %v3053_v9 }
 0x759   : > { %2034 = vmatpush.bf16.msra.mxu3 %v2949_v8  ;;  %2047 = vmatpush.bf16.msra.mxu0 %v2995_v35 }
 0x75c   : > { %1966 = vmatpush.bf16.msrb.mxu2 %v3063_v14 }
 0x75d   : > { %2035 = vmatpush.bf16.msra.mxu3 %v2966_v18  ;;  %2048 = vmatpush.bf16.msra.mxu0 %v3005_v41 }
 0x760   : > { %1967 = vmatpush.bf16.msrb.mxu2 %v3072_v21 }
 0x761   : > { %2036 = vmatpush.bf16.msra.mxu3 %v2978_v26  ;;  %2049 = vmatpush.bf16.msra.mxu0 %v3015_v48 }
 0x764   : > { %1968 = vmatpush.bf16.msrb.mxu2 %v3079_v28 }
 0x765   : > { %2037 = vmatpush.bf16.msra.mxu3 %v2990_v32  ;;  %2050 = vmatpush.bf16.msra.mxu0 %v3026_v56 }
 0x768   : > { %1969 = vmatpush.bf16.msrb.mxu2 %v3089_v33 }
 0x769   : > { %2038 = vmatpush.bf16.msra.mxu3 %v3000_v38  ;;  %2051 = vmatpush.bf16.msra.mxu0 %v3038_v63 }
 0x76c   : > { %1970 = vmatpush.bf16.msrb.mxu2 %v3099_v23 }
 0x76d   : > { %2039 = vmatpush.bf16.msra.mxu3 %v3010_v44  ;;  %2052 = vmatpush.bf16.msra.mxu0 %v3051_v7 }
 0x7cd   : > { %v1782_v16 = vpop.f32.mrf.mxu0 }
 0x7ce   : > { %v1783_v40 = vadd.f32 %v1782_v16, %v3206_v43 }
 0x7d2   : > { %v1756_v24 = vpop.f32.mrf.mxu2  ;;  %v1769_v45 = vpop.f32.mrf.mxu3 }
 0x7d3   : > { %v1757_v13 = vadd.f32 %v1756_v24, %v3180_v50  ;;  %v1770_v20 = vadd.f32 %v1769_v45, %v3190_v0 }
 0x7d5   : > { %v1786_v57 = vadd.f32 %v1757_v13, %v464_v55  ;;  %v1806_v2 = vadd.f32 %v1770_v20, %v513_v53  ;;  %v1784_v34 = vpop.f32.mrf.mxu0  ;;  %v3891_v55 = vld [vmem:[#allocation25_spill] sm:$0xff] }
 0x7d6   : > { %v562_v36 = vadd.f32 %v3891_v55, %v3204_v42 }
 0x7d7   : > { %v2644_v30 = vmul.f32 -1.442695, %v1786_v57  ;;  %v2645_v25 = vmul.f32 -1.442695, %v1806_v2 }
 0x7d9   : > { %2816 = vpow2.f32 %v2644_v30 }
 0x7da   : > { %2818 = vpow2.f32 %v2645_v25  ;;  %v1758_v31 = vpop.f32.mrf.mxu2  ;;  %v1771_v61 = vpop.f32.mrf.mxu3 }
 0x7df   : > { %v2817_v17 = vpop.eup %2816 }
 0x7e0   : > { %v2819_v39 = vpop.eup %2818  ;;  %v1790_v47 = vadd.f32 1.0, %v2817_v17 }
 0x7e1   : > { %v1810_v62 = vadd.f32 1.0, %v2819_v39 }
 0x7e2   : > { %2820 = vrcp.f32 %v1790_v47  ;;  %v1802_v52 = vand.u32 2147483648, %v1790_v47  ;;  %v1800_v6 = vand.u32 2147483647, %v1790_v47  ;;  %vm1796_vm2 = vweird.f32 %v1790_v47 }
 0x7e3   : > { %2822 = vrcp.f32 %v1810_v62  ;;  %v1822_v13 = vand.u32 2147483648, %v1810_v62  ;;  %vm1816_vm6 = vweird.f32 %v1810_v62  ;;  %v1820_v20 = vand.u32 2147483647, %v1810_v62 }
 0x7e4   : > { %v1803_v4 = vor.u32 1.1754944e-38, %v1802_v52  ;;  %vm1801_vm4 = vcmp.eq.f32.partialorder %v1800_v6, 8.507059e+37 }
 0x7e5   : > { %v1823_v34 = vor.u32 1.1754944e-38, %v1822_v13  ;;  %vm1821_vm8 = vcmp.eq.f32.partialorder %v1820_v20, 8.507059e+37 }
 0x7e8   : > { %v2821_v54 = vpop.eup %2820 }
 0x7e9   : > { %v2823_v10 = vpop.eup %2822  ;;  %v1792_v19 = vmul.f32 %v2821_v54, %v1790_v47  ;;  %vm1797_vm1 = vweird.f32 %v2821_v54  ;;  %v3892_v47 = vld [vmem:[#allocation11_spill] sm:$0xff] }
 0x7ea   : > { %v1812_v12 = vmul.f32 %v2823_v10, %v1810_v62  ;;  %vm1798_vm3 = vmor %vm1796_vm2, %vm1797_vm1  ;;  %vm1817_vm5 = vweird.f32 %v2823_v10  ;;  %v466_v62 = vadd.f32 %v3892_v47, %v3178_v49 }
 0x7eb   : > { %v1793_v15 = vsub.f32 1.0, %v1792_v19  ;;  %vm1818_vm7 = vmor %vm1816_vm6, %vm1817_vm5 }
 0x7ec   : > { %v1813_v11 = vsub.f32 1.0, %v1812_v12 }
 0x7ed   : > { %v1794_v27 = vmul.f32 %v2821_v54, %v1793_v15  ;;  %v3893_v15 = vld [vmem:[#allocation12_spill] sm:$0xff] }
 0x7ee   : > { %v1814_v59 = vmul.f32 %v2823_v10, %v1813_v11  ;;  %v515_v52 = vadd.f32 %v3893_v15, %v3188_v60 }
 0x7ef   : > { %v1795_v37 = vadd.f32 %v2821_v54, %v1794_v27 }
 0x7f0   : > { %v1815_v46 = vadd.f32 %v2823_v10, %v1814_v59 }
 0x7f1   : > { %v1799_v24 = vsel %vm1798_vm3, %v2821_v54, %v1795_v37 }
 0x7f2   : > { %v1804_v45 = vsel %vm1801_vm4, %v1803_v4, %v1799_v24  ;;  %v1819_v2 = vsel %vm1818_vm7, %v2823_v10, %v1815_v46 }
 0x7f3   : > { %v1826_v53 = vmul.f32 %v1804_v45, %v1783_v40  ;;  %v1824_v16 = vsel %vm1821_vm8, %v1823_v34, %v1819_v2 }
 0x7f4   : > { %v1829_v30 = vsub.f32 1.0, %v1824_v16  ;;  %v1831_v61 = vmul.f32 %v1824_v16, %v3663_v51 }
 0x7f5   : > { %v1827_v57 = vadd.f32 %v1826_v53, %v562_v36 }
 0x7f7   : > { %2824 = vtanh.f32 %v1827_v57 }
 0x7fd   : > { %v2825_v25 = vpop.eup %2824 }
 0x7fe   : > { %v1830_v31 = vmul.f32 %v2825_v25, %v1829_v30 }
 0x800   : > { %v3703_v17 = vadd.f32 %v1831_v61, %v1830_v31 }
 0x802   : > { %2646 = vst [vmem:[%s3222_s17 + $0x50] sm:$0xff] %v3703_v17  ;;  %v1841_v39 = vpack.c.bf16 %v3703_v17, %v3703_v17 }
 0x804   : > { %1850 = vmatmul.bf16.vlgmr.msra.gmra.mxu1 %v1841_v39  ;;  %1863 = vmatmul.bf16.vlgmr.msra.gmra.mxu2 %v1841_v39 }
 0x805   : > { %1876 = vmatmul.bf16.vlgmr.msrb.gmra.mxu3 %v1841_v39  ;;  %2058 = vmatpush.bf16.msra.mxu1 %v3029_v58 }
 0x806   : > { %2127 = vmatpush.bf16.msra.mxu2 %v2935_v3  ;;  %2140 = vmatpush.bf16.msrb.mxu3 %v2970_v22 }
 0x809   : > { %2059 = vmatpush.bf16.msra.mxu1 %v3041_v1 }
 0x80a   : > { %2128 = vmatpush.bf16.msra.mxu2 %v2939_v5  ;;  %2141 = vmatpush.bf16.msrb.mxu3 %v2983_v29 }
 0x80d   : > { %2060 = vmatpush.bf16.msra.mxu1 %v3053_v9 }
 0x80e   : > { %2129 = vmatpush.bf16.msra.mxu2 %v2949_v8  ;;  %2142 = vmatpush.bf16.msrb.mxu3 %v2995_v35 }
 0x811   : > { %2061 = vmatpush.bf16.msra.mxu1 %v3063_v14 }
 0x812   : > { %2130 = vmatpush.bf16.msra.mxu2 %v2966_v18  ;;  %2143 = vmatpush.bf16.msrb.mxu3 %v3005_v41 }
 0x815   : > { %2062 = vmatpush.bf16.msra.mxu1 %v3072_v21 }
 0x816   : > { %2131 = vmatpush.bf16.msra.mxu2 %v2978_v26  ;;  %2144 = vmatpush.bf16.msrb.mxu3 %v3015_v48 }
 0x819   : > { %2063 = vmatpush.bf16.msra.mxu1 %v3079_v28 }
 0x81a   : > { %2132 = vmatpush.bf16.msra.mxu2 %v2990_v32  ;;  %2145 = vmatpush.bf16.msrb.mxu3 %v3026_v56 }
 0x81d   : > { %2064 = vmatpush.bf16.msra.mxu1 %v3089_v33 }
 0x81e   : > { %2133 = vmatpush.bf16.msra.mxu2 %v3000_v38  ;;  %2146 = vmatpush.bf16.msrb.mxu3 %v3038_v63 }
 0x821   : > { %2065 = vmatpush.bf16.msra.mxu1 %v3099_v23 }
 0x822   : > { %2134 = vmatpush.bf16.msra.mxu2 %v3010_v44  ;;  %2147 = vmatpush.bf16.msrb.mxu3 %v3051_v7 }
 0x881   : > { %v1851_v51 = vpop.f32.mrf.mxu1 }
 0x882   : > { %v1852_v54 = vadd.f32 %v1851_v51, %v3180_v50  ;;  %v3894_v51 = vld [vmem:[#allocation26_spill] sm:$0xff] }
 0x883   : > { %v564_v47 = vadd.f32 %v3894_v51, %v3204_v42 }
 0x884   : > { %v1881_v10 = vadd.f32 %v1852_v54, %v466_v62 }
 0x886   : > { %v2647_v19 = vmul.f32 -1.442695, %v1881_v10 }
 0x887   : > { %v1864_v12 = vpop.f32.mrf.mxu2 }
 0x888   : > { %2826 = vpow2.f32 %v2647_v19  ;;  %v1865_v11 = vadd.f32 %v1864_v12, %v3190_v0  ;;  %v1877_v27 = vpop.f32.mrf.mxu3 }
 0x889   : > { %v1853_v6 = vpop.f32.mrf.mxu1  ;;  %v1878_v61 = vadd.f32 %v1877_v27, %v3206_v43 }
 0x88a   : > { %v1901_v59 = vadd.f32 %v1865_v11, %v515_v52 }
 0x88c   : > { %v2648_v37 = vmul.f32 -1.442695, %v1901_v59 }
 0x88e   : > { %v2827_v4 = vpop.eup %2826  ;;  %2828 = vpow2.f32 %v2648_v37 }
 0x88f   : > { %v1885_v40 = vadd.f32 1.0, %v2827_v4  ;;  %v1866_v24 = vpop.f32.mrf.mxu2 }
 0x890   : > { %v1879_v45 = vpop.f32.mrf.mxu3 }
 0x891   : > { %2830 = vrcp.f32 %v1885_v40  ;;  %v1897_v20 = vand.u32 2147483648, %v1885_v40  ;;  %v1895_v2 = vand.u32 2147483647, %v1885_v40  ;;  %vm1891_vm10 = vweird.f32 %v1885_v40 }
 0x893   : > { %v1898_v25 = vor.u32 1.1754944e-38, %v1897_v20  ;;  %vm1896_vm12 = vcmp.eq.f32.partialorder %v1895_v2, 8.507059e+37 }
 0x894   : > { %v2829_v46 = vpop.eup %2828 }
 0x895   : > { %v1905_v55 = vadd.f32 1.0, %v2829_v46 }
 0x897   : > { %v2831_v36 = vpop.eup %2830  ;;  %2832 = vrcp.f32 %v1905_v55  ;;  %v1917_v10 = vand.u32 2147483648, %v1905_v55  ;;  %v1915_v12 = vand.u32 2147483647, %v1905_v55  ;;  %vm1911_vm14 = vweird.f32 %v1905_v55 }
 0x898   : > { %v1887_v53 = vmul.f32 %v2831_v36, %v1885_v40  ;;  %vm1892_vm9 = vweird.f32 %v2831_v36 }
 0x899   : > { %vm1893_vm11 = vmor %vm1891_vm10, %vm1892_vm9  ;;  %v1918_v11 = vor.u32 1.1754944e-38, %v1917_v10  ;;  %vm1916_vm0 = vcmp.eq.f32.partialorder %v1915_v12, 8.507059e+37  ;;  %v3897_v10 = vld [vmem:[#allocation27_spill] sm:$0xff] }
 0x89a   : > { %v1888_v13 = vsub.f32 1.0, %v1887_v53 }
 0x89c   : > { %v1889_v57 = vmul.f32 %v2831_v36, %v1888_v13 }
 0x89d   : > { %v2833_v34 = vpop.eup %2832 }
 0x89e   : > { %v1907_v16 = vmul.f32 %v2833_v34, %v1905_v55  ;;  %v1890_v30 = vadd.f32 %v2831_v36, %v1889_v57  ;;  %vm1912_vm13 = vweird.f32 %v2833_v34 }
 0x89f   : > { %vm1913_vm15 = vmor %vm1911_vm14, %vm1912_vm13 }
 0x8a0   : > { %v1908_v31 = vsub.f32 1.0, %v1907_v16  ;;  %v1894_v39 = vsel %vm1893_vm11, %v2831_v36, %v1890_v30 }
 0x8a1   : > { %v1899_v62 = vsel %vm1896_vm12, %v1898_v25, %v1894_v39 }
 0x8a2   : > { %v1909_v54 = vmul.f32 %v2833_v34, %v1908_v31  ;;  %v1921_v19 = vmul.f32 %v1899_v62, %v1878_v61 }
 0x8a4   : > { %v1910_v15 = vadd.f32 %v2833_v34, %v1909_v54  ;;  %v1922_v52 = vadd.f32 %v1921_v19, %v564_v47  ;;  %v567_v19 = vadd.f32 %v3897_v10, %v3204_v42 }
 0x8a6   : > { %v1914_v6 = vsel %vm1913_vm15, %v2833_v34, %v1910_v15  ;;  %2834 = vtanh.f32 %v1922_v52 }
 0x8a7   : > { %v1919_v27 = vsel %vm1916_vm0, %v1918_v11, %v1914_v6 }
 0x8a8   : > { %v1924_v59 = vsub.f32 1.0, %v1919_v27  ;;  %v1926_v40 = vmul.f32 %v1919_v27, %v3703_v17 }
 0x8ac   : > { %v2835_v37 = vpop.eup %2834 }
 0x8ad   : > { %v1925_v4 = vmul.f32 %v2835_v37, %v1924_v59 }
 0x8af   : > { %v3743_v24 = vadd.f32 %v1926_v40, %v1925_v4 }
 0x8b1   : > { %2649 = vst [vmem:[%s3222_s17 + $0x58] sm:$0xff] %v3743_v24  ;;  %v1936_v45 = vpack.c.bf16 %v3743_v24, %v3743_v24 }
 0x8b3   : > { %1945 = vmatmul.bf16.vlgmr.msrb.gmra.mxu0 %v1936_v45  ;;  %1958 = vmatmul.bf16.vlgmr.msrb.gmra.mxu1 %v1936_v45 }
 0x8b4   : > { %1971 = vmatmul.bf16.vlgmr.msrb.gmra.mxu2 %v1936_v45  ;;  %2153 = vmatpush.bf16.msrb.mxu0 %v3029_v58 }
 0x8b5   : > { %2222 = vmatpush.bf16.msrb.mxu1 %v2935_v3  ;;  %2235 = vmatpush.bf16.msrb.mxu2 %v2970_v22  ;;  %v3896_v22 = vld [vmem:[#allocation14_spill] sm:$0xff] }
 0x8b8   : > { %2154 = vmatpush.bf16.msrb.mxu0 %v3041_v1 }
 0x8b9   : > { %2223 = vmatpush.bf16.msrb.mxu1 %v2939_v5  ;;  %2236 = vmatpush.bf16.msrb.mxu2 %v2983_v29 }
 0x8bc   : > { %2155 = vmatpush.bf16.msrb.mxu0 %v3053_v9 }
 0x8bd   : > { %2224 = vmatpush.bf16.msrb.mxu1 %v2949_v8  ;;  %2237 = vmatpush.bf16.msrb.mxu2 %v2995_v35  ;;  %v3895_v8 = vld [vmem:[#allocation13_spill] sm:$0xff] }
 0x8c0   : > { %2156 = vmatpush.bf16.msrb.mxu0 %v3063_v14 }
 0x8c1   : > { %2225 = vmatpush.bf16.msrb.mxu1 %v2966_v18  ;;  %2238 = vmatpush.bf16.msrb.mxu2 %v3005_v41  ;;  %v469_v18 = vadd.f32 %v3895_v8, %v3178_v49  ;;  %v3898_v8 = vld [vmem:[#allocation16_spill] sm:$0xff] }
 0x8c4   : > { %2157 = vmatpush.bf16.msrb.mxu0 %v3072_v21 }
 0x8c5   : > { %2226 = vmatpush.bf16.msrb.mxu1 %v2978_v26  ;;  %2239 = vmatpush.bf16.msrb.mxu2 %v3015_v48  ;;  %v518_v26 = vadd.f32 %v3896_v22, %v3188_v60 }
 0x8c8   : > { %2158 = vmatpush.bf16.msrb.mxu0 %v3079_v28 }
 0x8c9   : > { %2227 = vmatpush.bf16.msrb.mxu1 %v2990_v32  ;;  %2240 = vmatpush.bf16.msrb.mxu2 %v3026_v56 }
 0x8cc   : > { %2159 = vmatpush.bf16.msrb.mxu0 %v3089_v33 }
 0x8cd   : > { %2228 = vmatpush.bf16.msrb.mxu1 %v3000_v38  ;;  %2241 = vmatpush.bf16.msrb.mxu2 %v3038_v63 }
 0x8d0   : > { %2160 = vmatpush.bf16.msrb.mxu0 %v3099_v23 }
 0x8d1   : > { %2229 = vmatpush.bf16.msrb.mxu1 %v3010_v44  ;;  %2242 = vmatpush.bf16.msrb.mxu2 %v3051_v7 }
 0x930   : > { %v1946_v3 = vpop.f32.mrf.mxu0  ;;  %v1959_v5 = vpop.f32.mrf.mxu1 }
 0x931   : > { %v1947_v29 = vadd.f32 %v1946_v3, %v3180_v50  ;;  %v1960_v32 = vadd.f32 %v1959_v5, %v3190_v0 }
 0x933   : > { %v1976_v35 = vadd.f32 %v1947_v29, %v469_v18  ;;  %v1996_v38 = vadd.f32 %v1960_v32, %v518_v26  ;;  %v520_v18 = vadd.f32 %v3898_v8, %v3188_v60 }
 0x935   : > { %v2650_v41 = vmul.f32 -1.442695, %v1976_v35  ;;  %v2651_v48 = vmul.f32 -1.442695, %v1996_v38 }
 0x937   : > { %2836 = vpow2.f32 %v2650_v41  ;;  %v1972_v44 = vpop.f32.mrf.mxu2 }
 0x938   : > { %2838 = vpow2.f32 %v2651_v48  ;;  %v1948_v56 = vpop.f32.mrf.mxu0  ;;  %v1961_v63 = vpop.f32.mrf.mxu1  ;;  %v1973_v51 = vadd.f32 %v1972_v44, %v3206_v43 }
 0x93d   : > { %v2837_v7 = vpop.eup %2836 }
 0x93e   : > { %v2839_v17 = vpop.eup %2838  ;;  %v1980_v46 = vadd.f32 1.0, %v2837_v7 }
 0x93f   : > { %v2000_v55 = vadd.f32 1.0, %v2839_v17  ;;  %v1974_v36 = vpop.f32.mrf.mxu2 }
 0x940   : > { %2840 = vrcp.f32 %v1980_v46  ;;  %v1992_v16 = vand.u32 2147483648, %v1980_v46  ;;  %v1990_v25 = vand.u32 2147483647, %v1980_v46  ;;  %vm1986_vm2 = vweird.f32 %v1980_v46 }
 0x941   : > { %2842 = vrcp.f32 %v2000_v55  ;;  %v2012_v12 = vand.u32 2147483648, %v2000_v55  ;;  %vm2006_vm6 = vweird.f32 %v2000_v55  ;;  %v2010_v52 = vand.u32 2147483647, %v2000_v55 }
 0x942   : > { %v1993_v39 = vor.u32 1.1754944e-38, %v1992_v16  ;;  %vm1991_vm4 = vcmp.eq.f32.partialorder %v1990_v25, 8.507059e+37 }
 0x943   : > { %v2013_v27 = vor.u32 1.1754944e-38, %v2012_v12  ;;  %vm2011_vm8 = vcmp.eq.f32.partialorder %v2010_v52, 8.507059e+37 }
 0x946   : > { %v2841_v53 = vpop.eup %2840 }
 0x947   : > { %v2843_v13 = vpop.eup %2842  ;;  %v1982_v20 = vmul.f32 %v2841_v53, %v1980_v46  ;;  %vm1987_vm1 = vweird.f32 %v2841_v53 }
 0x948   : > { %v2002_v57 = vmul.f32 %v2843_v13, %v2000_v55  ;;  %vm1988_vm3 = vmor %vm1986_vm2, %vm1987_vm1  ;;  %vm2007_vm5 = vweird.f32 %v2843_v13 }
 0x949   : > { %v1983_v2 = vsub.f32 1.0, %v1982_v20  ;;  %vm2008_vm7 = vmor %vm2006_vm6, %vm2007_vm5 }
 0x94a   : > { %v2003_v34 = vsub.f32 1.0, %v2002_v57 }
 0x94b   : > { %v1984_v30 = vmul.f32 %v2841_v53, %v1983_v2 }
 0x94c   : > { %v2004_v31 = vmul.f32 %v2843_v13, %v2003_v34 }
 0x94d   : > { %v1985_v61 = vadd.f32 %v2841_v53, %v1984_v30 }
 0x94e   : > { %v2005_v54 = vadd.f32 %v2843_v13, %v2004_v31  ;;  %v3900_v31 = vld [vmem:[#allocation28_spill] sm:$0xff] }
 0x94f   : > { %v1989_v47 = vsel %vm1988_vm3, %v2841_v53, %v1985_v61  ;;  %v569_v61 = vadd.f32 %v3900_v31, %v3204_v42 }
 0x950   : > { %v1994_v62 = vsel %vm1991_vm4, %v1993_v39, %v1989_v47  ;;  %v2009_v6 = vsel %vm2008_vm7, %v2843_v13, %v2005_v54 }
 0x951   : > { %v2016_v15 = vmul.f32 %v1994_v62, %v1973_v51  ;;  %v2014_v59 = vsel %vm2011_vm8, %v2013_v27, %v2009_v6 }
 0x952   : > { %v2019_v37 = vsub.f32 1.0, %v2014_v59  ;;  %v2021_v45 = vmul.f32 %v2014_v59, %v3743_v24 }
 0x953   : > { %v2017_v11 = vadd.f32 %v2016_v15, %v567_v19 }
 0x955   : > { %2844 = vtanh.f32 %v2017_v11 }
 0x95b   : > { %v2845_v4 = vpop.eup %2844 }
 0x95c   : > { %v2020_v40 = vmul.f32 %v2845_v4, %v2019_v37 }
 0x95e   : > { %v3783_v3 = vadd.f32 %v2021_v45, %v2020_v40  ;;  %v3901_v40 = vld [vmem:[#allocation17_spill] sm:$0xff] }
 0x95f   : > { %v474_v45 = vadd.f32 %v3901_v40, %v3178_v49 }
 0x960   : > { %2652 = vst [vmem:[%s3222_s17 + $0x60] sm:$0xff] %v3783_v3  ;;  %v2031_v5 = vpack.c.bf16 %v3783_v3, %v3783_v3 }
 0x962   : > { %2040 = vmatmul.bf16.vlgmr.msra.gmra.mxu3 %v2031_v5  ;;  %2053 = vmatmul.bf16.vlgmr.msra.gmra.mxu0 %v2031_v5 }
 0x963   : > { %2066 = vmatmul.bf16.vlgmr.msra.gmra.mxu1 %v2031_v5  ;;  %2248 = vmatpush.bf16.msra.mxu3 %v3029_v58  ;;  %v3902_v5 = vld [vmem:[#allocation18_spill] sm:$0xff] }
 0x967   : > { %2249 = vmatpush.bf16.msra.mxu3 %v3041_v1 }
 0x96b   : > { %2250 = vmatpush.bf16.msra.mxu3 %v3053_v9 }
 0x96f   : > { %2251 = vmatpush.bf16.msra.mxu3 %v3063_v14  ;;  %v3899_v14 = vld [vmem:[#allocation15_spill] sm:$0xff] }
 0x970   : > { %v471_v29 = vadd.f32 %v3899_v14, %v3178_v49 }
 0x973   : > { %2252 = vmatpush.bf16.msra.mxu3 %v3072_v21 }
 0x977   : > { %2253 = vmatpush.bf16.msra.mxu3 %v3079_v28 }
 0x97b   : > { %2254 = vmatpush.bf16.msra.mxu3 %v3089_v33 }
 0x97f   : > { %2255 = vmatpush.bf16.msra.mxu3 %v3099_v23 }
 0x9df   : > { %v2054_v24 = vpop.f32.mrf.mxu0 }
 0x9e0   : > { %v2055_v58 = vadd.f32 %v2054_v24, %v3190_v0  ;;  %v2067_v22 = vpop.f32.mrf.mxu1  ;;  %v523_v24 = vadd.f32 %v3902_v5, %v3188_v60 }
 0x9e1   : > { %v2068_v34 = vadd.f32 %v2067_v22, %v3206_v43 }
 0x9e2   : > { %v2091_v1 = vadd.f32 %v2055_v58, %v520_v18 }
 0x9e4   : > { %v2654_v26 = vmul.f32 -1.442695, %v2091_v1 }
 0x9e5   : > { %v2041_v9 = vpop.f32.mrf.mxu3 }
 0x9e6   : > { %2846 = vpow2.f32 %v2654_v26  ;;  %v2042_v21 = vadd.f32 %v2041_v9, %v3180_v50 }
 0x9e7   : > { %v2056_v28 = vpop.f32.mrf.mxu0 }
 0x9e8   : > { %v2071_v33 = vadd.f32 %v2042_v21, %v471_v29  ;;  %v2069_v32 = vpop.f32.mrf.mxu1 }
 0x9ea   : > { %v2653_v23 = vmul.f32 -1.442695, %v2071_v33 }
 0x9ec   : > { %v2847_v35 = vpop.eup %2846  ;;  %2848 = vpow2.f32 %v2653_v23 }
 0x9ed   : > { %v2095_v38 = vadd.f32 1.0, %v2847_v35  ;;  %v2043_v41 = vpop.f32.mrf.mxu3 }
 0x9ef   : > { %2850 = vrcp.f32 %v2095_v38  ;;  %v2107_v39 = vand.u32 2147483648, %v2095_v38  ;;  %vm2101_vm14 = vweird.f32 %v2095_v38  ;;  %v2105_v47 = vand.u32 2147483647, %v2095_v38 }
 0x9f1   : > { %v2108_v10 = vor.u32 1.1754944e-38, %v2107_v39  ;;  %vm2106_vm0 = vcmp.eq.f32.partialorder %v2105_v47, 8.507059e+37 }
 0x9f2   : > { %v2849_v48 = vpop.eup %2848 }
 0x9f3   : > { %v2075_v44 = vadd.f32 1.0, %v2849_v48 }
 0x9f5   : > { %2852 = vrcp.f32 %v2075_v44  ;;  %v2851_v56 = vpop.eup %2850  ;;  %v2087_v36 = vand.u32 2147483648, %v2075_v44  ;;  %v2085_v13 = vand.u32 2147483647, %v2075_v44  ;;  %vm2081_vm10 = vweird.f32 %v2075_v44 }
 0x9f6   : > { %v2097_v63 = vmul.f32 %v2851_v56, %v2095_v38  ;;  %vm2102_vm13 = vweird.f32 %v2851_v56 }
 0x9f7   : > { %v2088_v2 = vor.u32 1.1754944e-38, %v2087_v36  ;;  %vm2086_vm12 = vcmp.eq.f32.partialorder %v2085_v13, 8.507059e+37  ;;  %vm2103_vm15 = vmor %vm2101_vm14, %vm2102_vm13 }
 0x9f8   : > { %v2098_v46 = vsub.f32 1.0, %v2097_v63 }
 0x9fa   : > { %v2099_v20 = vmul.f32 %v2851_v56, %v2098_v46 }
 0x9fb   : > { %v2853_v7 = vpop.eup %2852 }
 0x9fc   : > { %v2077_v17 = vmul.f32 %v2853_v7, %v2075_v44  ;;  %vm2082_vm9 = vweird.f32 %v2853_v7  ;;  %v2100_v30 = vadd.f32 %v2851_v56, %v2099_v20  ;;  %v3903_v20 = vld [vmem:[#allocation29_spill] sm:$0xff] }
 0x9fd   : > { %vm2083_vm11 = vmor %vm2081_vm10, %vm2082_vm9 }
 0x9fe   : > { %v2078_v55 = vsub.f32 1.0, %v2077_v17  ;;  %v2104_v54 = vsel %vm2103_vm15, %v2851_v56, %v2100_v30 }
 0x9ff   : > { %v2109_v19 = vsel %vm2106_vm0, %v2108_v10, %v2104_v54 }
 0xa00   : > { %v2079_v53 = vmul.f32 %v2853_v7, %v2078_v55  ;;  %v2114_v12 = vsub.f32 1.0, %v2109_v19  ;;  %v2116_v11 = vmul.f32 %v2109_v19, %v3783_v3 }
 0xa02   : > { %v2080_v57 = vadd.f32 %v2853_v7, %v2079_v53 }
 0xa04   : > { %v2084_v16 = vsel %vm2083_vm11, %v2853_v7, %v2080_v57  ;;  %v572_v57 = vadd.f32 %v3903_v20, %v3204_v42 }
 0xa05   : > { %v2089_v25 = vsel %vm2086_vm12, %v2088_v2, %v2084_v16 }
 0xa06   : > { %v2111_v51 = vmul.f32 %v2089_v25, %v2068_v34 }
 0xa08   : > { %v2112_v62 = vadd.f32 %v2111_v51, %v569_v61 }
 0xa0a   : > { %2854 = vtanh.f32 %v2112_v62 }
 0xa10   : > { %v2855_v15 = vpop.eup %2854 }
 0xa11   : > { %v2115_v52 = vmul.f32 %v2855_v15, %v2114_v12  ;;  %v3904_v12 = vld [vmem:[#allocation19_spill] sm:$0xff] }
 0xa12   : > { %v476_v15 = vadd.f32 %v3904_v12, %v3178_v49 }
 0xa13   : > { %v3807_v6 = vadd.f32 %v2116_v11, %v2115_v52 }
 0xa15   : > { %2655 = vst [vmem:[%s3222_s17 + $0x68] sm:$0xff] %v3807_v6  ;;  %v2126_v27 = vpack.c.bf16 %v3807_v6, %v3807_v6 }
 0xa17   : > { %2135 = vmatmul.bf16.vlgmr.msra.gmra.mxu2 %v2126_v27  ;;  %2148 = vmatmul.bf16.vlgmr.msrb.gmra.mxu3 %v2126_v27 }
 0xa18   : > { %2161 = vmatmul.bf16.vlgmr.msrb.gmra.mxu0 %v2126_v27 }
 0xa95   : > { %v2162_v59 = vpop.f32.mrf.mxu0 }
 0xa96   : > { %v2163_v55 = vadd.f32 %v2162_v59, %v3206_v43 }
 0xa9a   : > { %v2136_v37 = vpop.f32.mrf.mxu2  ;;  %v2149_v4 = vpop.f32.mrf.mxu3 }
 0xa9b   : > { %v2137_v3 = vadd.f32 %v2136_v37, %v3180_v50  ;;  %v2150_v8 = vadd.f32 %v2149_v4, %v3190_v0 }
 0xa9d   : > { %v2166_v18 = vadd.f32 %v2137_v3, %v474_v45  ;;  %v2186_v58 = vadd.f32 %v2150_v8, %v523_v24  ;;  %v2164_v22 = vpop.f32.mrf.mxu0 }
 0xa9f   : > { %v2656_v1 = vmul.f32 -1.442695, %v2166_v18  ;;  %v2657_v26 = vmul.f32 -1.442695, %v2186_v58 }
 0xaa1   : > { %2856 = vpow2.f32 %v2656_v1 }
 0xaa2   : > { %2858 = vpow2.f32 %v2657_v26  ;;  %v2138_v9 = vpop.f32.mrf.mxu2  ;;  %v2151_v14 = vpop.f32.mrf.mxu3 }
 0xaa7   : > { %v2857_v29 = vpop.eup %2856 }
 0xaa8   : > { %v2859_v21 = vpop.eup %2858  ;;  %v2170_v28 = vadd.f32 1.0, %v2857_v29 }
 0xaa9   : > { %v2190_v33 = vadd.f32 1.0, %v2859_v21 }
 0xaaa   : > { %2860 = vrcp.f32 %v2170_v28  ;;  %v2182_v48 = vand.u32 2147483648, %v2170_v28  ;;  %v2180_v63 = vand.u32 2147483647, %v2170_v28  ;;  %vm2176_vm2 = vweird.f32 %v2170_v28 }
 0xaab   : > { %2862 = vrcp.f32 %v2190_v33  ;;  %v2202_v34 = vand.u32 2147483648, %v2190_v33  ;;  %vm2196_vm6 = vweird.f32 %v2190_v33  ;;  %v2200_v16 = vand.u32 2147483647, %v2190_v33 }
 0xaac   : > { %v2183_v46 = vor.u32 1.1754944e-38, %v2182_v48  ;;  %vm2181_vm4 = vcmp.eq.f32.partialorder %v2180_v63, 8.507059e+37 }
 0xaad   : > { %v2203_v31 = vor.u32 1.1754944e-38, %v2202_v34  ;;  %vm2201_vm8 = vcmp.eq.f32.partialorder %v2200_v16, 8.507059e+37 }
 0xab0   : > { %v2861_v32 = vpop.eup %2860 }
 0xab1   : > { %v2863_v23 = vpop.eup %2862  ;;  %v2172_v35 = vmul.f32 %v2861_v32, %v2170_v28  ;;  %vm2177_vm1 = vweird.f32 %v2861_v32 }
 0xab2   : > { %v2192_v38 = vmul.f32 %v2863_v23, %v2190_v33  ;;  %vm2178_vm3 = vmor %vm2176_vm2, %vm2177_vm1  ;;  %vm2197_vm5 = vweird.f32 %v2863_v23 }
 0xab3   : > { %v2173_v41 = vsub.f32 1.0, %v2172_v35  ;;  %vm2198_vm7 = vmor %vm2196_vm6, %vm2197_vm5  ;;  %v3906_v35 = vld [vmem:[#allocation30_spill] sm:$0xff] }
 0xab4   : > { %v2193_v44 = vsub.f32 1.0, %v2192_v38  ;;  %v574_v38 = vadd.f32 %v3906_v35, %v3204_v42 }
 0xab5   : > { %v2174_v56 = vmul.f32 %v2861_v32, %v2173_v41 }
 0xab6   : > { %v2194_v7 = vmul.f32 %v2863_v23, %v2193_v44 }
 0xab7   : > { %v2175_v17 = vadd.f32 %v2861_v32, %v2174_v56 }
 0xab8   : > { %v2195_v13 = vadd.f32 %v2863_v23, %v2194_v7 }
 0xab9   : > { %v2179_v36 = vsel %vm2178_vm3, %v2861_v32, %v2175_v17 }
 0xaba   : > { %v2184_v53 = vsel %vm2181_vm4, %v2183_v46, %v2179_v36  ;;  %v2199_v25 = vsel %vm2198_vm7, %v2863_v23, %v2195_v13 }
 0xabb   : > { %v2206_v2 = vmul.f32 %v2184_v53, %v2163_v55  ;;  %v2204_v61 = vsel %vm2201_vm8, %v2203_v31, %v2199_v25 }
 0xabc   : > { %v2209_v39 = vsub.f32 1.0, %v2204_v61  ;;  %v2211_v62 = vmul.f32 %v2204_v61, %v3807_v6  ;;  %v3905_v6 = vld [vmem:[#allocation20_spill] sm:$0xff] }
 0xabd   : > { %v2207_v30 = vadd.f32 %v2206_v2, %v572_v57  ;;  %v525_v37 = vadd.f32 %v3905_v6, %v3188_v60 }
 0xabf   : > { %2864 = vtanh.f32 %v2207_v30 }
 0xac5   : > { %v2865_v51 = vpop.eup %2864 }
 0xac6   : > { %v2210_v47 = vmul.f32 %v2865_v51, %v2209_v39 }
 0xac8   : > { %v3823_v54 = vadd.f32 %v2211_v62, %v2210_v47 }
 0xaca   : > { %2658 = vst [vmem:[%s3222_s17 + $0x70] sm:$0xff] %v3823_v54  ;;  %v2221_v10 = vpack.c.bf16 %v3823_v54, %v3823_v54 }
 0xacc   : > { %2230 = vmatmul.bf16.vlgmr.msrb.gmra.mxu1 %v2221_v10  ;;  %2243 = vmatmul.bf16.vlgmr.msrb.gmra.mxu2 %v2221_v10 }
 0xacd   : > { %2256 = vmatmul.bf16.vlgmr.msra.gmra.mxu3 %v2221_v10 }
 0xb49   : > { %v2231_v19 = vpop.f32.mrf.mxu1 }
 0xb4a   : > { %v2232_v52 = vadd.f32 %v2231_v19, %v3180_v50 }
 0xb4c   : > { %v2261_v11 = vadd.f32 %v2232_v52, %v476_v15 }
 0xb4e   : > { %v2659_v27 = vmul.f32 -1.442695, %v2261_v11 }
 0xb4f   : > { %v2244_v59 = vpop.f32.mrf.mxu2 }
 0xb50   : > { %2866 = vpow2.f32 %v2659_v27  ;;  %v2245_v4 = vadd.f32 %v2244_v59, %v3190_v0  ;;  %v2257_v40 = vpop.f32.mrf.mxu3 }
 0xb51   : > { %v2233_v45 = vpop.f32.mrf.mxu1  ;;  %v2258_v32 = vadd.f32 %v2257_v40, %v3206_v43 }
 0xb52   : > { %v2281_v5 = vadd.f32 %v2245_v4, %v525_v37 }
 0xb54   : > { %v2660_v24 = vmul.f32 -1.442695, %v2281_v5 }
 0xb56   : > { %v2867_v3 = vpop.eup %2866  ;;  %2868 = vpow2.f32 %v2660_v24 }
 0xb57   : > { %v2265_v8 = vadd.f32 1.0, %v2867_v3  ;;  %v2246_v18 = vpop.f32.mrf.mxu2 }
 0xb58   : > { %v2259_v49 = vpop.f32.mrf.mxu3 }
 0xb59   : > { %2870 = vrcp.f32 %v2265_v8  ;;  %v2277_v60 = vand.u32 2147483648, %v2265_v8  ;;  %v2275_v0 = vand.u32 2147483647, %v2265_v8  ;;  %vm2271_vm10 = vweird.f32 %v2265_v8 }
 0xb5b   : > { %v2278_v28 = vor.u32 1.1754944e-38, %v2277_v60  ;;  %vm2276_vm12 = vcmp.eq.f32.partialorder %v2275_v0, 8.507059e+37 }
 0xb5c   : > { %v2869_v50 = vpop.eup %2868 }
 0xb5d   : > { %v2285_v58 = vadd.f32 1.0, %v2869_v50 }
 0xb5f   : > { %v2871_v22 = vpop.eup %2870  ;;  %2872 = vrcp.f32 %v2285_v58  ;;  %v2297_v44 = vand.u32 2147483648, %v2285_v58  ;;  %v2295_v63 = vand.u32 2147483647, %v2285_v58  ;;  %vm2291_vm14 = vweird.f32 %v2285_v58 }
 0xb60   : > { %v2267_v1 = vmul.f32 %v2871_v22, %v2265_v8  ;;  %vm2272_vm9 = vweird.f32 %v2871_v22 }
 0xb61   : > { %vm2273_vm11 = vmor %vm2271_vm10, %vm2272_vm9  ;;  %v2298_v46 = vor.u32 1.1754944e-38, %v2297_v44  ;;  %vm2296_vm0 = vcmp.eq.f32.partialorder %v2295_v63, 8.507059e+37 }
 0xb62   : > { %v2268_v26 = vsub.f32 1.0, %v2267_v1 }
 0xb64   : > { %v2269_v9 = vmul.f32 %v2871_v22, %v2268_v26 }
 0xb65   : > { %v2873_v14 = vpop.eup %2872 }
 0xb66   : > { %v2287_v29 = vmul.f32 %v2873_v14, %v2285_v58  ;;  %v2270_v21 = vadd.f32 %v2871_v22, %v2269_v9  ;;  %vm2292_vm13 = vweird.f32 %v2873_v14 }
 0xb67   : > { %vm2293_vm15 = vmor %vm2291_vm14, %vm2292_vm13 }
 0xb68   : > { %v2288_v33 = vsub.f32 1.0, %v2287_v29  ;;  %v2274_v23 = vsel %vm2273_vm11, %v2871_v22, %v2270_v21 }
 0xb69   : > { %v2279_v41 = vsel %vm2276_vm12, %v2278_v28, %v2274_v23 }
 0xb6a   : > { %v2289_v48 = vmul.f32 %v2873_v14, %v2288_v33  ;;  %v2301_v56 = vmul.f32 %v2279_v41, %v2258_v32 }
 0xb6c   : > { %v2290_v7 = vadd.f32 %v2873_v14, %v2289_v48  ;;  %v2302_v17 = vadd.f32 %v2301_v56, %v574_v38 }
 0xb6e   : > { %v2294_v55 = vsel %vm2293_vm15, %v2873_v14, %v2290_v7  ;;  %2874 = vtanh.f32 %v2302_v17 }
 0xb6f   : > { %v2299_v43 = vsel %vm2296_vm0, %v2298_v46, %v2294_v55 }
 0xb70   : > { %v2304_v36 = vsub.f32 1.0, %v2299_v43  ;;  %v2306_v42 = vmul.f32 %v2299_v43, %v3823_v54 }
 0xb74   : > { %v2875_v53 = vpop.eup %2874 }
 0xb75   : > { %v2305_v13 = vmul.f32 %v2875_v53, %v2304_v36 }
 0xb77   : > { %v2307_v20 = vadd.f32 %v2306_v42, %v2305_v13 }
 0xb79   : > { %2661 = vst [vmem:[%s3222_s17 + $0x78] sm:$0xff] %v2307_v20 }
 0xb7a PF: > { %s15_s18 = sadd.s32 1, %s2882_s18  }
 0xb7b   : > { %p12_p4 = scmp.ge.s32.totalorder %s15_s18, 4  }
 0xb7d   :  { %14 = sbr.rel (!%p12_p4) target bundleno = 1 (0x1), region = 113 }

</bundles_post_ra>
